<compile_context>
chip_gen: v7x
topology: tpu7x:2x2x1
jax: 0.10.0
libtpu: 0.0.40
codegen_flags: <defaults>
</compile_context>

<pallas_src>
import functools

import jax
import jax.numpy as jnp
from jax.experimental import pallas as pl
from jax.experimental.pallas import tpu as pltpu

BN_EPS = 1e-5  # torch.nn.BatchNorm1d default eps


def w1_partial_kernel(a_ref, w1_ref, o_ref):
    """Streamed Linear-1 partial GEMM.

    grid = (num_splits, k_steps); axis 0 "parallel" (megacore), axis 1
    "arbitrary" (K reduction).

    a_ref  : (B, tk)  bf16 streamed activation block
    w1_ref : (tk, H)  bf16 streamed W1 tile (the bandwidth-dominant tensor)
    o_ref  : (B, H)   f32 per-split partial; acts as the resident accumulator
                      across the k axis (constant block index along k).
    """
    k = pl.program_id(1)

    @pl.when(k == 0)
    def _():
        o_ref[...] = jnp.zeros_like(o_ref)

    o_ref[...] += jnp.dot(a_ref[...], w1_ref[...],
                          preferred_element_type=jnp.float32)


def epilogue_kernel(p_ref, b1_ref, g_ref, bt_ref, w2_ref, b2_ref, o_ref):
    """Combine partials + bias + BatchNorm1d (training stats) + ReLU + Linear2.

    Everything here is tiny ((B, 640)-sized), single grid step, f32 math.
    """
    h = jnp.sum(p_ref[...], axis=0) + b1_ref[...]          # (B, H)
    # BatchNorm1d, module-default training mode: biased batch statistics.
    mean = jnp.mean(h, axis=0, keepdims=True)
    var = jnp.mean((h - mean) ** 2, axis=0, keepdims=True)
    hn = (h - mean) * jax.lax.rsqrt(var + BN_EPS)
    hn = hn * g_ref[...] + bt_ref[...]
    r = jnp.maximum(hn, 0.0)                                # ReLU
    # Linear 2: lane-dense padded N (multiple of 128) -> unmasked stores.
    out = jnp.dot(r, w2_ref[...], preferred_element_type=jnp.float32)
    out = out + b2_ref[...]
    o_ref[...] = out.astype(o_ref.dtype)


def _default_tk():
    """Per-generation K-tile default for the W1 stream (sweepable)."""
    try:
        kind = jax.devices()[0].device_kind.lower()
    except Exception:  # pragma: no cover - conservative fallback
        return 4096
    if "v5" in kind:
        return 2048   # ~820 GB/s: 2.6 MiB tile already ~3.2 us >> step overhead
    if "v7" in kind:
        return 8192   # 3.2 TB/s/TC: amortize per-step overhead; 21 MiB buffers
    return 4096       # v6e and others


def mlp_head(x, w1, b1, gamma, beta, w2, b2, *, tk=None, num_splits=2):
    """Fused Linear(K->640) -> BatchNorm1d -> ReLU -> Linear(640->NOUT).

    `w1` is expected to already be in the streaming dtype (bf16), converted
    once at parameter-init time (NOT per call).
    """
    B, K = x.shape
    H = w1.shape[1]          # 640
    NOUT = w2.shape[1]       # num_joints * 2
    NOUT_P = pl.cdiv(NOUT, 128) * 128   # lane-dense output width

    if K % num_splits != 0:
        num_splits = 1
    K_s = K // num_splits

    if tk is None:
        tk = _default_tk()
    tk = min(tk, K_s)
    while tk > 8 and K_s % tk != 0:
        tk //= 2
    if K_s % tk != 0 or tk % 8 != 0:
        # Fallback for odd shapes: single full-K block (full-dim block is
        # always layout-legal).
        num_splits, K_s, tk = 1, K, K
    k_steps = K_s // tk

    # Activation cast to the W1 streaming dtype; tiny (B=2) vs the W1 bytes.
    a = x.astype(w1.dtype)
    w1_itemsize = jnp.dtype(w1.dtype).itemsize
    a_itemsize = jnp.dtype(a.dtype).itemsize

    cost = pl.CostEstimate(
        flops=2 * B * K * H,
        transcendentals=0,
        bytes_accessed=(K * H * w1_itemsize        # W1 stream -- dominant
                        + B * K * a_itemsize       # activation
                        + num_splits * B * H * 4), # partial outputs
    )

    # ---- Stage 1: streamed per-split partial GEMM (HBM-bandwidth bound) ----
    partials = pl.pallas_call(
        w1_partial_kernel,
        out_shape=jax.ShapeDtypeStruct((num_splits, B, H), jnp.float32),
        grid_spec=pltpu.PrefetchScalarGridSpec(
            num_scalar_prefetch=0,
            grid=(num_splits, k_steps),
            in_specs=[
                # Activation: small (B, tk) block per step (~KB-scale DMA).
                pl.BlockSpec((B, tk), lambda s, k: (0, s * k_steps + k)),
                # W1: the streamed, bandwidth-dominant tensor (double-buffered
                # by default; 2 x tk x 640 x 2B in flight).
                pl.BlockSpec((tk, H), lambda s, k: (s * k_steps + k, 0)),
            ],
            # Per-split f32 partial, resident across the k (reduction) axis.
            out_specs=pl.BlockSpec((None, B, H), lambda s, k: (s, 0, 0)),
        ),
        compiler_params=pltpu.CompilerParams(
            dimension_semantics=("parallel", "arbitrary"),
            vmem_limit_bytes=40 * 1024 * 1024),
        cost_estimate=cost,
    )(a, w1)

    # ---- Stage 2: tiny epilogue kernel (combine + bias + BN + ReLU + L2) ----
    b1_r = b1.reshape(1, H).astype(jnp.float32)
    gamma_r = gamma.reshape(1, H).astype(jnp.float32)
    beta_r = beta.reshape(1, H).astype(jnp.float32)
    w2_r = w2.astype(jnp.float32)
    b2_r = b2.reshape(1, NOUT).astype(jnp.float32)
    if NOUT_P != NOUT:
        w2_r = jnp.pad(w2_r, ((0, 0), (0, NOUT_P - NOUT)))
        b2_r = jnp.pad(b2_r, ((0, 0), (0, NOUT_P - NOUT)))

    out_p = pl.pallas_call(
        epilogue_kernel,
        out_shape=jax.ShapeDtypeStruct((B, NOUT_P), jnp.float32),
    )(partials, b1_r, gamma_r, beta_r, w2_r, b2_r)

    return out_p[:, :NOUT]


def baseline_forward(feat, params, num_joints):
    """Equivalent of Baseline.forward, from the backbone feature map onward."""
    B = feat.shape[0]
    feat_flat = feat.reshape(B, -1)                 # nn.Flatten (NCHW C-major)
    pose = mlp_head(feat_flat, *params)             # (B, num_joints * 2)
    return pose.reshape(B, num_joints, 2)           # .view(-1, num_joints, 2)


def baseline_forward_ref(feat, params, num_joints):
    """Plain-JAX reference with the SAME numerics policy as the kernel
    (bf16 W1/activation for Linear-1, f32 accumulation / BN / Linear-2)."""
    w1, b1, gamma, beta, w2, b2 = params
    B = feat.shape[0]
    a = feat.reshape(B, -1).astype(w1.dtype)
    h = jnp.dot(a, w1, preferred_element_type=jnp.float32) + b1
    mean = jnp.mean(h, axis=0, keepdims=True)
    var = jnp.mean((h - mean) ** 2, axis=0, keepdims=True)
    hn = (h - mean) * jax.lax.rsqrt(var + BN_EPS) * gamma + beta
    r = jnp.maximum(hn, 0.0)
    out = r @ w2 + b2
    return out.reshape(B, num_joints, 2)


if __name__ == "__main__":
    # Small synthetic config (structure matches the module):
    #   res_layers=34 would give reg_in_channels=512; scaled down to C=32 here
    #   so the test stays small while still exercising the split/tiled grid
    #   (K = C * 16 * 16, the MLP_in_channels formula).
    #   cfg.DATASET.NUM_JOINTS = 21  ->  self.num_joints = 42, output dim 84.
    B, C, HSP, WSP = 2, 32, 16, 16
    NUM_JOINTS = 21 * 2            # self.num_joints
    NOUT = NUM_JOINTS * 2          # final linear width (84)
    K = C * HSP * WSP              # MLP_in_channels (8192)
    HID = 640

    key = jax.random.PRNGKey(0)
    kf, k1, kb1, k2, kb2 = jax.random.split(key, 5)

    feat = jax.random.normal(kf, (B, C, HSP, WSP), dtype=jnp.float32)

    # Deterministic synthetic parameter init (not a checkpoint load).
    # Perf fix #1: W1 is converted to bf16 ONCE here, outside the jitted
    # forward, so no per-call f32->bf16 convert competes with the kernel for
    # HBM bandwidth.
    w1 = (jax.random.normal(k1, (K, HID), dtype=jnp.float32)
          / jnp.sqrt(K)).astype(jnp.bfloat16)
    b1 = jax.random.normal(kb1, (HID,), dtype=jnp.float32) * 0.01
    gamma = jnp.ones((HID,), dtype=jnp.float32)       # BatchNorm1d weight init
    beta = jnp.zeros((HID,), dtype=jnp.float32)       # BatchNorm1d bias init
    w2 = jax.random.normal(k2, (HID, NOUT), dtype=jnp.float32) / jnp.sqrt(HID)
    b2 = jax.random.normal(kb2, (NOUT,), dtype=jnp.float32) * 0.01

    params = (w1, b1, gamma, beta, w2, b2)

    run = jax.jit(functools.partial(baseline_forward, num_joints=NUM_JOINTS))
    out = jax.block_until_ready(run(feat, params))

    assert out.shape == (B, NUM_JOINTS, 2), out.shape

    # Compare against a reference with matching bf16-W1 numerics (training-mode
    # BatchNorm over a 2-sample batch is very sensitive to Linear-1
    # perturbations, so the reference uses the same streamed-operand dtype).
    ref = jax.block_until_ready(baseline_forward_ref(feat, params, NUM_JOINTS))
    max_err = float(jnp.max(jnp.abs(out - ref)))
    assert jnp.allclose(out, ref, rtol=1e-2, atol=1e-2), max_err

    print("KERNEL_OK")
</pallas_src>

<mosaic_0001>
module attributes {stable_mosaic.version = 11 : i64} {
  func.func @w1_partial_kernel(%arg0: i32, %arg1: i32, %arg2: memref<2x4096xbf16, #tpu.memory_space<vmem>>, %arg3: memref<4096x640xbf16, #tpu.memory_space<vmem>>, %arg4: memref<1x2x640xf32, #tpu.memory_space<vmem>>) attributes {dimension_semantics = [#tpu.dimension_semantics<parallel>, #tpu.dimension_semantics<arbitrary>], iteration_bounds = array<i64: 2, 1>, scalar_prefetch = 0 : i64, scratch_operands = 0 : i64, tpu.core_type = #tpu.core_type<tc>, window_params = [{transform_indices = @transform_0, window_bounds = array<i64: 2, 4096>}, {transform_indices = @transform_1, window_bounds = array<i64: 4096, 640>}, {transform_indices = @transform_2, window_bounds = array<i64: 1, 2, 640>}]} {
    %c0_i32 = arith.constant 0 : i32
    %0 = arith.cmpi eq, %arg1, %c0_i32 : i32
    %1 = arith.extui %0 : i1 to i32
    %c0_i32_0 = arith.constant 0 : i32
    %2 = arith.cmpi ne, %1, %c0_i32_0 : i32
    scf.if %2 {
      %cst_10 = arith.constant 0.000000e+00 : f32
      %12 = vector.broadcast %cst_10 : f32 to vector<2x640xf32>
      %c0_11 = arith.constant 0 : index
      %c0_12 = arith.constant 0 : index
      %c0_13 = arith.constant 0 : index
      %13 = vector.load %arg4[%c0_11, %c0_12, %c0_13] : memref<1x2x640xf32, #tpu.memory_space<vmem>>, vector<1x2x640xf32>
      %14 = vector.shape_cast %13 : vector<1x2x640xf32> to vector<2x640xf32>
      %15 = vector.shape_cast %12 : vector<2x640xf32> to vector<1x2x640xf32>
      tpu.vector_store %arg4[%c0_11, %c0_12, %c0_13], %15 {strides = array<i32>} : memref<1x2x640xf32, #tpu.memory_space<vmem>>, vector<1x2x640xf32>,
    } else {
    }
    %c0 = arith.constant 0 : index
    %c0_1 = arith.constant 0 : index
    %c0_2 = arith.constant 0 : index
    %3 = vector.load %arg4[%c0, %c0_1, %c0_2] : memref<1x2x640xf32, #tpu.memory_space<vmem>>, vector<1x2x640xf32>
    %4 = vector.shape_cast %3 : vector<1x2x640xf32> to vector<2x640xf32>
    %c0_3 = arith.constant 0 : index
    %c0_4 = arith.constant 0 : index
    %5 = vector.load %arg2[%c0_3, %c0_4] : memref<2x4096xbf16, #tpu.memory_space<vmem>>, vector<2x4096xbf16>
    %c0_5 = arith.constant 0 : index
    %c0_6 = arith.constant 0 : index
    %6 = vector.load %arg3[%c0_5, %c0_6] : memref<4096x640xbf16, #tpu.memory_space<vmem>>, vector<4096x640xbf16>
    %cst = arith.constant dense<0.000000e+00> : vector<2x640xf32>
    %7 = tpu.matmul %5, %6, %cst {dimension_numbers = #tpu.dot_dimension_numbers<[1], [0], [0], [1], [0, 0, 1, 1], [], []>} : vector<2x4096xbf16>, vector<4096x640xbf16>, vector<2x640xf32> -> vector<2x640xf32>
    %8 = arith.addf %4, %7 : vector<2x640xf32>
    %c0_7 = arith.constant 0 : index
    %c0_8 = arith.constant 0 : index
    %c0_9 = arith.constant 0 : index
    %9 = vector.load %arg4[%c0_7, %c0_8, %c0_9] : memref<1x2x640xf32, #tpu.memory_space<vmem>>, vector<1x2x640xf32>
    %10 = vector.shape_cast %9 : vector<1x2x640xf32> to vector<2x640xf32>
    %11 = vector.shape_cast %8 : vector<2x640xf32> to vector<1x2x640xf32>
    tpu.vector_store %arg4[%c0_7, %c0_8, %c0_9], %11 {strides = array<i32>} : memref<1x2x640xf32, #tpu.memory_space<vmem>>, vector<1x2x640xf32>,
    return
  }
  func.func @transform_0(%arg0: i32, %arg1: i32) -> (i32, i32) {
    %c1_i32 = arith.constant 1 : i32
    %0 = arith.muli %arg0, %c1_i32 : i32
    %1 = arith.addi %0, %arg1 : i32
    %c0_i32 = arith.constant 0 : i32
    %c0_i32_0 = arith.constant 0 : i32
    return %c0_i32, %1 : i32, i32
  }
  func.func @transform_1(%arg0: i32, %arg1: i32) -> (i32, i32) {
    %c1_i32 = arith.constant 1 : i32
    %0 = arith.muli %arg0, %c1_i32 : i32
    %1 = arith.addi %0, %arg1 : i32
    %c0_i32 = arith.constant 0 : i32
    %c0_i32_0 = arith.constant 0 : i32
    return %1, %c0_i32 : i32, i32
  }
  func.func @transform_2(%arg0: i32, %arg1: i32) -> (i32, i32, i32) {
    %c0_i32 = arith.constant 0 : i32
    %c0_i32_0 = arith.constant 0 : i32
    %c0_i32_1 = arith.constant 0 : i32
    return %arg0, %c0_i32, %c0_i32_0 : i32, i32, i32
  }
}

module attributes {stable_mosaic.version = 11 : i64} {
  func.func @epilogue_kernel(%arg0: memref<2x2x640xf32, #tpu.memory_space<vmem>>, %arg1: memref<1x640xf32, #tpu.memory_space<vmem>>, %arg2: memref<1x640xf32, #tpu.memory_space<vmem>>, %arg3: memref<1x640xf32, #tpu.memory_space<vmem>>, %arg4: memref<640x128xf32, #tpu.memory_space<vmem>>, %arg5: memref<1x128xf32, #tpu.memory_space<vmem>>, %arg6: memref<2x128xf32, #tpu.memory_space<vmem>>) attributes {dimension_semantics = [], scalar_prefetch = 0 : i64, scratch_operands = 0 : i64, tpu.core_type = #tpu.core_type<tc>} {
    %c0 = arith.constant 0 : index
    %c0_0 = arith.constant 0 : index
    %c0_1 = arith.constant 0 : index
    %0 = vector.load %arg0[%c0, %c0_0, %c0_1] : memref<2x2x640xf32, #tpu.memory_space<vmem>>, vector<2x2x640xf32>
    %cst = arith.constant dense<0.000000e+00> : vector<2x640xf32>
    %1 = vector.multi_reduction <add>, %0, %cst [0] : vector<2x2x640xf32> to vector<2x640xf32>
    %c0_2 = arith.constant 0 : index
    %c0_3 = arith.constant 0 : index
    %2 = vector.load %arg1[%c0_2, %c0_3] : memref<1x640xf32, #tpu.memory_space<vmem>>, vector<1x640xf32>
    %3 = vector.broadcast %2 : vector<1x640xf32> to vector<2x640xf32>
    %4 = arith.addf %1, %3 : vector<2x640xf32>
    %cst_4 = arith.constant dense<0.000000e+00> : vector<640xf32>
    %5 = vector.multi_reduction <add>, %4, %cst_4 [0] : vector<2x640xf32> to vector<640xf32>
    %6 = vector.shape_cast %5 : vector<640xf32> to vector<1x640xf32>
    %cst_5 = arith.constant 2.000000e+00 : f32
    %7 = vector.broadcast %cst_5 : f32 to vector<1x640xf32>
    %8 = arith.divf %6, %7 : vector<1x640xf32>
    %9 = vector.broadcast %8 : vector<1x640xf32> to vector<2x640xf32>
    %10 = arith.subf %4, %9 : vector<2x640xf32>
    %11 = arith.mulf %10, %10 : vector<2x640xf32>
    %cst_6 = arith.constant dense<0.000000e+00> : vector<640xf32>
    %12 = vector.multi_reduction <add>, %11, %cst_6 [0] : vector<2x640xf32> to vector<640xf32>
    %13 = vector.shape_cast %12 : vector<640xf32> to vector<1x640xf32>
    %cst_7 = arith.constant 2.000000e+00 : f32
    %14 = vector.broadcast %cst_7 : f32 to vector<1x640xf32>
    %15 = arith.divf %13, %14 : vector<1x640xf32>
    %16 = vector.broadcast %8 : vector<1x640xf32> to vector<2x640xf32>
    %17 = arith.subf %4, %16 : vector<2x640xf32>
    %cst_8 = arith.constant 9.99999974E-6 : f32
    %18 = vector.broadcast %cst_8 : f32 to vector<1x640xf32>
    %19 = arith.addf %15, %18 : vector<1x640xf32>
    %20 = math.rsqrt %19 : vector<1x640xf32>
    %21 = vector.broadcast %20 : vector<1x640xf32> to vector<2x640xf32>
    %22 = arith.mulf %17, %21 : vector<2x640xf32>
    %c0_9 = arith.constant 0 : index
    %c0_10 = arith.constant 0 : index
    %23 = vector.load %arg2[%c0_9, %c0_10] : memref<1x640xf32, #tpu.memory_space<vmem>>, vector<1x640xf32>
    %24 = vector.broadcast %23 : vector<1x640xf32> to vector<2x640xf32>
    %25 = arith.mulf %22, %24 : vector<2x640xf32>
    %c0_11 = arith.constant 0 : index
    %c0_12 = arith.constant 0 : index
    %26 = vector.load %arg3[%c0_11, %c0_12] : memref<1x640xf32, #tpu.memory_space<vmem>>, vector<1x640xf32>
    %27 = vector.broadcast %26 : vector<1x640xf32> to vector<2x640xf32>
    %28 = arith.addf %25, %27 : vector<2x640xf32>
    %cst_13 = arith.constant 0.000000e+00 : f32
    %29 = vector.broadcast %cst_13 : f32 to vector<2x640xf32>
    %30 = arith.maximumf %28, %29 : vector<2x640xf32>
    %c0_14 = arith.constant 0 : index
    %c0_15 = arith.constant 0 : index
    %31 = vector.load %arg4[%c0_14, %c0_15] : memref<640x128xf32, #tpu.memory_space<vmem>>, vector<640x128xf32>
    %cst_16 = arith.constant dense<0.000000e+00> : vector<2x128xf32>
    %32 = tpu.matmul %30, %31, %cst_16 {dimension_numbers = #tpu.dot_dimension_numbers<[1], [0], [0], [1], [0, 0, 1, 1], [], []>} : vector<2x640xf32>, vector<640x128xf32>, vector<2x128xf32> -> vector<2x128xf32>
    %c0_17 = arith.constant 0 : index
    %c0_18 = arith.constant 0 : index
    %33 = vector.load %arg5[%c0_17, %c0_18] : memref<1x128xf32, #tpu.memory_space<vmem>>, vector<1x128xf32>
    %34 = vector.broadcast %33 : vector<1x128xf32> to vector<2x128xf32>
    %35 = arith.addf %32, %34 : vector<2x128xf32>
    %c0_19 = arith.constant 0 : index
    %c0_20 = arith.constant 0 : index
    %36 = vector.load %arg6[%c0_19, %c0_20] : memref<2x128xf32, #tpu.memory_space<vmem>>, vector<2x128xf32>
    tpu.vector_store %arg6[%c0_19, %c0_20], %35 {strides = array<i32>} : memref<2x128xf32, #tpu.memory_space<vmem>>, vector<2x128xf32>,
    return
  }
}

</mosaic_0001>

<bundles_post_ra>
// kernel: baseline_forward.3
= control target key start
LH: loop header
LB: loop body
LE: loop exit
PB: predicated region body
PF: predicated region fallthrough
CT: control target
= control target key end

     0   :  { %v843_v42 = vmov 1983009808   ;;  %v35_v44 = vlaneseq  ;;  %vm89_vm0 = vcmask 1041408   ;;  %vm845_vm1 = vmmov 0   ;;  %s1262_s4 = inlined_call_operand.vmem [shape: f32[640,128], index: 4, kind: input, shape index: {}]   ;;  %s1263_s0 = inlined_call_operand.vmem [shape: f32[2,2,640], index: 0, kind: input, shape index: {}]   ;;  %s1264_s1 = inlined_call_operand.vmem [shape: f32[1,640], index: 1, kind: input, shape index: {}]   ;;  %s1265_s2 = inlined_call_operand.vmem [shape: f32[1,640], index: 2, kind: input, shape index: {}]   ;;  %s1266_s3 = inlined_call_operand.vmem [shape: f32[1,640], index: 3, kind: input, shape index: {}]   ;;  %s1267_s5 = inlined_call_operand.vmem [shape: f32[1,128], index: 5, kind: input, shape index: {}]   ;;  %s1268_s6 = inlined_call_operand.vmem [shape: f32[2,128], index: 6, kind: output, shape index: {}]  }
   0x1   :  { %v328_v0 = vld [vmem:[%s1262_s4 + $0x80] sm:$0xff]  ;;  %v329_v1 = vld [vmem:[%s1262_s4 + $0x88] sm:$0xff]  ;;  %v330_v9 = vld [vmem:[%s1262_s4 + $0x90] sm:$0xff]  ;;  %v33_v43 = vunpack.c.l.s4 %v843_v42 }
   0x2   :  { %v312_v2 = vld [vmem:[%s1262_s4] sm:$0xff]  ;;  %v739_v3 = vpack.c.bf16 %v329_v1, %v328_v0  ;;  %v313_v4 = vld [vmem:[%s1262_s4 + $0x8] sm:$0xff]  ;;  %v331_v10 = vld [vmem:[%s1262_s4 + $0x98] sm:$0xff]  ;;  %v996_v58 = vshrl.u32 %v35_v44, 7 }
   0x3   :  { %v360_v5 = vld [vmem:[%s1262_s4 + $0x180] sm:$0xff]  ;;  %v361_v6 = vld [vmem:[%s1262_s4 + $0x188] sm:$0xff]  ;;  %v741_v7 = vpack.c.bf16 %v313_v4, %v312_v2  ;;  %v743_v12 = vpack.c.bf16 %v331_v10, %v330_v9  ;;  %v314_v14 = vld [vmem:[%s1262_s4 + $0x10] sm:$0xff]  ;;  %v34_v57 = vunpack.c.0.s8 %v33_v43 }
   0x4   :  { %v771_v8 = vpack.c.bf16 %v361_v6, %v360_v5  ;;  %v344_v11 = vld [vmem:[%s1262_s4 + $0x100] sm:$0xff]  ;;  %740 = vmatprep.subr.bf16.mxu0 %v739_v3  ;;  %v345_v13 = vld [vmem:[%s1262_s4 + $0x108] sm:$0xff]  ;;  %v315_v15 = vld [vmem:[%s1262_s4 + $0x18] sm:$0xff] }
   0x5   :  { %742 = vmatpush3.bf16.msra.mxu0 %v741_v7  ;;  %v773_v16 = vpack.c.bf16 %v345_v13, %v344_v11  ;;  %v745_v17 = vpack.c.bf16 %v315_v15, %v314_v14  ;;  %v362_v18 = vld [vmem:[%s1262_s4 + $0x190] sm:$0xff]  ;;  %v363_v19 = vld [vmem:[%s1262_s4 + $0x198] sm:$0xff]  ;;  %v332_v20 = vld [vmem:[%s1262_s4 + $0xa0] sm:$0xff] }
   0x6   :  { %772 = vmatprep.subr.bf16.mxu1 %v771_v8  ;;  %744 = vmatprep.subr.bf16.mxu0 %v743_v12  ;;  %v775_v21 = vpack.c.bf16 %v363_v19, %v362_v18  ;;  %v333_v22 = vld [vmem:[%s1262_s4 + $0xa8] sm:$0xff]  ;;  %v346_v23 = vld [vmem:[%s1262_s4 + $0x110] sm:$0xff]  ;;  %v347_v24 = vld [vmem:[%s1262_s4 + $0x118] sm:$0xff]  ;;  %v1026_v8 = vsub.s32 %v34_v57, %v996_v58 }
   0x7   :  { %774 = vmatpush3.bf16.msra.mxu1 %v773_v16  ;;  %v747_v25 = vpack.c.bf16 %v333_v22, %v332_v20  ;;  %v777_v26 = vpack.c.bf16 %v347_v24, %v346_v23  ;;  %v316_v27 = vld [vmem:[%s1262_s4 + $0x20] sm:$0xff]  ;;  %v317_v28 = vld [vmem:[%s1262_s4 + $0x28] sm:$0xff]  ;;  %v334_v31 = vld [vmem:[%s1262_s4 + $0xb0] sm:$0xff] }
   0x8   :  { %v364_v29 = vld [vmem:[%s1262_s4 + $0x1a0] sm:$0xff]  ;;  %776 = vmatprep.subr.bf16.mxu1 %v775_v21  ;;  %v365_v30 = vld [vmem:[%s1262_s4 + $0x1a8] sm:$0xff]  ;;  %v335_v32 = vld [vmem:[%s1262_s4 + $0xb8] sm:$0xff]  ;;  %v749_v33 = vpack.c.bf16 %v317_v28, %v316_v27  ;;  %v1071_v27 = vsub.s32 1, %v996_v58 }
   0x9   :  { %746 = vmatpush3.bf16.msra.mxu0 %v745_v17  ;;  %v779_v34 = vpack.c.bf16 %v365_v30, %v364_v29  ;;  %v348_v35 = vld [vmem:[%s1262_s4 + $0x120] sm:$0xff]  ;;  %v349_v36 = vld [vmem:[%s1262_s4 + $0x128] sm:$0xff]  ;;  %v318_v37 = vld [vmem:[%s1262_s4 + $0x30] sm:$0xff]  ;;  %v751_v38 = vpack.c.bf16 %v335_v32, %v334_v31  ;;  %v1047_v17 = vsub.s32 0, %v996_v58  ;;  %v1075_v31 = vsub.s32 2, %v996_v58 }
   0xa   :  { %748 = vmatprep.subr.bf16.mxu0 %v747_v25  ;;  %v319_v39 = vld [vmem:[%s1262_s4 + $0x38] sm:$0xff]  ;;  %v366_v40 = vld [vmem:[%s1262_s4 + $0x1b0] sm:$0xff]  ;;  %v781_v45 = vpack.c.bf16 %v349_v36, %v348_v35  ;;  %v336_v46 = vld [vmem:[%s1262_s4 + $0xc0] sm:$0xff] }
   0xb   :  { %v367_v41 = vld [vmem:[%s1262_s4 + $0x1b8] sm:$0xff]  ;;  %778 = vmatpush3.bf16.msra.mxu1 %v777_v26  ;;  %v337_v47 = vld [vmem:[%s1262_s4 + $0xc8] sm:$0xff]  ;;  %v350_v49 = vld [vmem:[%s1262_s4 + $0x130] sm:$0xff]  ;;  %v753_v51 = vpack.c.bf16 %v319_v39, %v318_v37 }
   0xc   :  { %780 = vmatprep.subr.bf16.mxu1 %v779_v34  ;;  %v783_v48 = vpack.c.bf16 %v367_v41, %v366_v40  ;;  %v351_v50 = vld [vmem:[%s1262_s4 + $0x138] sm:$0xff]  ;;  %v368_v52 = vld [vmem:[%s1262_s4 + $0x1c0] sm:$0xff]  ;;  %v369_v53 = vld [vmem:[%s1262_s4 + $0x1c8] sm:$0xff]  ;;  %v755_v54 = vpack.c.bf16 %v337_v47, %v336_v46 }
   0xd   :  { %750 = vmatpush3.bf16.msra.mxu0 %v749_v33  ;;  %v320_v55 = vld [vmem:[%s1262_s4 + $0x40] sm:$0xff]  ;;  %v321_v56 = vld [vmem:[%s1262_s4 + $0x48] sm:$0xff]  ;;  %v785_v59 = vpack.c.bf16 %v351_v50, %v350_v49  ;;  %v338_v60 = vld [vmem:[%s1262_s4 + $0xd0] sm:$0xff]  ;;  %v787_v62 = vpack.c.bf16 %v369_v53, %v368_v52 }
   0xe   :  { %752 = vmatprep.subr.bf16.mxu0 %v751_v38  ;;  %v339_v61 = vld [vmem:[%s1262_s4 + $0xd8] sm:$0xff]  ;;  %v352_v63 = vld [vmem:[%s1262_s4 + $0x140] sm:$0xff]  ;;  %v353_v0 = vld [vmem:[%s1262_s4 + $0x148] sm:$0xff]  ;;  %v757_v1 = vpack.c.bf16 %v321_v56, %v320_v55  ;;  %v1111_v55 = vsub.s32 3, %v996_v58 }
   0xf   :  { %782 = vmatpush3.bf16.msra.mxu1 %v781_v45  ;;  %v370_v2 = vld [vmem:[%s1262_s4 + $0x1d0] sm:$0xff]  ;;  %v371_v3 = vld [vmem:[%s1262_s4 + $0x1d8] sm:$0xff]  ;;  %v759_v4 = vpack.c.bf16 %v339_v61, %v338_v60  ;;  %v340_v7 = vld [vmem:[%s1262_s4 + $0xe0] sm:$0xff]  ;;  %v789_v9 = vpack.c.bf16 %v353_v0, %v352_v63 }
  0x10   :  { %784 = vmatprep.subr.bf16.mxu1 %v783_v48  ;;  %v322_v5 = vld [vmem:[%s1262_s4 + $0x50] sm:$0xff]  ;;  %v323_v6 = vld [vmem:[%s1262_s4 + $0x58] sm:$0xff]  ;;  %v341_v10 = vld [vmem:[%s1262_s4 + $0xe8] sm:$0xff]  ;;  %v791_v13 = vpack.c.bf16 %v371_v3, %v370_v2 }
  0x11   :  { %754 = vmatpush3.bf16.msra.mxu0 %v753_v51  ;;  %v354_v11 = vld [vmem:[%s1262_s4 + $0x150] sm:$0xff]  ;;  %v355_v12 = vld [vmem:[%s1262_s4 + $0x158] sm:$0xff]  ;;  %v324_v14 = vld [vmem:[%s1262_s4 + $0x60] sm:$0xff]  ;;  %v761_v18 = vpack.c.bf16 %v323_v6, %v322_v5  ;;  %v763_v22 = vpack.c.bf16 %v341_v10, %v340_v7 }
  0x12   :  { %756 = vmatprep.subr.bf16.mxu0 %v755_v54  ;;  %v325_v15 = vld [vmem:[%s1262_s4 + $0x68] sm:$0xff]  ;;  %v372_v16 = vld [vmem:[%s1262_s4 + $0x1e0] sm:$0xff]  ;;  %v342_v20 = vld [vmem:[%s1262_s4 + $0xf0] sm:$0xff]  ;;  %v793_v29 = vpack.c.bf16 %v355_v12, %v354_v11  ;;  %v1127_v12 = vsub.s32 4, %v996_v58 }
  0x13   :  { %786 = vmatpush3.bf16.msra.mxu1 %v785_v59  ;;  %v373_v19 = vld [vmem:[%s1262_s4 + $0x1e8] sm:$0xff]  ;;  %v23_v21 = vld [vmem:[%s1263_s0] sm:$0xff]  ;;  %v343_v23 = vld [vmem:[%s1262_s4 + $0xf8] sm:$0xff]  ;;  %v765_v38 = vpack.c.bf16 %v325_v15, %v324_v14 }
  0x14   :  { %788 = vmatprep.subr.bf16.mxu1 %v787_v62  ;;  %v25_v24 = vld [vmem:[%s1263_s0 + $0xa] sm:$0xff]  ;;  %v38_v25 = vrot.slane %v23_v21, %v1026_v8  ;;  %v1068_v26 = vld [vmem:[%s1264_s1] sm:$0x1f]  ;;  %v31_v28 = vcombine.high %v23_v21, %v23_v21  ;;  %v795_v32 = vpack.c.bf16 %v373_v19, %v372_v16  ;;  %v767_v39 = vpack.c.bf16 %v343_v23, %v342_v20  ;;  %v375_v41 = vld [vmem:[%s1262_s4 + $0x1f8] sm:$0xff] }
  0x15   :  { %758 = vmatpush3.bf16.msra.mxu0 %v757_v1  ;;  %v62_v30 = vrot.slane %v25_v24, %v1026_v8  ;;  %v356_v33 = vld [vmem:[%s1262_s4 + $0x160] sm:$0xff]  ;;  %v357_v34 = vld [vmem:[%s1262_s4 + $0x168] sm:$0xff]  ;;  %v110_v37 = vrot.slane %v1068_v26, %v1047_v17  ;;  %v374_v40 = vld [vmem:[%s1262_s4 + $0x1f0] sm:$0xff]  ;;  %v114_v47 = vrot.slane %v1068_v26, %v1071_v27  ;;  %v55_v54 = vcombine.high %v25_v24, %v25_v24 }
  0x16   :  { %760 = vmatprep.subr.bf16.mxu0 %v759_v4  ;;  %v46_v35 = vcombine.high %v38_v25, %v38_v25  ;;  %v90_v36 = vsel %vm89_vm0, %v38_v25, 0.0  ;;  %v326_v44 = vld [vmem:[%s1262_s4 + $0x70] sm:$0xff]  ;;  %v327_v45 = vld [vmem:[%s1262_s4 + $0x78] sm:$0xff]  ;;  %v45_v49 = vrot.slane %v31_v28, %v1026_v8  ;;  %v797_v50 = vpack.c.bf16 %v357_v34, %v356_v33 }
  0x17   :  { %790 = vmatpush3.bf16.msra.mxu1 %v789_v9  ;;  %v70_v42 = vcombine.high %v62_v30, %v62_v30  ;;  %v91_v43 = vsel %vm89_vm0, %v62_v30, 0.0  ;;  %v358_v52 = vld [vmem:[%s1262_s4 + $0x170] sm:$0xff]  ;;  %v359_v53 = vld [vmem:[%s1262_s4 + $0x178] sm:$0xff]  ;;  %v799_v56 = vpack.c.bf16 %v375_v41, %v374_v40  ;;  %v769_v61 = vpack.c.bf16 %v327_v45, %v326_v44 }
  0x18   :  { %792 = vmatprep.subr.bf16.mxu1 %v791_v13  ;;  %v93_v46 = vsel %vm89_vm0, %v46_v35, 0.0  ;;  %v92_v48 = vadd.f32 %v91_v43, %v90_v36  ;;  %v47_v60 = vcombine.high %v45_v49, %v45_v49  ;;  %v69_v62 = vrot.slane %v55_v54, %v1026_v8  ;;  %v614_v11 = vld.sshfl [vmem:[%s1263_s0 + $0x8] sm:$0x3 pattern:$0x76325410] }
  0x19   :  { %762 = vmatpush3.bf16.msra.mxu0 %v761_v18  ;;  %v94_v51 = vsel %vm89_vm0, %v70_v42, 0.0  ;;  %v96_v63 = vsel %vm89_vm0, %v45_v49, 0.0  ;;  %v801_v1 = vpack.c.bf16 %v359_v53, %v358_v52  ;;  %v118_v3 = vrot.slane %v1068_v26, %v1075_v31  ;;  %v615_v16 = vld.sshfl [vmem:[%s1263_s0 + $0x12] sm:$0x3 pattern:$0x76325410] }
  0x1a   :  { %764 = vmatprep.subr.bf16.mxu0 %v763_v22  ;;  %v95_v57 = vadd.f32 %v94_v51, %v93_v46  ;;  %v132_v59 = vadd.f32 %v110_v37, %v92_v48  ;;  %v71_v5 = vcombine.high %v69_v62, %v69_v62  ;;  %v99_v6 = vsel %vm89_vm0, %v47_v60, 0.0 }
  0x1b   :  { %794 = vmatpush3.bf16.msra.mxu1 %v793_v29  ;;  %v97_v7 = vsel %vm89_vm0, %v69_v62, 0.0  ;;  %v122_v9 = vrot.slane %v1068_v26, %v1111_v55  ;;  %v844_v18 = vmov 0.0|0.0   ;;  %v102_v58 = vsel %vm89_vm0, %v614_v11, 0.0 }
  0x1c   :  { %796 = vmatprep.subr.bf16.mxu1 %v795_v32  ;;  %v133_v0 = vadd.f32 %v114_v47, %v95_v57  ;;  %v137_v2 = vsel %vm89_vm0, %v132_v59, 0.0  ;;  %v98_v10 = vadd.f32 %v97_v7, %v96_v63  ;;  %v100_v15 = vsel %vm89_vm0, %v71_v5, 0.0 }
  0x1d   :  { %766 = vmatpush3.bf16.msra.mxu0 %v765_v38  ;;  %v138_v4 = vrot.slane %v137_v2, 4  ;;  %v101_v19 = vadd.f32 %v100_v15, %v99_v6  ;;  %v103_v25 = vsel %vm89_vm0, %v615_v16, 0.0  ;;  %v126_v28 = vrot.slane %v1068_v26, %v1127_v12 }
  0x1e   :  { %768 = vmatprep.subr.bf16.mxu0 %v767_v39  ;;  %v144_v8 = vsel %vm89_vm0, %v133_v0, 0.0  ;;  %v134_v20 = vadd.f32 %v118_v3, %v98_v10  ;;  %v104_v33 = vadd.f32 %v103_v25, %v102_v58 }
  0x1f   :  { %798 = vmatpush3.bf16.msra.mxu1 %v797_v50  ;;  %v145_v13 = vrot.slane %v144_v8, 4  ;;  %v139_v14 = vadd.f32 %v138_v4, %v137_v2  ;;  %v135_v23 = vadd.f32 %v122_v9, %v101_v19 }
  0x20   :  { %800 = vmatprep.subr.bf16.mxu1 %v799_v56  ;;  %v151_v24 = vsel %vm89_vm0, %v134_v20, 0.0  ;;  %v136_v39 = vadd.f32 %v126_v28, %v104_v33 }
  0x21   :  { %770 = vmatpush3.bf16.msra.mxu0 %v769_v61  ;;  %v146_v21 = vadd.f32 %v145_v13, %v144_v8  ;;  %v140_v22 = vrot.slane %v139_v14, 2  ;;  %v152_v32 = vrot.slane %v151_v24, 4  ;;  %v158_v34 = vsel %vm89_vm0, %v135_v23, 0.0 }
  0x22   :  { %803 = vmatprep.subr.bf16.mxu0 %v844_v18  ;;  %v159_v37 = vrot.slane %v158_v34, 4  ;;  %v165_v44 = vsel %vm89_vm0, %v136_v39, 0.0 }
  0x23   :  { %802 = vmatpush3.bf16.msra.mxu1 %v801_v1  ;;  %v147_v29 = vrot.slane %v146_v21, 2  ;;  %v141_v30 = vadd.f32 %v140_v22, %v139_v14  ;;  %v153_v38 = vadd.f32 %v152_v32, %v151_v24  ;;  %v166_v48 = vrot.slane %v165_v44, 4 }
  0x24   :  { %v160_v42 = vadd.f32 %v159_v37, %v158_v34 }
  0x25   :  { %v148_v35 = vadd.f32 %v147_v29, %v146_v21  ;;  %v142_v36 = vrot.slane %v141_v30, 1  ;;  %v154_v43 = vrot.slane %v153_v38, 2  ;;  %v167_v53 = vadd.f32 %v166_v48, %v165_v44 }
  0x26   :  { %v161_v26 = vrot.slane %v160_v42, 2 }
  0x27   :  { %v149_v40 = vrot.slane %v148_v35, 1  ;;  %v143_v41 = vadd.f32 %v142_v36, %v141_v30  ;;  %v155_v47 = vadd.f32 %v154_v43, %v153_v38  ;;  %v168_v61 = vrot.slane %v167_v53, 2 }
  0x28   :  { %v162_v51 = vadd.f32 %v161_v26, %v160_v42 }
  0x29   :  { %v150_v45 = vadd.f32 %v149_v40, %v148_v35  ;;  %v173_v46 = vmul.f32 0.5, %v143_v41  ;;  %v156_v52 = vrot.slane %v155_v47, 1  ;;  %v169_v3 = vadd.f32 %v168_v61, %v167_v53 }
  0x2a   :  { %v163_v57 = vrot.slane %v162_v51, 1 }
  0x2b   :  { %v174_v49 = vmul.f32 0.5, %v150_v45  ;;  %v1141_v50 = vsub.f32 %v132_v59, %v173_v46  ;;  %v157_v60 = vadd.f32 %v156_v52, %v155_v47  ;;  %v170_v8 = vrot.slane %v169_v3, 1 }
  0x2c   :  { %v164_v1 = vadd.f32 %v163_v57, %v162_v51 }
  0x2d   :  { %v1143_v54 = vsub.f32 %v133_v0, %v174_v49  ;;  %v183_v56 = vmul.f32 %v1141_v50, %v1141_v50  ;;  %v175_v2 = vmul.f32 0.5, %v157_v60  ;;  %v171_v14 = vadd.f32 %v170_v8, %v169_v3  ;;  %v1169_v60 = vld [vmem:[%s1265_s2] sm:$0x1f] }
  0x2e   :  { %v176_v5 = vmul.f32 0.5, %v164_v1 }
  0x2f   :  { %v184_v62 = vmul.f32 %v1143_v54, %v1143_v54  ;;  %v188_v63 = vsel %vm89_vm0, %v183_v56, 0.0  ;;  %v1151_v0 = vsub.f32 %v134_v20, %v175_v2  ;;  %v177_v22 = vmul.f32 0.5, %v171_v14  ;;  %v376_v14 = vld [vmem:[%s1262_s4 + $0x200] sm:$0xff] }
  0x30   :  { %v189_v59 = vrot.slane %v188_v63, 4  ;;  %v1153_v9 = vsub.f32 %v135_v23, %v176_v5 }
  0x31   :  { %v195_v4 = vsel %vm89_vm0, %v184_v62, 0.0  ;;  %v185_v10 = vmul.f32 %v1151_v0, %v1151_v0  ;;  %v1161_v29 = vsub.f32 %v136_v39, %v177_v22  ;;  %v1174_v62 = vld [vmem:[%s1266_s3] sm:$0x1f] }
  0x32   :  { %v196_v6 = vrot.slane %v195_v4, 4  ;;  %v190_v7 = vadd.f32 %v189_v59, %v188_v63  ;;  %v186_v15 = vmul.f32 %v1153_v9, %v1153_v9  ;;  %v248_v63 = vrot.slane %v1169_v60, %v1047_v17 }
  0x33   :  { %v202_v16 = vsel %vm89_vm0, %v185_v10, 0.0  ;;  %v187_v35 = vmul.f32 %v1161_v29, %v1161_v29  ;;  %v252_v59 = vrot.slane %v1169_v60, %v1071_v27 }
  0x34   :  { %v197_v11 = vadd.f32 %v196_v6, %v195_v4  ;;  %v191_v13 = vrot.slane %v190_v7, 2  ;;  %v203_v20 = vrot.slane %v202_v16, 4  ;;  %v209_v58 = vsel %vm89_vm0, %v186_v15, 0.0 }
  0x35   :  { %v210_v25 = vrot.slane %v209_v58, 4  ;;  %v216_v41 = vsel %vm89_vm0, %v187_v35, 0.0  ;;  %v280_v4 = vrot.slane %v1174_v62, %v1047_v17  ;;  %v256_v17 = vrot.slane %v1169_v60, %v1075_v31 }
  0x36   :  { %v198_v19 = vrot.slane %v197_v11, 2  ;;  %v192_v21 = vadd.f32 %v191_v13, %v190_v7  ;;  %v204_v28 = vadd.f32 %v203_v20, %v202_v16  ;;  %v217_v46 = vrot.slane %v216_v41, 4 }
  0x37   :  { %v211_v33 = vadd.f32 %v210_v25, %v209_v58  ;;  %v284_v7 = vrot.slane %v1174_v62, %v1071_v27  ;;  %v292_v25 = vrot.slane %v1174_v62, %v1111_v55  ;;  %v846_v35 = vmov 0.0  }
  0x38   :  { %v199_v24 = vadd.f32 %v198_v19, %v197_v11  ;;  %v193_v23 = vrot.slane %v192_v21, 1  ;;  %v205_v34 = vrot.slane %v204_v28, 2  ;;  %v218_v48 = vadd.f32 %v217_v46, %v216_v41  ;;  %v382_v41 = vld [vmem:[%s1262_s4 + $0x230] sm:$0xff] }
  0x39   :  { %v212_v38 = vrot.slane %v211_v33, 2  ;;  %v288_v19 = vrot.slane %v1174_v62, %v1075_v31 }
  0x3a   :  { %v200_v30 = vrot.slane %v199_v24, 1  ;;  %v194_v32 = vadd.f32 %v193_v23, %v192_v21  ;;  %v206_v40 = vadd.f32 %v205_v34, %v204_v28  ;;  %v219_v52 = vrot.slane %v218_v48, 2 }
  0x3b   :  { %v213_v44 = vadd.f32 %v212_v38, %v211_v33 }
  0x3c   :  { %v201_v36 = vadd.f32 %v200_v30, %v199_v24  ;;  %v223_v37 = vmul.f32 0.5, %v194_v32  ;;  %v207_v45 = vrot.slane %v206_v40, 1  ;;  %v220_v57 = vadd.f32 %v219_v52, %v218_v48  ;;  %v378_v30 = vld [vmem:[%s1262_s4 + $0x210] sm:$0xff]  ;;  %v388_v52 = vld [vmem:[%s1262_s4 + $0x260] sm:$0xff] }
  0x3d   :  { %v214_v26 = vrot.slane %v213_v44, 1 }
  0x3e   :  { %v224_v42 = vmul.f32 0.5, %v201_v36  ;;  %v228_v43 = vadd.f32 1e-05, %v223_v37  ;;  %v208_v47 = vadd.f32 %v207_v45, %v206_v40  ;;  %v221_v1 = vrot.slane %v220_v57, 1  ;;  %v380_v36 = vld [vmem:[%s1262_s4 + $0x220] sm:$0xff]  ;;  %v381_v37 = vld [vmem:[%s1262_s4 + $0x228] sm:$0xff] }
  0x3f   :  { %v215_v49 = vadd.f32 %v214_v26, %v213_v44  ;;  %v810_v40 = vpack.c.bf16 %v381_v37, %v380_v36  ;;  %v384_v44 = vld [vmem:[%s1262_s4 + $0x240] sm:$0xff]  ;;  %v385_v45 = vld [vmem:[%s1262_s4 + $0x248] sm:$0xff]  ;;  %v386_v26 = vld [vmem:[%s1262_s4 + $0x250] sm:$0xff] }
  0x40   :  { %v229_v39 = vadd.f32 1e-05, %v224_v42  ;;  %833 = vrsqrt.f32 %v228_v43  ;;  %v225_v51 = vmul.f32 0.5, %v208_v47  ;;  %v222_v10 = vadd.f32 %v221_v1, %v220_v57  ;;  %v383_v42 = vld [vmem:[%s1262_s4 + $0x238] sm:$0xff] }
  0x41   :  { %v226_v53 = vmul.f32 0.5, %v215_v49  ;;  %v813_v43 = vpack.c.bf16 %v383_v42, %v382_v41  ;;  %v387_v47 = vld [vmem:[%s1262_s4 + $0x258] sm:$0xff]  ;;  %v264_v49 = vrot.slane %v1169_v60, %v1127_v12  ;;  %v296_v57 = vrot.slane %v1174_v62, %v1127_v12 }
  0x42   :  { %835 = vrsqrt.f32 %v229_v39  ;;  %v230_v56 = vadd.f32 1e-05, %v225_v51  ;;  %v227_v21 = vmul.f32 0.5, %v222_v10  ;;  %v816_v39 = vpack.c.bf16 %v385_v45, %v384_v44 }
  0x43   :  { %v231_v61 = vadd.f32 1e-05, %v226_v53  ;;  %v819_v51 = vpack.c.bf16 %v387_v47, %v386_v26  ;;  %v389_v53 = vld [vmem:[%s1262_s4 + $0x268] sm:$0xff] }
  0x44   :  { %837 = vrsqrt.f32 %v230_v56  ;;  %v232_v33 = vadd.f32 1e-05, %v227_v21 }
  0x45   :  { %839 = vrsqrt.f32 %v231_v61  ;;  %v391_v61 = vld [vmem:[%s1262_s4 + $0x278] sm:$0xff] }
  0x46   :  { %841 = vrsqrt.f32 %v232_v33 }
  0x4a   :  { %v834_v2 = vpop.eup %833 }
  0x4b   :  { %v238_v3 = vmul.f32 %v834_v2, %v1141_v50  ;;  %v377_v50 = vld [vmem:[%s1262_s4 + $0x208] sm:$0xff] }
  0x4c   :  { %v836_v5 = vpop.eup %835  ;;  %v804_v58 = vpack.c.bf16 %v377_v50, %v376_v14 }
  0x4d   :  { %v239_v6 = vmul.f32 %v836_v5, %v1143_v54  ;;  %v270_v8 = vmul.f32 %v248_v63, %v238_v3  ;;  %v260_v54 = vrot.slane %v1169_v60, %v1111_v55  ;;  %v390_v60 = vld [vmem:[%s1262_s4 + $0x270] sm:$0xff]  ;;  %v616_v3 = vld [vmem:[%s1267_s5] ss:$0 sm:$0xff] }
  0x4e   :  { %v838_v15 = vpop.eup %837  ;;  %v825_v1 = vpack.c.bf16 %v391_v61, %v390_v60 }
  0x4f   :  { %v271_v11 = vmul.f32 %v252_v59, %v239_v6  ;;  %v302_v13 = vadd.f32 %v280_v4, %v270_v8  ;;  %v240_v16 = vmul.f32 %v838_v15, %v1151_v0  ;;  %v840_v20 = vpop.eup %839  ;;  %v379_v0 = vld [vmem:[%s1262_s4 + $0x218] sm:$0xff] }
  0x50   :  { %v241_v23 = vmul.f32 %v840_v20, %v1153_v9  ;;  %v807_v9 = vpack.c.bf16 %v379_v0, %v378_v30  ;;  %v842_v46 = vpop.eup %841 }
  0x51   :  { %v303_v27 = vadd.f32 %v284_v7, %v271_v11  ;;  %v307_v22 = vmax.f32 %v302_v13, 0.0  ;;  %v272_v28 = vmul.f32 %v256_v17, %v240_v16  ;;  %v242_v48 = vmul.f32 %v842_v46, %v1161_v29 }
  0x52   :  { %v273_v31 = vmul.f32 %v260_v54, %v241_v23  ;;  %v822_v29 = vpack.c.bf16 %v389_v53, %v388_v52 }
  0x53   :  { %v308_v24 = vmax.f32 %v303_v27, 0.0  ;;  %v304_v32 = vadd.f32 %v288_v19, %v272_v28  ;;  %v274_v56 = vmul.f32 %v264_v49, %v242_v48 }
  0x54   :  { %v305_v34 = vadd.f32 %v292_v25, %v273_v31 }
  0x55   :  { %463 = vmatprep.mubr.f32.mxu0 %v308_v24  ;;  %v309_v55 = vmax.f32 %v304_v32, 0.0  ;;  %v306_v63 = vadd.f32 %v296_v57, %v274_v56 }
  0x56   :  { %464 = vmatmul.mubr.f32.vlgmr.msra.gmra.mrb[0].mxu0 %v307_v22  ;;  %v310_v38 = vmax.f32 %v305_v34, 0.0 }
  0x57   :  { %805 = vmatpush3.bf16.msra.mxu0 %v804_v58  ;;  %736 = vmatprep.mubr.msk.f32.mxu0 %vm845_vm1, %v846_v35  ;;  %v311_v2 = vmax.f32 %v306_v63, 0.0 }
  0x58   :  { %806 = vmatprep.subr.bf16.mxu0 %v844_v18  ;;  %533 = vmatprep.mubr.f32.mxu1 %v310_v38 }
  0x59   :  { %534 = vmatmul.mubr.f32.vlgmr.msra.gmra.mrb[0].mxu1 %v309_v55 }
  0x5b   :  { %808 = vmatpush3.bf16.msra.mxu0 %v807_v9 }
  0x5c   :  { %809 = vmatprep.subr.bf16.mxu0 %v844_v18 }
  0x5f   :  { %811 = vmatpush3.bf16.msra.mxu0 %v810_v40 }
  0x60   :  { %812 = vmatprep.subr.bf16.mxu0 %v844_v18 }
  0x63   :  { %814 = vmatpush3.bf16.msra.mxu0 %v813_v43 }
  0x64   :  { %815 = vmatprep.subr.bf16.mxu0 %v844_v18 }
  0x67   :  { %817 = vmatpush3.bf16.msra.mxu0 %v816_v39 }
  0x68   :  { %818 = vmatprep.subr.bf16.mxu0 %v844_v18 }
  0x6b   :  { %820 = vmatpush3.bf16.msra.mxu0 %v819_v51 }
  0x6c   :  { %821 = vmatprep.subr.bf16.mxu0 %v844_v18 }
  0x6f   :  { %823 = vmatpush3.bf16.msra.mxu0 %v822_v29 }
  0x70   :  { %824 = vmatprep.subr.bf16.mxu0 %v844_v18 }
  0x73   :  { %826 = vmatpush3.bf16.msra.mxu0 %v825_v1 }
  0x76   :  { %737 = vmatmul.mubr.f32.vlgmr.msra.gmra.mrb[2].mxu0 %v311_v2 }
 0x129   :  { %v649_v12 = vpop.f32.mrb[0].mxu0 }
 0x12a   :  { %v650_v62 = vpop.f32.mrb[1].mxu0 }
 0x12b   :  { %v651_v59 = vadd.f32 %v650_v62, %v649_v12 }
 0x12c   :  { %v684_v5 = vpop.f32.mrb[0].mxu1 }
 0x12d   :  { %v466_v4 = vadd.f32 %v651_v59, %v616_v3  ;;  %v685_v6 = vpop.f32.mrb[1].mxu1 }
 0x12e   :  { %v686_v7 = vadd.f32 %v685_v6, %v684_v5 }
 0x130   :  { %v536_v8 = vadd.f32 %v686_v7, %v466_v4 }
 0x149   :  { %v605_v10 = vpop.f32.mrb[2].mxu0 }
 0x14a   :  { %v606_v11 = vadd.f32 %v605_v10, %v536_v8  ;;  %v738_v13 = vpop.f32.mrb[3].mxu0 }
 0x14c   :  { %609 = vst [vmem:[%s1268_s6] sm:$0x3] %v606_v11 }

// kernel: baseline_forward.2
= control target key start
LH: loop header
LB: loop body
LE: loop exit
PB: predicated region body
PF: predicated region fallthrough
CT: control target
= control target key end

     0   :  { %7 = vsyncpa [#allocation3], 0  ;;  %s16136_s0 = inlined_call_operand.vmem [shape: bf16[2,8192], index: 0, kind: input, shape index: {}]   ;;  %s16137_s1 = inlined_call_operand.hbm [shape: bf16[8192,640], index: 1, kind: input, shape index: {}]   ;;  %s16138_s2 = inlined_call_operand.vmem [shape: f32[2,2,640], index: 2, kind: output, shape index: {}]  }
   0x1   :  { %9 = vsyncpa [#allocation3 + $0x1], 0  ;;  %s14448_s9 = smov 0   ;;  %s14450_s10 = smov 0  }
   0x2   :  { %s14452_s11 = smov 0   ;;  %s14454_s12 = smov 0  }
   0x3   :  { %s14456_s13 = smov 0   ;;  %s14458_s14 = smov 0  }
   0x4 LB: > { %s10717_s15 = sadd.s32 4294967295, %s14425_s14   ;;  %s27_s16 = sadd.s32 1, %s14421_s13  ;;  %s14425_s14 = sphi %s14458_s14, %s15_s14   ;;  %s14421_s13 = sphi %s14456_s13, %s16145_s13   ;;  %s14417_s12 = sphi %s14454_s12, %s16144_s12   ;;  %s14413_s11 = sphi %s14452_s11, %s16143_s11   ;;  %s14409_s10 = sphi %s14450_s10, %s16142_s10   ;;  %s14405_s9 = sphi %s14448_s9, %s16141_s9  }
   0x5   : > { %p29_p0 = scmp.ge.s32.totalorder %s27_s16, 2  ;;  %s64_s17 = sadd.s32 1, %s14413_s11 }
   0x6   : > { %p71_p1 = scmp.ne.s32.totalorder %s14413_s11, %s14409_s10  ;;  %p72_p2 = scmp.eq.s32.totalorder %s14425_s14, 0 }
   0x7   : > { %s16147_s16 = smov (%p29_p0, %s27_s16), 0  ;;  %p77_p4 = scmp.ne.s32.totalorder %s14409_s10, %s14405_s9 }
   0x8   : > { %p73_p3 = por %p72_p2, %p71_p1  ;;  %s61_s18 = ssub.s32 %s14421_s13, %s16147_s16 }
   0x9   : > { %p78_p5 = scmp.eq.s32.totalorder %s10717_s15, 0  ;;  %p62_p6 = scmp.eq.s32.totalorder %s61_s18, 0 }
   0xa   : > { %p12491_p8 = scmp.lt.s32.totalorder %s14425_s14, 2  ;;  %s137_s21 = sand.u32 1, %s14413_s11  }
   0xb   : > { %p14487_p7 = por %p78_p5, %p77_p4  ;;  %s12482_s22 = smul.u32 163840, %s14421_s13 }
   0xc   : > { %s14493_s20 = scalar_select %p62_p6, %s14413_s11, %s64_s17  }
   0xd   : > { %s12481_s23 = smul.u32 10240, %s137_s21  ;;  %s14500_s26 = scalar_lea.hbm %s16137_s1, %s12482_s22 }
   0xe   : > { %p14502_p9 = pnand %p12491_p8, %p73_p3  ;;  %s14508_s30 = scalar_lea.sflag [#allocation3], %s137_s21 }
   0xf   : > { %s141_s28 = scalar_lea.vmem [#allocation2], %s12481_s23  ;;  %s14345_s3 = scalar_lea.hbm %s14500_s26, 163840 }
  0x10   : > { %s150_s29 = sshll.u32 %s141_s28, 4  ;;  %p14346_p10 = scmp.ne.s32.totalorder %s14500_s26, %s14345_s3  ;;  %s14506_s29 = int_to_ptr.vmem [resolvable:$true] %s150_s29 }
  0x11   : > { %p14347_p11 = pneg %p14502_p9  ;;  %s14350_s6 = scalar_lea.hbm %s16137_s1, 327680 }
  0x12   : > { %p14351_p0 = scmp.lt.u32.totalorder %s14500_s26, %s16137_s1  ;;  %p14352_p1 = scmp.lt.u32.totalorder %s14350_s6, %s14345_s3 }
  0x13   : > { %p14348_p12 = pnand %p14347_p11, %p14346_p10  ;;  %p14354_p3 = scmp.lt.u32.totalorder %s14345_s3, %s14500_s26 }
  0x14   : > { %p14353_p2 = por %p14352_p1, %p14351_p0 }
  0x15   : > { %p14349_p13 = pneg %p14348_p12 }
  0x16   : > { %p14355_p4 = por %p14354_p3, %p14353_p2 }
  0x18   : > { %p14356_p5 = pnand %p14355_p4, %p14349_p13 }
  0x1a   : > { %14359 = shalt.err (!%p14356_p5)
}
  0x1b   : > { %s14360_s9 = scalar_lea.vmem %s14506_s29, 163840  ;;  %s14427_s15 = smov [#allocation2]  }
  0x1c   : > { %p14361_p6 = scmp.ne.s32.totalorder %s14506_s29, %s14360_s9  ;;  %s14365_s17 = sshll.u32 %s14427_s15, 4  ;;  %s14366_s17 = int_to_ptr.vmem [resolvable:$false] %s14365_s17 }
  0x1d   : > { %s14367_s18 = scalar_lea.vmem %s14366_s17, 327680  ;;  %p14368_p12 = scmp.lt.s32.totalorder %s14506_s29, %s14366_s17 }
  0x1e   : > { %p14363_p8 = pnand %p14361_p6, %p14347_p11  ;;  %p14369_p0 = scmp.lt.s32.totalorder %s14367_s18, %s14360_s9 }
  0x20   : > { %p14364_p10 = pneg %p14363_p8  ;;  %p14370_p1 = por %p14369_p0, %p14368_p12 }
  0x22   : > { %p14371_p2 = pnand %p14370_p1, %p14364_p10 }
  0x24   : > { %14374 = shalt.err (!%p14371_p2)
}
  0x25   : > { %s14428_s21 = smov 320   ;;  %s14429_s22 = smov 20  }
  0x26   : > { %12490 = dma.hbm_to_vmem [thread:$0]  (!%p14502_p9), %s14500_s26, 163840, %s14506_s29, %s14508_s30, %s14428_s21, %s14428_s21, %s14429_s22  }
  0x27   : > { %p10724_p11 = scmp.ge.s32.totalorder %s14425_s14, 1  ;;  %p158_p13 = scmp.lt.s32.totalorder %s14425_s14, 3 }
  0x29   : > { %p159_p3 = pnand %p10724_p11, %p158_p13 }
  0x2a   : > { %s164_s23 = sand.u32 (!%p159_p3), 1, %s14409_s10  }
  0x2b   : > { %162 = sbr.rel (%p159_p3) target bundleno = 1556 (0x614), region = 28  ;;  %s165_s25 = scalar_lea.sflag (!%p159_p3), [#allocation3], %s164_s23 }
  0x2c   : > { %s12483_s24 = smul.u32 (!%p159_p3), 10240, %s164_s23 }
  0x2e   : > { %s14539_s28 = scalar_lea.vmem (!%p159_p3), [#allocation2], %s12483_s24 }
  0x32   : > { %14400 = dma.done.wait (%p14487_p7), %s165_s25, 163840  }
  0x33   : > { %14402 = vsyncadd (%p14487_p7), %s165_s25, 4294803456  ;;  %v12545_v0 = vld [vmem:[%s14539_s28 + $0x4] ss:$20 sps:$4 sm:$0xff]   ;;  %v12547_v1 = vld [vmem:[%s14539_s28 + $0xc] ss:$20 sps:$4 sm:$0xff]   ;;  %s10725_s19 = sshll.u32 %s14417_s12, 5  ;;  %v1765_v38 = vlaneseq }
  0x34   : > { %8645 = vmatprep.subr.bf16.mxu0 %v12545_v0  ;;  %v12549_v2 = vld [vmem:[%s14539_s28] ss:$20 sps:$4 sm:$0xff]   ;;  %v12550_v3 = vld [vmem:[%s14539_s28 + $0x8] ss:$20 sps:$4 sm:$0xff]   ;;  %9301 = vmatprep.subr.bf16.mxu1 %v12547_v1  ;;  %v12556_v7 = vld [vmem:[%s14539_s28 + $0x30] ss:$20 sps:$4 sm:$0xff]  }
  0x35   : > { %v12551_v4 = vld [vmem:[%s14539_s28 + $0x2c] ss:$20 sps:$4 sm:$0xff]   ;;  %8646 = vmatpush1.bf16.msra.mxu0 %v12549_v2  ;;  %9302 = vmatpush1.bf16.msra.mxu1 %v12550_v3  ;;  %v12553_v5 = vld [vmem:[%s14539_s28 + $0x34] ss:$20 sps:$4 sm:$0xff]   ;;  %v12559_v9 = vld [vmem:[%s14539_s28 + $0x5c] ss:$20 sps:$4 sm:$0xff]  }
  0x36   : > { %v12555_v6 = vld [vmem:[%s14539_s28 + $0x28] ss:$20 sps:$4 sm:$0xff]   ;;  %8647 = vmatprep.subr.bf16.mxu0 %v12551_v4  ;;  %9303 = vmatprep.subr.bf16.mxu1 %v12553_v5  ;;  %v12561_v10 = vld [vmem:[%s14539_s28 + $0x50] ss:$20 sps:$4 sm:$0xff]   ;;  %v12562_v11 = vld [vmem:[%s14539_s28 + $0x58] ss:$20 sps:$4 sm:$0xff]  }
  0x37   : > { %v12557_v8 = vld [vmem:[%s14539_s28 + $0x54] ss:$20 sps:$4 sm:$0xff]   ;;  %v12563_v12 = vld [vmem:[%s14539_s28 + $0x7c] ss:$20 sps:$4 sm:$0xff]   ;;  %v12565_v13 = vld [vmem:[%s14539_s28 + $0x84] ss:$20 sps:$4 sm:$0xff]  }
  0x38   : > { %v12567_v14 = vld [vmem:[%s14539_s28 + $0x78] ss:$20 sps:$4 sm:$0xff]   ;;  %v12568_v15 = vld [vmem:[%s14539_s28 + $0x80] ss:$20 sps:$4 sm:$0xff]   ;;  %v12574_v19 = vld [vmem:[%s14539_s28 + $0xa8] ss:$20 sps:$4 sm:$0xff]  }
  0x39   : > { %8648 = vmatpush1.bf16.msra.mxu0 %v12555_v6  ;;  %9304 = vmatpush1.bf16.msra.mxu1 %v12556_v7  ;;  %v12569_v16 = vld [vmem:[%s14539_s28 + $0xa4] ss:$20 sps:$4 sm:$0xff]   ;;  %v12571_v17 = vld [vmem:[%s14539_s28 + $0xac] ss:$20 sps:$4 sm:$0xff]   ;;  %v12577_v21 = vld [vmem:[%s14539_s28 + $0xd4] ss:$20 sps:$4 sm:$0xff]  }
  0x3a   : > { %8649 = vmatprep.subr.bf16.mxu0 %v12557_v8  ;;  %9305 = vmatprep.subr.bf16.mxu1 %v12559_v9  ;;  %v12573_v18 = vld [vmem:[%s14539_s28 + $0xa0] ss:$20 sps:$4 sm:$0xff]   ;;  %v12579_v22 = vld [vmem:[%s14539_s28 + $0xc8] ss:$20 sps:$4 sm:$0xff]   ;;  %v12580_v23 = vld [vmem:[%s14539_s28 + $0xd0] ss:$20 sps:$4 sm:$0xff]  }
  0x3b   : > { %v12575_v20 = vld [vmem:[%s14539_s28 + $0xcc] ss:$20 sps:$4 sm:$0xff]   ;;  %v12581_v24 = vld [vmem:[%s14539_s28 + $0xf4] ss:$20 sps:$4 sm:$0xff]   ;;  %v12583_v25 = vld [vmem:[%s14539_s28 + $0xfc] ss:$20 sps:$4 sm:$0xff]  }
  0x3c   : > { %v12585_v26 = vld [vmem:[%s14539_s28 + $0xf0] ss:$20 sps:$4 sm:$0xff]   ;;  %v12586_v27 = vld [vmem:[%s14539_s28 + $0xf8] ss:$20 sps:$4 sm:$0xff]   ;;  %v12592_v31 = vld [vmem:[%s14539_s28 + $0x120] ss:$20 sps:$4 sm:$0xff]  }
  0x3d   : > { %8650 = vmatpush1.bf16.msra.mxu0 %v12561_v10  ;;  %9306 = vmatpush1.bf16.msra.mxu1 %v12562_v11  ;;  %v12587_v28 = vld [vmem:[%s14539_s28 + $0x11c] ss:$20 sps:$4 sm:$0xff]   ;;  %v12589_v29 = vld [vmem:[%s14539_s28 + $0x124] ss:$20 sps:$4 sm:$0xff]   ;;  %v12595_v33 = vld [vmem:[%s14539_s28 + $0x14c] ss:$20 sps:$4 sm:$0xff]  }
  0x3e   : > { %8651 = vmatprep.subr.bf16.mxu0 %v12563_v12  ;;  %9307 = vmatprep.subr.bf16.mxu1 %v12565_v13  ;;  %v12591_v30 = vld [vmem:[%s14539_s28 + $0x118] ss:$20 sps:$4 sm:$0xff]   ;;  %v12597_v34 = vld [vmem:[%s14539_s28 + $0x140] ss:$20 sps:$4 sm:$0xff]   ;;  %v12598_v35 = vld [vmem:[%s14539_s28 + $0x148] ss:$20 sps:$4 sm:$0xff]  }
  0x3f   : > { %v12593_v32 = vld [vmem:[%s14539_s28 + $0x144] ss:$20 sps:$4 sm:$0xff]   ;;  %p196_p7 = scmp.lt.s32.totalorder %s10725_s19, 63  ;;  %v14430_v36 = vmov 1966171168   ;;  %v14585_v43 = vshrl.u32 %v1765_v38, 7 }
  0x40   : > { %v1763_v37 = vunpack.c.l.s4 %v14430_v36  ;;  %v12599_v39 = vld [vmem:[%s14539_s28 + $0x16c] ss:$20 sps:$4 sm:$0xff]   ;;  %v12601_v40 = vld [vmem:[%s14539_s28 + $0x174] ss:$20 sps:$4 sm:$0xff]   ;;  %v12604_v44 = vld [vmem:[%s14539_s28 + $0x170] ss:$20 sps:$4 sm:$0xff]  }
  0x41   : > { %8652 = vmatpush1.bf16.msra.mxu0 %v12567_v14  ;;  %9308 = vmatpush1.bf16.msra.mxu1 %v12568_v15  ;;  %v12603_v41 = vld [vmem:[%s14539_s28 + $0x168] ss:$20 sps:$4 sm:$0xff]   ;;  %s16149_s19 = smov (!%p196_p7, %s10725_s19), 63  ;;  %v12609_v47 = vld [vmem:[%s14539_s28 + $0x190] ss:$20 sps:$4 sm:$0xff]   ;;  %p203_p9 = scmp.lt.s32.totalorder %s14417_s12, 1 }
  0x42   : > { %8653 = vmatprep.subr.bf16.mxu0 %v12569_v16  ;;  %9309 = vmatprep.subr.bf16.mxu1 %v12571_v17  ;;  %v1764_v42 = vunpack.c.0.s8 %v1763_v37  ;;  %v12605_v45 = vld [vmem:[%s14539_s28 + $0x194] ss:$20 sps:$4 sm:$0xff]   ;;  %v12607_v46 = vld [vmem:[%s14539_s28 + $0x19c] ss:$20 sps:$4 sm:$0xff]   ;;  %v12610_v48 = vld [vmem:[%s14539_s28 + $0x198] ss:$20 sps:$4 sm:$0xff]   ;;  %s14595_s29 = scalar_lea.vmem %s16136_s0, %s16149_s19 }
  0x43   : > { %v12611_v50 = vld [vmem:[%s14539_s28 + $0x1bc] ss:$20 sps:$4 sm:$0xff]   ;;  %v12613_v51 = vld [vmem:[%s14539_s28 + $0x1c4] ss:$20 sps:$4 sm:$0xff]   ;;  %v12616_v55 = vld [vmem:[%s14539_s28 + $0x1c0] ss:$20 sps:$4 sm:$0xff]  }
  0x44   : > { %v14598_v49 = vsub.s32 %v1764_v42, %v14585_v43  ;;  %v14603_v52 = vld [vmem:[%s14595_s29] sm:$0xff]  ;;  %v12615_v53 = vld [vmem:[%s14539_s28 + $0x1b8] ss:$20 sps:$4 sm:$0xff]   ;;  %v12622_v61 = vld [vmem:[%s14539_s28 + $0x1e8] ss:$20 sps:$4 sm:$0xff]   ;;  %s16151_s12 = smov (!%p203_p9, %s14417_s12), 1 }
  0x45   : > { %8654 = vmatpush1.bf16.msra.mxu0 %v12573_v18  ;;  %9310 = vmatpush1.bf16.msra.mxu1 %v12574_v19  ;;  %v12617_v56 = vld [vmem:[%s14539_s28 + $0x1e4] ss:$20 sps:$4 sm:$0xff]   ;;  %v12619_v57 = vld [vmem:[%s14539_s28 + $0x1ec] ss:$20 sps:$4 sm:$0xff]   ;;  %v12625_v63 = vld [vmem:[%s14539_s28 + $0x214] ss:$20 sps:$4 sm:$0xff]  }
  0x46   : > { %8655 = vmatprep.subr.bf16.mxu0 %v12575_v20  ;;  %9311 = vmatprep.subr.bf16.mxu1 %v12577_v21  ;;  %v1768_v54 = vrot.slane %v14603_v52, %v14598_v49  ;;  %v12621_v59 = vld [vmem:[%s14539_s28 + $0x1e0] ss:$20 sps:$4 sm:$0xff]   ;;  %v12627_v0 = vld [vmem:[%s14539_s28 + $0x208] ss:$20 sps:$4 sm:$0xff]   ;;  %v12628_v1 = vld [vmem:[%s14539_s28 + $0x210] ss:$20 sps:$4 sm:$0xff]  }
  0x47   : > { %v12623_v62 = vld [vmem:[%s14539_s28 + $0x20c] ss:$20 sps:$4 sm:$0xff]   ;;  %v12629_v2 = vld [vmem:[%s14539_s28 + $0x234] ss:$20 sps:$4 sm:$0xff]   ;;  %v12631_v3 = vld [vmem:[%s14539_s28 + $0x23c] ss:$20 sps:$4 sm:$0xff]  }
  0x48   : > { %v1776_v58 = vcombine.high %v1768_v54, %v1768_v54  ;;  %v12633_v4 = vld [vmem:[%s14539_s28 + $0x230] ss:$20 sps:$4 sm:$0xff]   ;;  %v12634_v5 = vld [vmem:[%s14539_s28 + $0x238] ss:$20 sps:$4 sm:$0xff]   ;;  %v12640_v9 = vld [vmem:[%s14539_s28 + $0x260] ss:$20 sps:$4 sm:$0xff]   ;;  %v14634_v13 = vrot.slane %v1768_v54, %v14598_v49 }
  0x49   : > { %8656 = vmatpush1.bf16.msra.mxu0 %v12579_v22  ;;  %9312 = vmatpush1.bf16.msra.mxu1 %v12580_v23  ;;  %v12635_v6 = vld [vmem:[%s14539_s28 + $0x25c] ss:$20 sps:$4 sm:$0xff]   ;;  %v12637_v7 = vld [vmem:[%s14539_s28 + $0x264] ss:$20 sps:$4 sm:$0xff]   ;;  %v12646_v11 = vld [vmem:[%s14539_s28 + $0x28c] ss:$20 sps:$4 sm:$0xff]  }
  0x4a   : > { %8657 = vmatprep.subr.bf16.mxu0 %v12581_v24  ;;  %9313 = vmatprep.subr.bf16.mxu1 %v12583_v25  ;;  %v14613_v60 = vrot.slane %v1776_v58, %v14598_v49  ;;  %v12639_v8 = vld [vmem:[%s14539_s28 + $0x258] ss:$20 sps:$4 sm:$0xff]   ;;  %v12641_v12 = vld [vmem:[%s14539_s28 + $0x280] ss:$20 sps:$4 sm:$0xff]   ;;  %v12644_v14 = vld [vmem:[%s14539_s28 + $0x288] ss:$20 sps:$4 sm:$0xff]  }
  0x4b   : > { %v12643_v10 = vld [vmem:[%s14539_s28 + $0x284] ss:$20 sps:$4 sm:$0xff]   ;;  %v12649_v15 = vld [vmem:[%s14539_s28 + $0x2ac] ss:$20 sps:$4 sm:$0xff]   ;;  %v12652_v16 = vld [vmem:[%s14539_s28 + $0x2b4] ss:$20 sps:$4 sm:$0xff]  }
  0x4c   : > { %8677 = vmatprep.mubr.bf16.mxu0 %v14613_v60  ;;  %9333 = vmatprep.mubr.bf16.mxu1 %v14613_v60  ;;  %v14641_v17 = vcombine.high %v14613_v60, %v14613_v60  ;;  %v12647_v18 = vld [vmem:[%s14539_s28 + $0x2a8] ss:$20 sps:$4 sm:$0xff]   ;;  %v12650_v19 = vld [vmem:[%s14539_s28 + $0x2b0] ss:$20 sps:$4 sm:$0xff]   ;;  %v12656_v23 = vld [vmem:[%s14539_s28 + $0x2d8] ss:$20 sps:$4 sm:$0xff]  }
  0x4d   : > { %8658 = vmatpush1.bf16.msra.mxu0 %v12585_v26  ;;  %9314 = vmatpush1.bf16.msra.mxu1 %v12586_v27  ;;  %v12655_v20 = vld [vmem:[%s14539_s28 + $0x2d4] ss:$20 sps:$4 sm:$0xff]   ;;  %v12658_v21 = vld [vmem:[%s14539_s28 + $0x2dc] ss:$20 sps:$4 sm:$0xff]   ;;  %v12664_v25 = vld [vmem:[%s14539_s28 + $0x304] ss:$20 sps:$4 sm:$0xff]  }
  0x4e   : > { %8659 = vmatprep.subr.bf16.mxu0 %v12587_v28  ;;  %9315 = vmatprep.subr.bf16.mxu1 %v12589_v29  ;;  %v12653_v22 = vld [vmem:[%s14539_s28 + $0x2d0] ss:$20 sps:$4 sm:$0xff]   ;;  %v12659_v26 = vld [vmem:[%s14539_s28 + $0x2f8] ss:$20 sps:$4 sm:$0xff]   ;;  %v12662_v27 = vld [vmem:[%s14539_s28 + $0x300] ss:$20 sps:$4 sm:$0xff]  }
  0x4f   : > { %v12661_v24 = vld [vmem:[%s14539_s28 + $0x2fc] ss:$20 sps:$4 sm:$0xff]   ;;  %v12667_v28 = vld [vmem:[%s14539_s28 + $0x324] ss:$20 sps:$4 sm:$0xff]   ;;  %v12670_v29 = vld [vmem:[%s14539_s28 + $0x32c] ss:$20 sps:$4 sm:$0xff]  }
  0x50   : > { %v12679_v36 = vld [vmem:[%s14539_s28 + $0x374] ss:$20 sps:$4 sm:$0xff]   ;;  %v12682_v37 = vld [vmem:[%s14539_s28 + $0x37c] ss:$20 sps:$4 sm:$0xff]   ;;  %v12683_v42 = vld [vmem:[%s14539_s28 + $0x398] ss:$20 sps:$4 sm:$0xff]  }
  0x51   : > { %8660 = vmatpush1.bf16.msra.mxu0 %v12591_v30  ;;  %9316 = vmatpush1.bf16.msra.mxu1 %v12592_v31  ;;  %v12665_v30 = vld [vmem:[%s14539_s28 + $0x320] ss:$20 sps:$4 sm:$0xff]   ;;  %v12668_v31 = vld [vmem:[%s14539_s28 + $0x328] ss:$20 sps:$4 sm:$0xff]   ;;  %v12677_v38 = vld [vmem:[%s14539_s28 + $0x370] ss:$20 sps:$4 sm:$0xff]  }
  0x52   : > { %8661 = vmatprep.subr.bf16.mxu0 %v12593_v32  ;;  %9317 = vmatprep.subr.bf16.mxu1 %v12595_v33  ;;  %v12673_v32 = vld [vmem:[%s14539_s28 + $0x34c] ss:$20 sps:$4 sm:$0xff]   ;;  %v12676_v33 = vld [vmem:[%s14539_s28 + $0x354] ss:$20 sps:$4 sm:$0xff]   ;;  %v12698_v54 = vld [vmem:[%s14539_s28 + $0x3f0] ss:$20 sps:$4 sm:$0xff]  }
  0x53   : > { %v12704_v58 = vld [vmem:[%s14539_s28 + $0x418] ss:$20 sps:$4 sm:$0xff]   ;;  %s12484_s30 = smul.u32 10, %s16151_s12 }
  0x55   : > { %8662 = vmatpush1.bf16.msra.mxu0 %v12597_v34  ;;  %9318 = vmatpush1.bf16.msra.mxu1 %v12598_v35  ;;  %v12671_v34 = vld [vmem:[%s14539_s28 + $0x348] ss:$20 sps:$4 sm:$0xff]   ;;  %v12674_v35 = vld [vmem:[%s14539_s28 + $0x350] ss:$20 sps:$4 sm:$0xff]   ;;  %s15926_s5 = scalar_lea.vmem %s16138_s2, %s12484_s30 }
  0x56   : > { %8663 = vmatprep.subr.bf16.mxu0 %v12599_v39  ;;  %9319 = vmatprep.subr.bf16.mxu1 %v12601_v40  ;;  %v12680_v39 = vld [vmem:[%s14539_s28 + $0x378] ss:$20 sps:$4 sm:$0xff]   ;;  %v12685_v40 = vld [vmem:[%s14539_s28 + $0x39c] ss:$20 sps:$4 sm:$0xff]  }
  0x59   : > { %8664 = vmatpush1.bf16.msra.mxu0 %v12603_v41  ;;  %9320 = vmatpush1.bf16.msra.mxu1 %v12604_v44  ;;  %v12688_v41 = vld [vmem:[%s14539_s28 + $0x3a4] ss:$20 sps:$4 sm:$0xff]   ;;  %v12686_v44 = vld [vmem:[%s14539_s28 + $0x3a0] ss:$20 sps:$4 sm:$0xff]  }
  0x5a   : > { %8665 = vmatprep.subr.bf16.mxu0 %v12605_v45  ;;  %9321 = vmatprep.subr.bf16.mxu1 %v12607_v46  ;;  %v12691_v45 = vld [vmem:[%s14539_s28 + $0x3c4] ss:$20 sps:$4 sm:$0xff]   ;;  %v12694_v46 = vld [vmem:[%s14539_s28 + $0x3cc] ss:$20 sps:$4 sm:$0xff]  }
  0x5d   : > { %8666 = vmatpush1.bf16.msra.mxu0 %v12609_v47  ;;  %9322 = vmatpush1.bf16.msra.mxu1 %v12610_v48  ;;  %v12689_v47 = vld [vmem:[%s14539_s28 + $0x3c0] ss:$20 sps:$4 sm:$0xff]   ;;  %v12692_v48 = vld [vmem:[%s14539_s28 + $0x3c8] ss:$20 sps:$4 sm:$0xff]  }
  0x5e   : > { %8667 = vmatprep.subr.bf16.mxu0 %v12611_v50  ;;  %9323 = vmatprep.subr.bf16.mxu1 %v12613_v51  ;;  %v12697_v50 = vld [vmem:[%s14539_s28 + $0x3ec] ss:$20 sps:$4 sm:$0xff]   ;;  %v12700_v51 = vld [vmem:[%s14539_s28 + $0x3f4] ss:$20 sps:$4 sm:$0xff]  }
  0x61   : > { %8668 = vmatpush1.bf16.msra.mxu0 %v12615_v53  ;;  %9324 = vmatpush1.bf16.msra.mxu1 %v12616_v55  ;;  %v12695_v53 = vld [vmem:[%s14539_s28 + $0x3e8] ss:$20 sps:$4 sm:$0xff]  }
  0x62   : > { %8669 = vmatprep.subr.bf16.mxu0 %v12617_v56  ;;  %9325 = vmatprep.subr.bf16.mxu1 %v12619_v57  ;;  %v12703_v55 = vld [vmem:[%s14539_s28 + $0x414] ss:$20 sps:$4 sm:$0xff]   ;;  %v12706_v56 = vld [vmem:[%s14539_s28 + $0x41c] ss:$20 sps:$4 sm:$0xff]  }
  0x63   : > { %v12701_v57 = vld [vmem:[%s14539_s28 + $0x410] ss:$20 sps:$4 sm:$0xff]  }
  0x65   : > { %8670 = vmatpush1.bf16.msra.mxu0 %v12621_v59  ;;  %9326 = vmatpush1.bf16.msra.mxu1 %v12622_v61  ;;  %v12709_v59 = vld [vmem:[%s14539_s28 + $0x43c] ss:$20 sps:$4 sm:$0xff]   ;;  %v12712_v61 = vld [vmem:[%s14539_s28 + $0x444] ss:$20 sps:$4 sm:$0xff]  }
  0x66   : > { %8671 = vmatprep.subr.bf16.mxu0 %v12623_v62  ;;  %9327 = vmatprep.subr.bf16.mxu1 %v12625_v63  ;;  %v12707_v62 = vld [vmem:[%s14539_s28 + $0x438] ss:$20 sps:$4 sm:$0xff]   ;;  %v12710_v63 = vld [vmem:[%s14539_s28 + $0x440] ss:$20 sps:$4 sm:$0xff]  }
  0x69   : > { %8672 = vmatpush1.bf16.msra.mxu0 %v12627_v0  ;;  %9328 = vmatpush1.bf16.msra.mxu1 %v12628_v1  ;;  %v12715_v0 = vld [vmem:[%s14539_s28 + $0x464] ss:$20 sps:$4 sm:$0xff]   ;;  %v12718_v1 = vld [vmem:[%s14539_s28 + $0x46c] ss:$20 sps:$4 sm:$0xff]  }
  0x6a   : > { %8673 = vmatprep.subr.bf16.mxu0 %v12629_v2  ;;  %9329 = vmatprep.subr.bf16.mxu1 %v12631_v3  ;;  %v12713_v2 = vld [vmem:[%s14539_s28 + $0x460] ss:$20 sps:$4 sm:$0xff]   ;;  %v12716_v3 = vld [vmem:[%s14539_s28 + $0x468] ss:$20 sps:$4 sm:$0xff]  }
  0x6d   : > { %8674 = vmatpush1.bf16.msra.mxu0 %v12633_v4  ;;  %9330 = vmatpush1.bf16.msra.mxu1 %v12634_v5  ;;  %v12721_v4 = vld [vmem:[%s14539_s28 + $0x48c] ss:$20 sps:$4 sm:$0xff]   ;;  %v12724_v5 = vld [vmem:[%s14539_s28 + $0x494] ss:$20 sps:$4 sm:$0xff]  }
  0x6e   : > { %8675 = vmatprep.subr.bf16.mxu0 %v12635_v6  ;;  %9331 = vmatprep.subr.bf16.mxu1 %v12637_v7  ;;  %v12719_v6 = vld [vmem:[%s14539_s28 + $0x488] ss:$20 sps:$4 sm:$0xff]   ;;  %v12722_v7 = vld [vmem:[%s14539_s28 + $0x490] ss:$20 sps:$4 sm:$0xff]  }
  0x71   : > { %8676 = vmatpush1.bf16.msra.mxu0 %v12639_v8  ;;  %9332 = vmatpush1.bf16.msra.mxu1 %v12640_v9  ;;  %v12727_v8 = vld [vmem:[%s14539_s28 + $0x4b4] ss:$20 sps:$4 sm:$0xff]   ;;  %v12730_v9 = vld [vmem:[%s14539_s28 + $0x4bc] ss:$20 sps:$4 sm:$0xff]  }
  0x72   : > { %8686 = vmatprep.subr.bf16.mxu0 %v12643_v10  ;;  %9342 = vmatprep.subr.bf16.mxu1 %v12646_v11  ;;  %v1761_v10 = vcombine.high %v14603_v52, %v14603_v52  ;;  %v12725_v11 = vld [vmem:[%s14539_s28 + $0x4b0] ss:$20 sps:$4 sm:$0xff]   ;;  %v12734_v52 = vld [vmem:[%s14539_s28 + $0x4e0] ss:$20 sps:$4 sm:$0xff]  }
  0x74   : > { %8678 = vmatmul.mubr.bf16.vlgmr.msra.gmra.mrb[0].mxu0 %v14634_v13  ;;  %9334 = vmatmul.mubr.bf16.vlgmr.msra.gmra.mrb[0].mxu1 %v14634_v13 }
  0x75   : > { %8687 = vmatpush1.bf16.msra.mxu0 %v12641_v12  ;;  %9343 = vmatpush1.bf16.msra.mxu1 %v12644_v14  ;;  %v12728_v12 = vld [vmem:[%s14539_s28 + $0x4b8] ss:$20 sps:$4 sm:$0xff]   ;;  %v12733_v14 = vld [vmem:[%s14539_s28 + $0x4dc] ss:$20 sps:$4 sm:$0xff]  }
  0x76   : > { %8688 = vmatprep.subr.bf16.mxu0 %v12649_v15  ;;  %9344 = vmatprep.subr.bf16.mxu1 %v12652_v16  ;;  %v12736_v15 = vld [vmem:[%s14539_s28 + $0x4e4] ss:$20 sps:$4 sm:$0xff]   ;;  %v14706_v16 = vrot.slane %v1761_v10, %v14598_v49 }
  0x77   : > { %8718 = vmatprep.mubr.bf16.mxu0 %v14641_v17  ;;  %9374 = vmatprep.mubr.bf16.mxu1 %v14641_v17  ;;  %v12811_v10 = vld [vmem:[%s14539_s28 + $0x6e4] ss:$20 sps:$4 sm:$0xff]  }
  0x79   : > { %8689 = vmatpush1.bf16.msra.mxu0 %v12647_v18  ;;  %9345 = vmatpush1.bf16.msra.mxu1 %v12650_v19  ;;  %v12731_v18 = vld [vmem:[%s14539_s28 + $0x4d8] ss:$20 sps:$4 sm:$0xff]  }
  0x7a   : > { %8690 = vmatprep.subr.bf16.mxu0 %v12655_v20  ;;  %9346 = vmatprep.subr.bf16.mxu1 %v12658_v21  ;;  %v12739_v19 = vld [vmem:[%s14539_s28 + $0x504] ss:$20 sps:$4 sm:$0xff]   ;;  %v12742_v20 = vld [vmem:[%s14539_s28 + $0x50c] ss:$20 sps:$4 sm:$0xff]   ;;  %v1777_v21 = vcombine.high %v14706_v16, %v14706_v16 }
  0x7d   : > { %8691 = vmatpush1.bf16.msra.mxu0 %v12653_v22  ;;  %9347 = vmatpush1.bf16.msra.mxu1 %v12656_v23  ;;  %v12737_v22 = vld [vmem:[%s14539_s28 + $0x500] ss:$20 sps:$4 sm:$0xff]   ;;  %v14717_v23 = vcombine.high %v14634_v13, %v14634_v13 }
  0x7e   : > { %8692 = vmatprep.subr.bf16.mxu0 %v12661_v24  ;;  %9348 = vmatprep.subr.bf16.mxu1 %v12664_v25  ;;  %v12740_v24 = vld [vmem:[%s14539_s28 + $0x508] ss:$20 sps:$4 sm:$0xff]   ;;  %v12745_v25 = vld [vmem:[%s14539_s28 + $0x52c] ss:$20 sps:$4 sm:$0xff]  }
  0x81   : > { %8693 = vmatpush1.bf16.msra.mxu0 %v12659_v26  ;;  %9349 = vmatpush1.bf16.msra.mxu1 %v12662_v27  ;;  %v12748_v26 = vld [vmem:[%s14539_s28 + $0x534] ss:$20 sps:$4 sm:$0xff]   ;;  %v14723_v27 = vrot.slane %v1777_v21, %v14598_v49  ;;  %v12826_v21 = vld [vmem:[%s14539_s28 + $0x73c] ss:$20 sps:$4 sm:$0xff]  }
  0x82   : > { %8694 = vmatprep.subr.bf16.mxu0 %v12667_v28  ;;  %9350 = vmatprep.subr.bf16.mxu1 %v12670_v29  ;;  %v12743_v28 = vld [vmem:[%s14539_s28 + $0x528] ss:$20 sps:$4 sm:$0xff]   ;;  %v12746_v29 = vld [vmem:[%s14539_s28 + $0x530] ss:$20 sps:$4 sm:$0xff]  }
  0x85   : > { %8695 = vmatpush1.bf16.msra.mxu0 %v12665_v30  ;;  %9351 = vmatpush1.bf16.msra.mxu1 %v12668_v31  ;;  %v12751_v30 = vld [vmem:[%s14539_s28 + $0x554] ss:$20 sps:$4 sm:$0xff]   ;;  %v12754_v31 = vld [vmem:[%s14539_s28 + $0x55c] ss:$20 sps:$4 sm:$0xff]  }
  0x86   : > { %8696 = vmatprep.subr.bf16.mxu0 %v12673_v32  ;;  %9352 = vmatprep.subr.bf16.mxu1 %v12676_v33  ;;  %v12749_v32 = vld [vmem:[%s14539_s28 + $0x550] ss:$20 sps:$4 sm:$0xff]   ;;  %v12752_v33 = vld [vmem:[%s14539_s28 + $0x558] ss:$20 sps:$4 sm:$0xff]  }
  0x89   : > { %8697 = vmatpush1.bf16.msra.mxu0 %v12671_v34  ;;  %9353 = vmatpush1.bf16.msra.mxu1 %v12674_v35  ;;  %v12757_v34 = vld [vmem:[%s14539_s28 + $0x57c] ss:$20 sps:$4 sm:$0xff]   ;;  %v12760_v35 = vld [vmem:[%s14539_s28 + $0x584] ss:$20 sps:$4 sm:$0xff]  }
  0x8a   : > { %8698 = vmatprep.subr.bf16.mxu0 %v12679_v36  ;;  %9354 = vmatprep.subr.bf16.mxu1 %v12682_v37  ;;  %v12755_v36 = vld [vmem:[%s14539_s28 + $0x578] ss:$20 sps:$4 sm:$0xff]   ;;  %v12758_v37 = vld [vmem:[%s14539_s28 + $0x580] ss:$20 sps:$4 sm:$0xff]  }
  0x8d   : > { %8699 = vmatpush1.bf16.msra.mxu0 %v12677_v38  ;;  %9355 = vmatpush1.bf16.msra.mxu1 %v12680_v39  ;;  %v12763_v38 = vld [vmem:[%s14539_s28 + $0x5a4] ss:$20 sps:$4 sm:$0xff]   ;;  %v12766_v39 = vld [vmem:[%s14539_s28 + $0x5ac] ss:$20 sps:$4 sm:$0xff]  }
  0x8e   : > { %8700 = vmatprep.subr.bf16.mxu0 %v12685_v40  ;;  %9356 = vmatprep.subr.bf16.mxu1 %v12688_v41  ;;  %v12761_v40 = vld [vmem:[%s14539_s28 + $0x5a0] ss:$20 sps:$4 sm:$0xff]   ;;  %v12764_v41 = vld [vmem:[%s14539_s28 + $0x5a8] ss:$20 sps:$4 sm:$0xff]  }
  0x91   : > { %8701 = vmatpush1.bf16.msra.mxu0 %v12683_v42  ;;  %9357 = vmatpush1.bf16.msra.mxu1 %v12686_v44  ;;  %v12769_v42 = vld [vmem:[%s14539_s28 + $0x5cc] ss:$20 sps:$4 sm:$0xff]   ;;  %v12772_v44 = vld [vmem:[%s14539_s28 + $0x5d4] ss:$20 sps:$4 sm:$0xff]  }
  0x92   : > { %8702 = vmatprep.subr.bf16.mxu0 %v12691_v45  ;;  %9358 = vmatprep.subr.bf16.mxu1 %v12694_v46  ;;  %v12767_v45 = vld [vmem:[%s14539_s28 + $0x5c8] ss:$20 sps:$4 sm:$0xff]   ;;  %v12770_v46 = vld [vmem:[%s14539_s28 + $0x5d0] ss:$20 sps:$4 sm:$0xff]  }
  0x95   : > { %8703 = vmatpush1.bf16.msra.mxu0 %v12689_v47  ;;  %9359 = vmatpush1.bf16.msra.mxu1 %v12692_v48  ;;  %v12775_v47 = vld [vmem:[%s14539_s28 + $0x5f4] ss:$20 sps:$4 sm:$0xff]   ;;  %v12778_v48 = vld [vmem:[%s14539_s28 + $0x5fc] ss:$20 sps:$4 sm:$0xff]  }
  0x96   : > { %8704 = vmatprep.subr.bf16.mxu0 %v12697_v50  ;;  %9360 = vmatprep.subr.bf16.mxu1 %v12700_v51  ;;  %v12773_v50 = vld [vmem:[%s14539_s28 + $0x5f0] ss:$20 sps:$4 sm:$0xff]   ;;  %v12776_v51 = vld [vmem:[%s14539_s28 + $0x5f8] ss:$20 sps:$4 sm:$0xff]  }
  0x99   : > { %8705 = vmatpush1.bf16.msra.mxu0 %v12695_v53  ;;  %9361 = vmatpush1.bf16.msra.mxu1 %v12698_v54  ;;  %v12781_v53 = vld [vmem:[%s14539_s28 + $0x61c] ss:$20 sps:$4 sm:$0xff]   ;;  %v12784_v54 = vld [vmem:[%s14539_s28 + $0x624] ss:$20 sps:$4 sm:$0xff]  }
  0x9a   : > { %8706 = vmatprep.subr.bf16.mxu0 %v12703_v55  ;;  %9362 = vmatprep.subr.bf16.mxu1 %v12706_v56  ;;  %v12779_v55 = vld [vmem:[%s14539_s28 + $0x618] ss:$20 sps:$4 sm:$0xff]   ;;  %v12782_v56 = vld [vmem:[%s14539_s28 + $0x620] ss:$20 sps:$4 sm:$0xff]  }
  0x9d   : > { %8707 = vmatpush1.bf16.msra.mxu0 %v12701_v57  ;;  %9363 = vmatpush1.bf16.msra.mxu1 %v12704_v58  ;;  %v12787_v57 = vld [vmem:[%s14539_s28 + $0x644] ss:$20 sps:$4 sm:$0xff]   ;;  %v12790_v58 = vld [vmem:[%s14539_s28 + $0x64c] ss:$20 sps:$4 sm:$0xff]  }
  0x9e   : > { %8708 = vmatprep.subr.bf16.mxu0 %v12709_v59  ;;  %9364 = vmatprep.subr.bf16.mxu1 %v12712_v61  ;;  %v12785_v59 = vld [vmem:[%s14539_s28 + $0x640] ss:$20 sps:$4 sm:$0xff]   ;;  %v12788_v61 = vld [vmem:[%s14539_s28 + $0x648] ss:$20 sps:$4 sm:$0xff]  }
  0xa1   : > { %8709 = vmatpush1.bf16.msra.mxu0 %v12707_v62  ;;  %9365 = vmatpush1.bf16.msra.mxu1 %v12710_v63  ;;  %v12793_v62 = vld [vmem:[%s14539_s28 + $0x66c] ss:$20 sps:$4 sm:$0xff]   ;;  %v12796_v63 = vld [vmem:[%s14539_s28 + $0x674] ss:$20 sps:$4 sm:$0xff]  }
  0xa2   : > { %8710 = vmatprep.subr.bf16.mxu0 %v12715_v0  ;;  %9366 = vmatprep.subr.bf16.mxu1 %v12718_v1  ;;  %v12791_v0 = vld [vmem:[%s14539_s28 + $0x668] ss:$20 sps:$4 sm:$0xff]   ;;  %v12794_v1 = vld [vmem:[%s14539_s28 + $0x670] ss:$20 sps:$4 sm:$0xff]  }
  0xa5   : > { %8711 = vmatpush1.bf16.msra.mxu0 %v12713_v2  ;;  %9367 = vmatpush1.bf16.msra.mxu1 %v12716_v3  ;;  %v12799_v2 = vld [vmem:[%s14539_s28 + $0x694] ss:$20 sps:$4 sm:$0xff]   ;;  %v12802_v3 = vld [vmem:[%s14539_s28 + $0x69c] ss:$20 sps:$4 sm:$0xff]  }
  0xa6   : > { %8712 = vmatprep.subr.bf16.mxu0 %v12721_v4  ;;  %9368 = vmatprep.subr.bf16.mxu1 %v12724_v5  ;;  %v12797_v4 = vld [vmem:[%s14539_s28 + $0x690] ss:$20 sps:$4 sm:$0xff]   ;;  %v12800_v5 = vld [vmem:[%s14539_s28 + $0x698] ss:$20 sps:$4 sm:$0xff]  }
  0xa9   : > { %8713 = vmatpush1.bf16.msra.mxu0 %v12719_v6  ;;  %9369 = vmatpush1.bf16.msra.mxu1 %v12722_v7  ;;  %v12805_v6 = vld [vmem:[%s14539_s28 + $0x6bc] ss:$20 sps:$4 sm:$0xff]   ;;  %v12808_v7 = vld [vmem:[%s14539_s28 + $0x6c4] ss:$20 sps:$4 sm:$0xff]  }
  0xaa   : > { %8714 = vmatprep.subr.bf16.mxu0 %v12727_v8  ;;  %9370 = vmatprep.subr.bf16.mxu1 %v12730_v9  ;;  %v12803_v8 = vld [vmem:[%s14539_s28 + $0x6b8] ss:$20 sps:$4 sm:$0xff]   ;;  %v12806_v9 = vld [vmem:[%s14539_s28 + $0x6c0] ss:$20 sps:$4 sm:$0xff]  }
  0xad   : > { %8715 = vmatpush1.bf16.msra.mxu0 %v12725_v11  ;;  %9371 = vmatpush1.bf16.msra.mxu1 %v12728_v12  ;;  %v12814_v11 = vld [vmem:[%s14539_s28 + $0x6ec] ss:$20 sps:$4 sm:$0xff]  }
  0xae   : > { %8716 = vmatprep.subr.bf16.mxu0 %v12733_v14  ;;  %9372 = vmatprep.subr.bf16.mxu1 %v12736_v15  ;;  %v12809_v12 = vld [vmem:[%s14539_s28 + $0x6e0] ss:$20 sps:$4 sm:$0xff]   ;;  %v12812_v14 = vld [vmem:[%s14539_s28 + $0x6e8] ss:$20 sps:$4 sm:$0xff]  }
  0xaf   : > { %v12817_v15 = vld [vmem:[%s14539_s28 + $0x70c] ss:$20 sps:$4 sm:$0xff]  }
  0xb1   : > { %8717 = vmatpush1.bf16.msra.mxu0 %v12731_v18  ;;  %9373 = vmatpush1.bf16.msra.mxu1 %v12734_v52  ;;  %v12820_v18 = vld [vmem:[%s14539_s28 + $0x714] ss:$20 sps:$4 sm:$0xff]  }
  0xb2   : > { %8727 = vmatprep.subr.bf16.mxu0 %v12739_v19  ;;  %9383 = vmatprep.subr.bf16.mxu1 %v12742_v20  ;;  %v12815_v52 = vld [vmem:[%s14539_s28 + $0x708] ss:$20 sps:$4 sm:$0xff]   ;;  %v12818_v19 = vld [vmem:[%s14539_s28 + $0x710] ss:$20 sps:$4 sm:$0xff]  }
  0xb3   : > { %v12823_v20 = vld [vmem:[%s14539_s28 + $0x734] ss:$20 sps:$4 sm:$0xff]  }
  0xb4   : > { %8719 = vmatmul.mubr.bf16.vlgmr.msra.gmra.mrb[0].mxu0 %v14717_v23  ;;  %9375 = vmatmul.mubr.bf16.vlgmr.msra.gmra.mrb[0].mxu1 %v14717_v23 }
  0xb5   : > { %8728 = vmatpush1.bf16.msra.mxu0 %v12737_v22  ;;  %9384 = vmatpush1.bf16.msra.mxu1 %v12740_v24  ;;  %v12821_v22 = vld [vmem:[%s14539_s28 + $0x730] ss:$20 sps:$4 sm:$0xff]   ;;  %v12824_v24 = vld [vmem:[%s14539_s28 + $0x738] ss:$20 sps:$4 sm:$0xff]  }
  0xb6   : > { %8729 = vmatprep.subr.bf16.mxu0 %v12745_v25  ;;  %9385 = vmatprep.subr.bf16.mxu1 %v12748_v26  ;;  %v12829_v25 = vld [vmem:[%s14539_s28 + $0x75c] ss:$20 sps:$4 sm:$0xff]   ;;  %v12832_v26 = vld [vmem:[%s14539_s28 + $0x764] ss:$20 sps:$4 sm:$0xff]  }
  0xb7   : > { %8759 = vmatprep.mubr.bf16.mxu0 %v14723_v27  ;;  %9415 = vmatprep.mubr.bf16.mxu1 %v14723_v27 }
  0xb9   : > { %8730 = vmatpush1.bf16.msra.mxu0 %v12743_v28  ;;  %9386 = vmatpush1.bf16.msra.mxu1 %v12746_v29  ;;  %v12827_v28 = vld [vmem:[%s14539_s28 + $0x758] ss:$20 sps:$4 sm:$0xff]   ;;  %v12830_v29 = vld [vmem:[%s14539_s28 + $0x760] ss:$20 sps:$4 sm:$0xff]  }
  0xba   : > { %8731 = vmatprep.subr.bf16.mxu0 %v12751_v30  ;;  %9387 = vmatprep.subr.bf16.mxu1 %v12754_v31  ;;  %v12836_v30 = vld [vmem:[%s14539_s28 + $0x784] ss:$20 sps:$4 sm:$0xff]   ;;  %v12839_v31 = vld [vmem:[%s14539_s28 + $0x78c] ss:$20 sps:$4 sm:$0xff]  }
  0xbd   : > { %8732 = vmatpush1.bf16.msra.mxu0 %v12749_v32  ;;  %9388 = vmatpush1.bf16.msra.mxu1 %v12752_v33  ;;  %v12834_v32 = vld [vmem:[%s14539_s28 + $0x780] ss:$20 sps:$4 sm:$0xff]   ;;  %v14792_v33 = vrot.slane %v14706_v16, %v14598_v49  ;;  %v12840_v16 = vld [vmem:[%s14539_s28 + $0x7a8] ss:$20 sps:$4 sm:$0xff]  }
  0xbe   : > { %8733 = vmatprep.subr.bf16.mxu0 %v12757_v34  ;;  %9389 = vmatprep.subr.bf16.mxu1 %v12760_v35  ;;  %v12837_v34 = vld [vmem:[%s14539_s28 + $0x788] ss:$20 sps:$4 sm:$0xff]   ;;  %v12842_v35 = vld [vmem:[%s14539_s28 + $0x7ac] ss:$20 sps:$4 sm:$0xff]  }
  0xc1   : > { %8734 = vmatpush1.bf16.msra.mxu0 %v12755_v36  ;;  %9390 = vmatpush1.bf16.msra.mxu1 %v12758_v37  ;;  %v12845_v36 = vld [vmem:[%s14539_s28 + $0x7b4] ss:$20 sps:$4 sm:$0xff]   ;;  %v14799_v37 = vcombine.high %v14723_v27, %v14723_v27 }
  0xc2   : > { %8735 = vmatprep.subr.bf16.mxu0 %v12763_v38  ;;  %9391 = vmatprep.subr.bf16.mxu1 %v12766_v39  ;;  %v12843_v38 = vld [vmem:[%s14539_s28 + $0x7b0] ss:$20 sps:$4 sm:$0xff]   ;;  %v12848_v39 = vld [vmem:[%s14539_s28 + $0x7d4] ss:$20 sps:$4 sm:$0xff]  }
  0xc5   : > { %8736 = vmatpush1.bf16.msra.mxu0 %v12761_v40  ;;  %9392 = vmatpush1.bf16.msra.mxu1 %v12764_v41  ;;  %v12851_v40 = vld [vmem:[%s14539_s28 + $0x7dc] ss:$20 sps:$4 sm:$0xff]  }
  0xc6   : > { %8737 = vmatprep.subr.bf16.mxu0 %v12769_v42  ;;  %9393 = vmatprep.subr.bf16.mxu1 %v12772_v44  ;;  %v12846_v41 = vld [vmem:[%s14539_s28 + $0x7d0] ss:$20 sps:$4 sm:$0xff]   ;;  %v12849_v42 = vld [vmem:[%s14539_s28 + $0x7d8] ss:$20 sps:$4 sm:$0xff]  }
  0xc7   : > { %v12854_v44 = vld [vmem:[%s14539_s28 + $0x7fc] ss:$20 sps:$4 sm:$0xff]  }
  0xc9   : > { %8738 = vmatpush1.bf16.msra.mxu0 %v12767_v45  ;;  %9394 = vmatpush1.bf16.msra.mxu1 %v12770_v46  ;;  %v12857_v45 = vld [vmem:[%s14539_s28 + $0x804] ss:$20 sps:$4 sm:$0xff]  }
  0xca   : > { %8739 = vmatprep.subr.bf16.mxu0 %v12775_v47  ;;  %9395 = vmatprep.subr.bf16.mxu1 %v12778_v48  ;;  %v12852_v46 = vld [vmem:[%s14539_s28 + $0x7f8] ss:$20 sps:$4 sm:$0xff]   ;;  %v12855_v47 = vld [vmem:[%s14539_s28 + $0x800] ss:$20 sps:$4 sm:$0xff]  }
  0xcb   : > { %v12860_v48 = vld [vmem:[%s14539_s28 + $0x824] ss:$20 sps:$4 sm:$0xff]  }
  0xcd   : > { %8740 = vmatpush1.bf16.msra.mxu0 %v12773_v50  ;;  %9396 = vmatpush1.bf16.msra.mxu1 %v12776_v51  ;;  %v12863_v50 = vld [vmem:[%s14539_s28 + $0x82c] ss:$20 sps:$4 sm:$0xff]  }
  0xce   : > { %8741 = vmatprep.subr.bf16.mxu0 %v12781_v53  ;;  %9397 = vmatprep.subr.bf16.mxu1 %v12784_v54  ;;  %v12858_v51 = vld [vmem:[%s14539_s28 + $0x820] ss:$20 sps:$4 sm:$0xff]   ;;  %v12861_v53 = vld [vmem:[%s14539_s28 + $0x828] ss:$20 sps:$4 sm:$0xff]  }
  0xcf   : > { %v12866_v54 = vld [vmem:[%s14539_s28 + $0x84c] ss:$20 sps:$4 sm:$0xff]  }
  0xd1   : > { %8742 = vmatpush1.bf16.msra.mxu0 %v12779_v55  ;;  %9398 = vmatpush1.bf16.msra.mxu1 %v12782_v56  ;;  %v12869_v55 = vld [vmem:[%s14539_s28 + $0x854] ss:$20 sps:$4 sm:$0xff]  }
  0xd2   : > { %8743 = vmatprep.subr.bf16.mxu0 %v12787_v57  ;;  %9399 = vmatprep.subr.bf16.mxu1 %v12790_v58  ;;  %v12864_v56 = vld [vmem:[%s14539_s28 + $0x848] ss:$20 sps:$4 sm:$0xff]   ;;  %v12867_v57 = vld [vmem:[%s14539_s28 + $0x850] ss:$20 sps:$4 sm:$0xff]  }
  0xd3   : > { %v12872_v58 = vld [vmem:[%s14539_s28 + $0x874] ss:$20 sps:$4 sm:$0xff]  }
  0xd5   : > { %8744 = vmatpush1.bf16.msra.mxu0 %v12785_v59  ;;  %9400 = vmatpush1.bf16.msra.mxu1 %v12788_v61  ;;  %v12875_v59 = vld [vmem:[%s14539_s28 + $0x87c] ss:$20 sps:$4 sm:$0xff]  }
  0xd6   : > { %8745 = vmatprep.subr.bf16.mxu0 %v12793_v62  ;;  %9401 = vmatprep.subr.bf16.mxu1 %v12796_v63  ;;  %v12870_v61 = vld [vmem:[%s14539_s28 + $0x870] ss:$20 sps:$4 sm:$0xff]   ;;  %v12873_v62 = vld [vmem:[%s14539_s28 + $0x878] ss:$20 sps:$4 sm:$0xff]  }
  0xd7   : > { %v12878_v63 = vld [vmem:[%s14539_s28 + $0x89c] ss:$20 sps:$4 sm:$0xff]  }
  0xd9   : > { %8746 = vmatpush1.bf16.msra.mxu0 %v12791_v0  ;;  %9402 = vmatpush1.bf16.msra.mxu1 %v12794_v1  ;;  %v12881_v0 = vld [vmem:[%s14539_s28 + $0x8a4] ss:$20 sps:$4 sm:$0xff]  }
  0xda   : > { %8747 = vmatprep.subr.bf16.mxu0 %v12799_v2  ;;  %9403 = vmatprep.subr.bf16.mxu1 %v12802_v3  ;;  %v12876_v1 = vld [vmem:[%s14539_s28 + $0x898] ss:$20 sps:$4 sm:$0xff]   ;;  %v12879_v2 = vld [vmem:[%s14539_s28 + $0x8a0] ss:$20 sps:$4 sm:$0xff]  }
  0xdb   : > { %v12884_v3 = vld [vmem:[%s14539_s28 + $0x8c4] ss:$20 sps:$4 sm:$0xff]  }
  0xdd   : > { %8748 = vmatpush1.bf16.msra.mxu0 %v12797_v4  ;;  %9404 = vmatpush1.bf16.msra.mxu1 %v12800_v5  ;;  %v12887_v4 = vld [vmem:[%s14539_s28 + $0x8cc] ss:$20 sps:$4 sm:$0xff]  }
  0xde   : > { %8749 = vmatprep.subr.bf16.mxu0 %v12805_v6  ;;  %9405 = vmatprep.subr.bf16.mxu1 %v12808_v7  ;;  %v12882_v5 = vld [vmem:[%s14539_s28 + $0x8c0] ss:$20 sps:$4 sm:$0xff]   ;;  %v12885_v6 = vld [vmem:[%s14539_s28 + $0x8c8] ss:$20 sps:$4 sm:$0xff]  }
  0xdf   : > { %v12890_v7 = vld [vmem:[%s14539_s28 + $0x8ec] ss:$20 sps:$4 sm:$0xff]  }
  0xe1   : > { %8750 = vmatpush1.bf16.msra.mxu0 %v12803_v8  ;;  %9406 = vmatpush1.bf16.msra.mxu1 %v12806_v9  ;;  %v12893_v8 = vld [vmem:[%s14539_s28 + $0x8f4] ss:$20 sps:$4 sm:$0xff]  }
  0xe2   : > { %8751 = vmatprep.subr.bf16.mxu0 %v12811_v10  ;;  %9407 = vmatprep.subr.bf16.mxu1 %v12814_v11  ;;  %v12888_v9 = vld [vmem:[%s14539_s28 + $0x8e8] ss:$20 sps:$4 sm:$0xff]   ;;  %v12891_v10 = vld [vmem:[%s14539_s28 + $0x8f0] ss:$20 sps:$4 sm:$0xff]  }
  0xe3   : > { %v12896_v11 = vld [vmem:[%s14539_s28 + $0x914] ss:$20 sps:$4 sm:$0xff]  }
  0xe5   : > { %8752 = vmatpush1.bf16.msra.mxu0 %v12809_v12  ;;  %9408 = vmatpush1.bf16.msra.mxu1 %v12812_v14  ;;  %v12899_v12 = vld [vmem:[%s14539_s28 + $0x91c] ss:$20 sps:$4 sm:$0xff]  }
  0xe6   : > { %8753 = vmatprep.subr.bf16.mxu0 %v12817_v15  ;;  %9409 = vmatprep.subr.bf16.mxu1 %v12820_v18  ;;  %v12894_v14 = vld [vmem:[%s14539_s28 + $0x910] ss:$20 sps:$4 sm:$0xff]   ;;  %v12897_v15 = vld [vmem:[%s14539_s28 + $0x918] ss:$20 sps:$4 sm:$0xff]  }
  0xe7   : > { %v12902_v18 = vld [vmem:[%s14539_s28 + $0x93c] ss:$20 sps:$4 sm:$0xff]  }
  0xe9   : > { %8754 = vmatpush1.bf16.msra.mxu0 %v12815_v52  ;;  %9410 = vmatpush1.bf16.msra.mxu1 %v12818_v19  ;;  %v12905_v52 = vld [vmem:[%s14539_s28 + $0x944] ss:$20 sps:$4 sm:$0xff]  }
  0xea   : > { %8755 = vmatprep.subr.bf16.mxu0 %v12823_v20  ;;  %9411 = vmatprep.subr.bf16.mxu1 %v12826_v21  ;;  %v12900_v19 = vld [vmem:[%s14539_s28 + $0x938] ss:$20 sps:$4 sm:$0xff]   ;;  %v12903_v20 = vld [vmem:[%s14539_s28 + $0x940] ss:$20 sps:$4 sm:$0xff]  }
  0xeb   : > { %v12908_v21 = vld [vmem:[%s14539_s28 + $0x964] ss:$20 sps:$4 sm:$0xff]  }
  0xed   : > { %8756 = vmatpush1.bf16.msra.mxu0 %v12821_v22  ;;  %9412 = vmatpush1.bf16.msra.mxu1 %v12824_v24  ;;  %v12911_v22 = vld [vmem:[%s14539_s28 + $0x96c] ss:$20 sps:$4 sm:$0xff]  }
  0xee   : > { %8757 = vmatprep.subr.bf16.mxu0 %v12829_v25  ;;  %9413 = vmatprep.subr.bf16.mxu1 %v12832_v26  ;;  %v12906_v24 = vld [vmem:[%s14539_s28 + $0x960] ss:$20 sps:$4 sm:$0xff]   ;;  %v12909_v25 = vld [vmem:[%s14539_s28 + $0x968] ss:$20 sps:$4 sm:$0xff]  }
  0xef   : > { %v12914_v26 = vld [vmem:[%s14539_s28 + $0x98c] ss:$20 sps:$4 sm:$0xff]  }
  0xf1   : > { %8758 = vmatpush1.bf16.msra.mxu0 %v12827_v28  ;;  %9414 = vmatpush1.bf16.msra.mxu1 %v12830_v29  ;;  %v12917_v28 = vld [vmem:[%s14539_s28 + $0x994] ss:$20 sps:$4 sm:$0xff]  }
  0xf2   : > { %8768 = vmatprep.subr.bf16.mxu0 %v12836_v30  ;;  %9424 = vmatprep.subr.bf16.mxu1 %v12839_v31  ;;  %v12912_v29 = vld [vmem:[%s14539_s28 + $0x988] ss:$20 sps:$4 sm:$0xff]   ;;  %v12915_v30 = vld [vmem:[%s14539_s28 + $0x990] ss:$20 sps:$4 sm:$0xff]  }
  0xf3   : > { %v12920_v31 = vld [vmem:[%s14539_s28 + $0x9b4] ss:$20 sps:$4 sm:$0xff]  }
  0xf4   : > { %8760 = vmatmul.mubr.bf16.vlgmr.msra.gmra.mrb[0].mxu0 %v14792_v33  ;;  %9416 = vmatmul.mubr.bf16.vlgmr.msra.gmra.mrb[0].mxu1 %v14792_v33 }
  0xf5   : > { %8769 = vmatpush1.bf16.msra.mxu0 %v12834_v32  ;;  %9425 = vmatpush1.bf16.msra.mxu1 %v12837_v34  ;;  %v12923_v32 = vld [vmem:[%s14539_s28 + $0x9bc] ss:$20 sps:$4 sm:$0xff]   ;;  %v14858_v34 = vld.sshfl [vmem:[%s14595_s29 + $0x8] sm:$0xff pattern:$0x75316420] }
  0xf6   : > { %8770 = vmatprep.subr.bf16.mxu0 %v12842_v35  ;;  %9426 = vmatprep.subr.bf16.mxu1 %v12845_v36  ;;  %v12918_v35 = vld [vmem:[%s14539_s28 + $0x9b0] ss:$20 sps:$4 sm:$0xff]   ;;  %v12921_v36 = vld [vmem:[%s14539_s28 + $0x9b8] ss:$20 sps:$4 sm:$0xff]  }
  0xf7   : > { %8800 = vmatprep.mubr.bf16.mxu0 %v14799_v37  ;;  %9456 = vmatprep.mubr.bf16.mxu1 %v14799_v37 }
  0xf9   : > { %8771 = vmatpush1.bf16.msra.mxu0 %v12840_v16  ;;  %9427 = vmatpush1.bf16.msra.mxu1 %v12843_v38  ;;  %v12926_v16 = vld [vmem:[%s14539_s28 + $0x9dc] ss:$20 sps:$4 sm:$0xff]   ;;  %v12929_v38 = vld [vmem:[%s14539_s28 + $0x9e4] ss:$20 sps:$4 sm:$0xff]  }
  0xfa   : > { %8772 = vmatprep.subr.bf16.mxu0 %v12848_v39  ;;  %9428 = vmatprep.subr.bf16.mxu1 %v12851_v40  ;;  %v12924_v39 = vld [vmem:[%s14539_s28 + $0x9d8] ss:$20 sps:$4 sm:$0xff]   ;;  %v12927_v40 = vld [vmem:[%s14539_s28 + $0x9e0] ss:$20 sps:$4 sm:$0xff]  }
  0xfd   : > { %8773 = vmatpush1.bf16.msra.mxu0 %v12846_v41  ;;  %9429 = vmatpush1.bf16.msra.mxu1 %v12849_v42  ;;  %v12932_v41 = vld [vmem:[%s14539_s28 + $0xa04] ss:$20 sps:$4 sm:$0xff]   ;;  %v12935_v42 = vld [vmem:[%s14539_s28 + $0xa0c] ss:$20 sps:$4 sm:$0xff]  }
  0xfe   : > { %8774 = vmatprep.subr.bf16.mxu0 %v12854_v44  ;;  %9430 = vmatprep.subr.bf16.mxu1 %v12857_v45  ;;  %v1825_v44 = vcombine.high %v14858_v34, %v14858_v34  ;;  %v14872_v45 = vcombine.high %v14792_v33, %v14792_v33 }
 0x101   : > { %8775 = vmatpush1.bf16.msra.mxu0 %v12852_v46  ;;  %9431 = vmatpush1.bf16.msra.mxu1 %v12855_v47  ;;  %v12930_v46 = vld [vmem:[%s14539_s28 + $0xa00] ss:$20 sps:$4 sm:$0xff]   ;;  %v12933_v47 = vld [vmem:[%s14539_s28 + $0xa08] ss:$20 sps:$4 sm:$0xff]  }
 0x102   : > { %8776 = vmatprep.subr.bf16.mxu0 %v12860_v48  ;;  %9432 = vmatprep.subr.bf16.mxu1 %v12863_v50  ;;  %v12938_v48 = vld [vmem:[%s14539_s28 + $0xa2c] ss:$20 sps:$4 sm:$0xff]   ;;  %v12941_v50 = vld [vmem:[%s14539_s28 + $0xa34] ss:$20 sps:$4 sm:$0xff]  }
 0x105   : > { %8777 = vmatpush1.bf16.msra.mxu0 %v12858_v51  ;;  %9433 = vmatpush1.bf16.msra.mxu1 %v12861_v53  ;;  %v14879_v51 = vrot.slane %v1825_v44, %v14598_v49  ;;  %v12936_v53 = vld [vmem:[%s14539_s28 + $0xa28] ss:$20 sps:$4 sm:$0xff]  }
 0x106   : > { %8778 = vmatprep.subr.bf16.mxu0 %v12866_v54  ;;  %9434 = vmatprep.subr.bf16.mxu1 %v12869_v55  ;;  %v12939_v54 = vld [vmem:[%s14539_s28 + $0xa30] ss:$20 sps:$4 sm:$0xff]   ;;  %v12944_v55 = vld [vmem:[%s14539_s28 + $0xa54] ss:$20 sps:$4 sm:$0xff]  }
 0x107   : > { %v13013_v44 = vld [vmem:[%s14539_s28 + $0xc14] ss:$20 sps:$4 sm:$0xff]  }
 0x109   : > { %8779 = vmatpush1.bf16.msra.mxu0 %v12864_v56  ;;  %9435 = vmatpush1.bf16.msra.mxu1 %v12867_v57  ;;  %v12947_v56 = vld [vmem:[%s14539_s28 + $0xa5c] ss:$20 sps:$4 sm:$0xff]  }
 0x10a   : > { %8780 = vmatprep.subr.bf16.mxu0 %v12872_v58  ;;  %9436 = vmatprep.subr.bf16.mxu1 %v12875_v59  ;;  %v12942_v57 = vld [vmem:[%s14539_s28 + $0xa50] ss:$20 sps:$4 sm:$0xff]   ;;  %v12945_v58 = vld [vmem:[%s14539_s28 + $0xa58] ss:$20 sps:$4 sm:$0xff]  }
 0x10b   : > { %v12950_v59 = vld [vmem:[%s14539_s28 + $0xa7c] ss:$20 sps:$4 sm:$0xff]  }
 0x10d   : > { %8781 = vmatpush1.bf16.msra.mxu0 %v12870_v61  ;;  %9437 = vmatpush1.bf16.msra.mxu1 %v12873_v62  ;;  %v12953_v61 = vld [vmem:[%s14539_s28 + $0xa84] ss:$20 sps:$4 sm:$0xff]  }
 0x10e   : > { %8782 = vmatprep.subr.bf16.mxu0 %v12878_v63  ;;  %9438 = vmatprep.subr.bf16.mxu1 %v12881_v0  ;;  %v12948_v62 = vld [vmem:[%s14539_s28 + $0xa78] ss:$20 sps:$4 sm:$0xff]   ;;  %v12951_v63 = vld [vmem:[%s14539_s28 + $0xa80] ss:$20 sps:$4 sm:$0xff]  }
 0x10f   : > { %v12956_v0 = vld [vmem:[%s14539_s28 + $0xaa4] ss:$20 sps:$4 sm:$0xff]  }
 0x111   : > { %8783 = vmatpush1.bf16.msra.mxu0 %v12876_v1  ;;  %9439 = vmatpush1.bf16.msra.mxu1 %v12879_v2  ;;  %v12959_v1 = vld [vmem:[%s14539_s28 + $0xaac] ss:$20 sps:$4 sm:$0xff]  }
 0x112   : > { %8784 = vmatprep.subr.bf16.mxu0 %v12884_v3  ;;  %9440 = vmatprep.subr.bf16.mxu1 %v12887_v4  ;;  %v12954_v2 = vld [vmem:[%s14539_s28 + $0xaa0] ss:$20 sps:$4 sm:$0xff]   ;;  %v12957_v3 = vld [vmem:[%s14539_s28 + $0xaa8] ss:$20 sps:$4 sm:$0xff]  }
 0x113   : > { %v12962_v4 = vld [vmem:[%s14539_s28 + $0xacc] ss:$20 sps:$4 sm:$0xff]  }
 0x115   : > { %8785 = vmatpush1.bf16.msra.mxu0 %v12882_v5  ;;  %9441 = vmatpush1.bf16.msra.mxu1 %v12885_v6  ;;  %v12965_v5 = vld [vmem:[%s14539_s28 + $0xad4] ss:$20 sps:$4 sm:$0xff]  }
 0x116   : > { %8786 = vmatprep.subr.bf16.mxu0 %v12890_v7  ;;  %9442 = vmatprep.subr.bf16.mxu1 %v12893_v8  ;;  %v12960_v6 = vld [vmem:[%s14539_s28 + $0xac8] ss:$20 sps:$4 sm:$0xff]   ;;  %v12963_v7 = vld [vmem:[%s14539_s28 + $0xad0] ss:$20 sps:$4 sm:$0xff]  }
 0x117   : > { %v12968_v8 = vld [vmem:[%s14539_s28 + $0xaf4] ss:$20 sps:$4 sm:$0xff]  }
 0x119   : > { %8787 = vmatpush1.bf16.msra.mxu0 %v12888_v9  ;;  %9443 = vmatpush1.bf16.msra.mxu1 %v12891_v10  ;;  %v12971_v9 = vld [vmem:[%s14539_s28 + $0xafc] ss:$20 sps:$4 sm:$0xff]  }
 0x11a   : > { %8788 = vmatprep.subr.bf16.mxu0 %v12896_v11  ;;  %9444 = vmatprep.subr.bf16.mxu1 %v12899_v12  ;;  %v12966_v10 = vld [vmem:[%s14539_s28 + $0xaf0] ss:$20 sps:$4 sm:$0xff]   ;;  %v12969_v11 = vld [vmem:[%s14539_s28 + $0xaf8] ss:$20 sps:$4 sm:$0xff]  }
 0x11b   : > { %v12974_v12 = vld [vmem:[%s14539_s28 + $0xb1c] ss:$20 sps:$4 sm:$0xff]  }
 0x11d   : > { %8789 = vmatpush1.bf16.msra.mxu0 %v12894_v14  ;;  %9445 = vmatpush1.bf16.msra.mxu1 %v12897_v15  ;;  %v12977_v14 = vld [vmem:[%s14539_s28 + $0xb24] ss:$20 sps:$4 sm:$0xff]  }
 0x11e   : > { %8790 = vmatprep.subr.bf16.mxu0 %v12902_v18  ;;  %9446 = vmatprep.subr.bf16.mxu1 %v12905_v52  ;;  %v12972_v15 = vld [vmem:[%s14539_s28 + $0xb18] ss:$20 sps:$4 sm:$0xff]   ;;  %v12975_v18 = vld [vmem:[%s14539_s28 + $0xb20] ss:$20 sps:$4 sm:$0xff]  }
 0x11f   : > { %v12980_v52 = vld [vmem:[%s14539_s28 + $0xb44] ss:$20 sps:$4 sm:$0xff]  }
 0x121   : > { %8791 = vmatpush1.bf16.msra.mxu0 %v12900_v19  ;;  %9447 = vmatpush1.bf16.msra.mxu1 %v12903_v20  ;;  %v12983_v19 = vld [vmem:[%s14539_s28 + $0xb4c] ss:$20 sps:$4 sm:$0xff]  }
 0x122   : > { %8792 = vmatprep.subr.bf16.mxu0 %v12908_v21  ;;  %9448 = vmatprep.subr.bf16.mxu1 %v12911_v22  ;;  %v12978_v20 = vld [vmem:[%s14539_s28 + $0xb40] ss:$20 sps:$4 sm:$0xff]   ;;  %v12981_v21 = vld [vmem:[%s14539_s28 + $0xb48] ss:$20 sps:$4 sm:$0xff]  }
 0x123   : > { %v12986_v22 = vld [vmem:[%s14539_s28 + $0xb6c] ss:$20 sps:$4 sm:$0xff]  }
 0x125   : > { %8793 = vmatpush1.bf16.msra.mxu0 %v12906_v24  ;;  %9449 = vmatpush1.bf16.msra.mxu1 %v12909_v25  ;;  %v12989_v24 = vld [vmem:[%s14539_s28 + $0xb74] ss:$20 sps:$4 sm:$0xff]  }
 0x126   : > { %8794 = vmatprep.subr.bf16.mxu0 %v12914_v26  ;;  %9450 = vmatprep.subr.bf16.mxu1 %v12917_v28  ;;  %v12984_v25 = vld [vmem:[%s14539_s28 + $0xb68] ss:$20 sps:$4 sm:$0xff]   ;;  %v12987_v26 = vld [vmem:[%s14539_s28 + $0xb70] ss:$20 sps:$4 sm:$0xff]  }
 0x127   : > { %v12992_v28 = vld [vmem:[%s14539_s28 + $0xb94] ss:$20 sps:$4 sm:$0xff]  }
 0x129   : > { %8795 = vmatpush1.bf16.msra.mxu0 %v12912_v29  ;;  %9451 = vmatpush1.bf16.msra.mxu1 %v12915_v30  ;;  %v12995_v29 = vld [vmem:[%s14539_s28 + $0xb9c] ss:$20 sps:$4 sm:$0xff]  }
 0x12a   : > { %8796 = vmatprep.subr.bf16.mxu0 %v12920_v31  ;;  %9452 = vmatprep.subr.bf16.mxu1 %v12923_v32  ;;  %v12990_v30 = vld [vmem:[%s14539_s28 + $0xb90] ss:$20 sps:$4 sm:$0xff]   ;;  %v12993_v31 = vld [vmem:[%s14539_s28 + $0xb98] ss:$20 sps:$4 sm:$0xff]  }
 0x12b   : > { %v12998_v32 = vld [vmem:[%s14539_s28 + $0xbbc] ss:$20 sps:$4 sm:$0xff]  }
 0x12d   : > { %8797 = vmatpush1.bf16.msra.mxu0 %v12918_v35  ;;  %9453 = vmatpush1.bf16.msra.mxu1 %v12921_v36  ;;  %v13001_v35 = vld [vmem:[%s14539_s28 + $0xbc4] ss:$20 sps:$4 sm:$0xff]  }
 0x12e   : > { %8798 = vmatprep.subr.bf16.mxu0 %v12926_v16  ;;  %9454 = vmatprep.subr.bf16.mxu1 %v12929_v38  ;;  %v12996_v36 = vld [vmem:[%s14539_s28 + $0xbb8] ss:$20 sps:$4 sm:$0xff]   ;;  %v12999_v16 = vld [vmem:[%s14539_s28 + $0xbc0] ss:$20 sps:$4 sm:$0xff]  }
 0x12f   : > { %v13004_v38 = vld [vmem:[%s14539_s28 + $0xbe4] ss:$20 sps:$4 sm:$0xff]  }
 0x131   : > { %8799 = vmatpush1.bf16.msra.mxu0 %v12924_v39  ;;  %9455 = vmatpush1.bf16.msra.mxu1 %v12927_v40  ;;  %v13007_v39 = vld [vmem:[%s14539_s28 + $0xbec] ss:$20 sps:$4 sm:$0xff]  }
 0x132   : > { %8809 = vmatprep.subr.bf16.mxu0 %v12932_v41  ;;  %9465 = vmatprep.subr.bf16.mxu1 %v12935_v42  ;;  %v13002_v40 = vld [vmem:[%s14539_s28 + $0xbe0] ss:$20 sps:$4 sm:$0xff]   ;;  %v13005_v41 = vld [vmem:[%s14539_s28 + $0xbe8] ss:$20 sps:$4 sm:$0xff]  }
 0x133   : > { %v13010_v42 = vld [vmem:[%s14539_s28 + $0xc0c] ss:$20 sps:$4 sm:$0xff]  }
 0x134   : > { %8801 = vmatmul.mubr.bf16.vlgmr.msra.gmra.mrb[0].mxu0 %v14872_v45  ;;  %9457 = vmatmul.mubr.bf16.vlgmr.msra.gmra.mrb[0].mxu1 %v14872_v45 }
 0x135   : > { %8810 = vmatpush1.bf16.msra.mxu0 %v12930_v46  ;;  %9466 = vmatpush1.bf16.msra.mxu1 %v12933_v47  ;;  %v13008_v46 = vld [vmem:[%s14539_s28 + $0xc08] ss:$20 sps:$4 sm:$0xff]   ;;  %v13011_v47 = vld [vmem:[%s14539_s28 + $0xc10] ss:$20 sps:$4 sm:$0xff]  }
 0x136   : > { %8811 = vmatprep.subr.bf16.mxu0 %v12938_v48  ;;  %9467 = vmatprep.subr.bf16.mxu1 %v12941_v50  ;;  %v13016_v48 = vld [vmem:[%s14539_s28 + $0xc34] ss:$20 sps:$4 sm:$0xff]   ;;  %v13019_v50 = vld [vmem:[%s14539_s28 + $0xc3c] ss:$20 sps:$4 sm:$0xff]  }
 0x137   : > { %8841 = vmatprep.mubr.bf16.mxu0 %v14879_v51  ;;  %9497 = vmatprep.mubr.bf16.mxu1 %v14879_v51 }
 0x139   : > { %8812 = vmatpush1.bf16.msra.mxu0 %v12936_v53  ;;  %9468 = vmatpush1.bf16.msra.mxu1 %v12939_v54  ;;  %v13014_v53 = vld [vmem:[%s14539_s28 + $0xc30] ss:$20 sps:$4 sm:$0xff]   ;;  %v13017_v54 = vld [vmem:[%s14539_s28 + $0xc38] ss:$20 sps:$4 sm:$0xff]  }
 0x13a   : > { %8813 = vmatprep.subr.bf16.mxu0 %v12944_v55  ;;  %9469 = vmatprep.subr.bf16.mxu1 %v12947_v56  ;;  %v13022_v55 = vld [vmem:[%s14539_s28 + $0xc5c] ss:$20 sps:$4 sm:$0xff]   ;;  %v13025_v56 = vld [vmem:[%s14539_s28 + $0xc64] ss:$20 sps:$4 sm:$0xff]  }
 0x13d   : > { %8814 = vmatpush1.bf16.msra.mxu0 %v12942_v57  ;;  %9470 = vmatpush1.bf16.msra.mxu1 %v12945_v58  ;;  %v13020_v57 = vld [vmem:[%s14539_s28 + $0xc58] ss:$20 sps:$4 sm:$0xff]   ;;  %v13023_v58 = vld [vmem:[%s14539_s28 + $0xc60] ss:$20 sps:$4 sm:$0xff]  }
 0x13e   : > { %8815 = vmatprep.subr.bf16.mxu0 %v12950_v59  ;;  %9471 = vmatprep.subr.bf16.mxu1 %v12953_v61  ;;  %v13028_v59 = vld [vmem:[%s14539_s28 + $0xc84] ss:$20 sps:$4 sm:$0xff]   ;;  %v13031_v61 = vld [vmem:[%s14539_s28 + $0xc8c] ss:$20 sps:$4 sm:$0xff]  }
 0x141   : > { %8816 = vmatpush1.bf16.msra.mxu0 %v12948_v62  ;;  %9472 = vmatpush1.bf16.msra.mxu1 %v12951_v63  ;;  %v14947_v62 = vrot.slane %v14858_v34, %v14598_v49  ;;  %v13026_v63 = vld [vmem:[%s14539_s28 + $0xc80] ss:$20 sps:$4 sm:$0xff]   ;;  %v13032_v34 = vld [vmem:[%s14539_s28 + $0xca8] ss:$20 sps:$4 sm:$0xff]  }
 0x142   : > { %8817 = vmatprep.subr.bf16.mxu0 %v12956_v0  ;;  %9473 = vmatprep.subr.bf16.mxu1 %v12959_v1  ;;  %v13029_v0 = vld [vmem:[%s14539_s28 + $0xc88] ss:$20 sps:$4 sm:$0xff]   ;;  %v13034_v1 = vld [vmem:[%s14539_s28 + $0xcac] ss:$20 sps:$4 sm:$0xff]  }
 0x145   : > { %8818 = vmatpush1.bf16.msra.mxu0 %v12954_v2  ;;  %9474 = vmatpush1.bf16.msra.mxu1 %v12957_v3  ;;  %v13037_v2 = vld [vmem:[%s14539_s28 + $0xcb4] ss:$20 sps:$4 sm:$0xff]   ;;  %v14955_v3 = vcombine.high %v14879_v51, %v14879_v51 }
 0x146   : > { %8819 = vmatprep.subr.bf16.mxu0 %v12962_v4  ;;  %9475 = vmatprep.subr.bf16.mxu1 %v12965_v5  ;;  %v13035_v4 = vld [vmem:[%s14539_s28 + $0xcb0] ss:$20 sps:$4 sm:$0xff]   ;;  %v13040_v5 = vld [vmem:[%s14539_s28 + $0xcd4] ss:$20 sps:$4 sm:$0xff]  }
 0x149   : > { %8820 = vmatpush1.bf16.msra.mxu0 %v12960_v6  ;;  %9476 = vmatpush1.bf16.msra.mxu1 %v12963_v7  ;;  %v13043_v6 = vld [vmem:[%s14539_s28 + $0xcdc] ss:$20 sps:$4 sm:$0xff]  }
 0x14a   : > { %8821 = vmatprep.subr.bf16.mxu0 %v12968_v8  ;;  %9477 = vmatprep.subr.bf16.mxu1 %v12971_v9  ;;  %v13038_v7 = vld [vmem:[%s14539_s28 + $0xcd0] ss:$20 sps:$4 sm:$0xff]   ;;  %v13041_v8 = vld [vmem:[%s14539_s28 + $0xcd8] ss:$20 sps:$4 sm:$0xff]  }
 0x14b   : > { %v13046_v9 = vld [vmem:[%s14539_s28 + $0xcfc] ss:$20 sps:$4 sm:$0xff]  }
 0x14d   : > { %8822 = vmatpush1.bf16.msra.mxu0 %v12966_v10  ;;  %9478 = vmatpush1.bf16.msra.mxu1 %v12969_v11  ;;  %v13049_v10 = vld [vmem:[%s14539_s28 + $0xd04] ss:$20 sps:$4 sm:$0xff]  }
 0x14e   : > { %8823 = vmatprep.subr.bf16.mxu0 %v12974_v12  ;;  %9479 = vmatprep.subr.bf16.mxu1 %v12977_v14  ;;  %v13044_v11 = vld [vmem:[%s14539_s28 + $0xcf8] ss:$20 sps:$4 sm:$0xff]   ;;  %v13047_v12 = vld [vmem:[%s14539_s28 + $0xd00] ss:$20 sps:$4 sm:$0xff]  }
 0x14f   : > { %v13052_v14 = vld [vmem:[%s14539_s28 + $0xd24] ss:$20 sps:$4 sm:$0xff]  }
 0x151   : > { %8824 = vmatpush1.bf16.msra.mxu0 %v12972_v15  ;;  %9480 = vmatpush1.bf16.msra.mxu1 %v12975_v18  ;;  %v13055_v15 = vld [vmem:[%s14539_s28 + $0xd2c] ss:$20 sps:$4 sm:$0xff]  }
 0x152   : > { %8825 = vmatprep.subr.bf16.mxu0 %v12980_v52  ;;  %9481 = vmatprep.subr.bf16.mxu1 %v12983_v19  ;;  %v13050_v18 = vld [vmem:[%s14539_s28 + $0xd20] ss:$20 sps:$4 sm:$0xff]   ;;  %v13053_v52 = vld [vmem:[%s14539_s28 + $0xd28] ss:$20 sps:$4 sm:$0xff]  }
 0x153   : > { %v13058_v19 = vld [vmem:[%s14539_s28 + $0xd4c] ss:$20 sps:$4 sm:$0xff]  }
 0x155   : > { %8826 = vmatpush1.bf16.msra.mxu0 %v12978_v20  ;;  %9482 = vmatpush1.bf16.msra.mxu1 %v12981_v21  ;;  %v13061_v20 = vld [vmem:[%s14539_s28 + $0xd54] ss:$20 sps:$4 sm:$0xff]  }
 0x156   : > { %8827 = vmatprep.subr.bf16.mxu0 %v12986_v22  ;;  %9483 = vmatprep.subr.bf16.mxu1 %v12989_v24  ;;  %v13056_v21 = vld [vmem:[%s14539_s28 + $0xd48] ss:$20 sps:$4 sm:$0xff]   ;;  %v13059_v22 = vld [vmem:[%s14539_s28 + $0xd50] ss:$20 sps:$4 sm:$0xff]  }
 0x157   : > { %v13064_v24 = vld [vmem:[%s14539_s28 + $0xd74] ss:$20 sps:$4 sm:$0xff]  }
 0x159   : > { %8828 = vmatpush1.bf16.msra.mxu0 %v12984_v25  ;;  %9484 = vmatpush1.bf16.msra.mxu1 %v12987_v26  ;;  %v13067_v25 = vld [vmem:[%s14539_s28 + $0xd7c] ss:$20 sps:$4 sm:$0xff]  }
 0x15a   : > { %8829 = vmatprep.subr.bf16.mxu0 %v12992_v28  ;;  %9485 = vmatprep.subr.bf16.mxu1 %v12995_v29  ;;  %v13062_v26 = vld [vmem:[%s14539_s28 + $0xd70] ss:$20 sps:$4 sm:$0xff]   ;;  %v13065_v28 = vld [vmem:[%s14539_s28 + $0xd78] ss:$20 sps:$4 sm:$0xff]  }
 0x15b   : > { %v13070_v29 = vld [vmem:[%s14539_s28 + $0xd9c] ss:$20 sps:$4 sm:$0xff]  }
 0x15d   : > { %8830 = vmatpush1.bf16.msra.mxu0 %v12990_v30  ;;  %9486 = vmatpush1.bf16.msra.mxu1 %v12993_v31  ;;  %v13073_v30 = vld [vmem:[%s14539_s28 + $0xda4] ss:$20 sps:$4 sm:$0xff]  }
 0x15e   : > { %8831 = vmatprep.subr.bf16.mxu0 %v12998_v32  ;;  %9487 = vmatprep.subr.bf16.mxu1 %v13001_v35  ;;  %v13068_v31 = vld [vmem:[%s14539_s28 + $0xd98] ss:$20 sps:$4 sm:$0xff]   ;;  %v13071_v32 = vld [vmem:[%s14539_s28 + $0xda0] ss:$20 sps:$4 sm:$0xff]  }
 0x15f   : > { %v13076_v35 = vld [vmem:[%s14539_s28 + $0xdc4] ss:$20 sps:$4 sm:$0xff]  }
 0x161   : > { %8832 = vmatpush1.bf16.msra.mxu0 %v12996_v36  ;;  %9488 = vmatpush1.bf16.msra.mxu1 %v12999_v16  ;;  %v13079_v36 = vld [vmem:[%s14539_s28 + $0xdcc] ss:$20 sps:$4 sm:$0xff]  }
 0x162   : > { %8833 = vmatprep.subr.bf16.mxu0 %v13004_v38  ;;  %9489 = vmatprep.subr.bf16.mxu1 %v13007_v39  ;;  %v13074_v16 = vld [vmem:[%s14539_s28 + $0xdc0] ss:$20 sps:$4 sm:$0xff]   ;;  %v13077_v38 = vld [vmem:[%s14539_s28 + $0xdc8] ss:$20 sps:$4 sm:$0xff]  }
 0x163   : > { %v13082_v39 = vld [vmem:[%s14539_s28 + $0xdec] ss:$20 sps:$4 sm:$0xff]  }
 0x165   : > { %8834 = vmatpush1.bf16.msra.mxu0 %v13002_v40  ;;  %9490 = vmatpush1.bf16.msra.mxu1 %v13005_v41  ;;  %v13085_v40 = vld [vmem:[%s14539_s28 + $0xdf4] ss:$20 sps:$4 sm:$0xff]  }
 0x166   : > { %8835 = vmatprep.subr.bf16.mxu0 %v13010_v42  ;;  %9491 = vmatprep.subr.bf16.mxu1 %v13013_v44  ;;  %v13080_v41 = vld [vmem:[%s14539_s28 + $0xde8] ss:$20 sps:$4 sm:$0xff]   ;;  %v13083_v42 = vld [vmem:[%s14539_s28 + $0xdf0] ss:$20 sps:$4 sm:$0xff]  }
 0x167   : > { %v13088_v44 = vld [vmem:[%s14539_s28 + $0xe14] ss:$20 sps:$4 sm:$0xff]  }
 0x169   : > { %8836 = vmatpush1.bf16.msra.mxu0 %v13008_v46  ;;  %9492 = vmatpush1.bf16.msra.mxu1 %v13011_v47  ;;  %v13091_v46 = vld [vmem:[%s14539_s28 + $0xe1c] ss:$20 sps:$4 sm:$0xff]  }
 0x16a   : > { %8837 = vmatprep.subr.bf16.mxu0 %v13016_v48  ;;  %9493 = vmatprep.subr.bf16.mxu1 %v13019_v50  ;;  %v13086_v47 = vld [vmem:[%s14539_s28 + $0xe10] ss:$20 sps:$4 sm:$0xff]   ;;  %v13089_v48 = vld [vmem:[%s14539_s28 + $0xe18] ss:$20 sps:$4 sm:$0xff]  }
 0x16b   : > { %v13094_v50 = vld [vmem:[%s14539_s28 + $0xe3c] ss:$20 sps:$4 sm:$0xff]  }
 0x16d   : > { %8838 = vmatpush1.bf16.msra.mxu0 %v13014_v53  ;;  %9494 = vmatpush1.bf16.msra.mxu1 %v13017_v54  ;;  %v13097_v53 = vld [vmem:[%s14539_s28 + $0xe44] ss:$20 sps:$4 sm:$0xff]  }
 0x16e   : > { %8839 = vmatprep.subr.bf16.mxu0 %v13022_v55  ;;  %9495 = vmatprep.subr.bf16.mxu1 %v13025_v56  ;;  %v13092_v54 = vld [vmem:[%s14539_s28 + $0xe38] ss:$20 sps:$4 sm:$0xff]   ;;  %v13095_v55 = vld [vmem:[%s14539_s28 + $0xe40] ss:$20 sps:$4 sm:$0xff]  }
 0x16f   : > { %v13100_v56 = vld [vmem:[%s14539_s28 + $0xe64] ss:$20 sps:$4 sm:$0xff]  }
 0x171   : > { %8840 = vmatpush1.bf16.msra.mxu0 %v13020_v57  ;;  %9496 = vmatpush1.bf16.msra.mxu1 %v13023_v58  ;;  %v13103_v57 = vld [vmem:[%s14539_s28 + $0xe6c] ss:$20 sps:$4 sm:$0xff]  }
 0x172   : > { %8850 = vmatprep.subr.bf16.mxu0 %v13028_v59  ;;  %9506 = vmatprep.subr.bf16.mxu1 %v13031_v61  ;;  %v13098_v58 = vld [vmem:[%s14539_s28 + $0xe60] ss:$20 sps:$4 sm:$0xff]   ;;  %v13101_v59 = vld [vmem:[%s14539_s28 + $0xe68] ss:$20 sps:$4 sm:$0xff]  }
 0x173   : > { %v13106_v61 = vld [vmem:[%s14539_s28 + $0xe8c] ss:$20 sps:$4 sm:$0xff]  }
 0x174   : > { %8842 = vmatmul.mubr.bf16.vlgmr.msra.gmra.mrb[0].mxu0 %v14947_v62  ;;  %9498 = vmatmul.mubr.bf16.vlgmr.msra.gmra.mrb[0].mxu1 %v14947_v62 }
 0x175   : > { %8851 = vmatpush1.bf16.msra.mxu0 %v13026_v63  ;;  %9507 = vmatpush1.bf16.msra.mxu1 %v13029_v0  ;;  %v13109_v63 = vld [vmem:[%s14539_s28 + $0xe94] ss:$20 sps:$4 sm:$0xff]  }
 0x176   : > { %8852 = vmatprep.subr.bf16.mxu0 %v13034_v1  ;;  %9508 = vmatprep.subr.bf16.mxu1 %v13037_v2  ;;  %v13104_v0 = vld [vmem:[%s14539_s28 + $0xe88] ss:$20 sps:$4 sm:$0xff]   ;;  %v13107_v1 = vld [vmem:[%s14539_s28 + $0xe90] ss:$20 sps:$4 sm:$0xff]  }
 0x177   : > { %8882 = vmatprep.mubr.bf16.mxu0 %v14955_v3  ;;  %9538 = vmatprep.mubr.bf16.mxu1 %v14955_v3  ;;  %v13112_v2 = vld [vmem:[%s14539_s28 + $0xeb4] ss:$20 sps:$4 sm:$0xff]  }
 0x179   : > { %8853 = vmatpush1.bf16.msra.mxu0 %v13032_v34  ;;  %9509 = vmatpush1.bf16.msra.mxu1 %v13035_v4  ;;  %v13115_v34 = vld [vmem:[%s14539_s28 + $0xebc] ss:$20 sps:$4 sm:$0xff]   ;;  %v14341_v4 = vld [vmem:[%s14595_s29 + $0x8] sm:$0xff] }
 0x17a   : > { %8854 = vmatprep.subr.bf16.mxu0 %v13040_v5  ;;  %9510 = vmatprep.subr.bf16.mxu1 %v13043_v6  ;;  %v1810_v5 = vcombine.high %v14341_v4, %v14341_v4  ;;  %v13110_v6 = vld [vmem:[%s14539_s28 + $0xeb0] ss:$20 sps:$4 sm:$0xff]  }
 0x17b   : > { %v13179_v4 = vld [vmem:[%s14539_s28 + $0x1070] ss:$20 sps:$4 sm:$0xff]  }
 0x17d   : > { %8855 = vmatpush1.bf16.msra.mxu0 %v13038_v7  ;;  %9511 = vmatpush1.bf16.msra.mxu1 %v13041_v8  ;;  %v13113_v7 = vld [vmem:[%s14539_s28 + $0xeb8] ss:$20 sps:$4 sm:$0xff]   ;;  %v13118_v8 = vld [vmem:[%s14539_s28 + $0xedc] ss:$20 sps:$4 sm:$0xff]  }
 0x17e   : > { %8856 = vmatprep.subr.bf16.mxu0 %v13046_v9  ;;  %9512 = vmatprep.subr.bf16.mxu1 %v13049_v10  ;;  %v13121_v9 = vld [vmem:[%s14539_s28 + $0xee4] ss:$20 sps:$4 sm:$0xff]   ;;  %v15019_v10 = vrot.slane %v1810_v5, %v14598_v49  ;;  %v13184_v5 = vld [vmem:[%s14539_s28 + $0x1094] ss:$20 sps:$4 sm:$0xff]  }
 0x181   : > { %8857 = vmatpush1.bf16.msra.mxu0 %v13044_v11  ;;  %9513 = vmatpush1.bf16.msra.mxu1 %v13047_v12  ;;  %v13116_v11 = vld [vmem:[%s14539_s28 + $0xed8] ss:$20 sps:$4 sm:$0xff]   ;;  %v13119_v12 = vld [vmem:[%s14539_s28 + $0xee0] ss:$20 sps:$4 sm:$0xff]  }
 0x182   : > { %8858 = vmatprep.subr.bf16.mxu0 %v13052_v14  ;;  %9514 = vmatprep.subr.bf16.mxu1 %v13055_v15  ;;  %v13124_v14 = vld [vmem:[%s14539_s28 + $0xf04] ss:$20 sps:$4 sm:$0xff]   ;;  %v13127_v15 = vld [vmem:[%s14539_s28 + $0xf0c] ss:$20 sps:$4 sm:$0xff]  }
 0x185   : > { %8859 = vmatpush1.bf16.msra.mxu0 %v13050_v18  ;;  %9515 = vmatpush1.bf16.msra.mxu1 %v13053_v52  ;;  %v1826_v18 = vcombine.high %v15019_v10, %v15019_v10  ;;  %v15029_v52 = vcombine.high %v14947_v62, %v14947_v62 }
 0x186   : > { %8860 = vmatprep.subr.bf16.mxu0 %v13058_v19  ;;  %9516 = vmatprep.subr.bf16.mxu1 %v13061_v20  ;;  %v13122_v19 = vld [vmem:[%s14539_s28 + $0xf00] ss:$20 sps:$4 sm:$0xff]   ;;  %v13125_v20 = vld [vmem:[%s14539_s28 + $0xf08] ss:$20 sps:$4 sm:$0xff]  }
 0x189   : > { %8861 = vmatpush1.bf16.msra.mxu0 %v13056_v21  ;;  %9517 = vmatpush1.bf16.msra.mxu1 %v13059_v22  ;;  %v13130_v21 = vld [vmem:[%s14539_s28 + $0xf2c] ss:$20 sps:$4 sm:$0xff]   ;;  %v13133_v22 = vld [vmem:[%s14539_s28 + $0xf34] ss:$20 sps:$4 sm:$0xff]  }
 0x18a   : > { %8862 = vmatprep.subr.bf16.mxu0 %v13064_v24  ;;  %9518 = vmatprep.subr.bf16.mxu1 %v13067_v25  ;;  %v15036_v24 = vrot.slane %v1826_v18, %v14598_v49  ;;  %v13128_v25 = vld [vmem:[%s14539_s28 + $0xf28] ss:$20 sps:$4 sm:$0xff]   ;;  %v13199_v18 = vld [vmem:[%s14539_s28 + $0x10ec] ss:$20 sps:$4 sm:$0xff]  }
 0x18d   : > { %8863 = vmatpush1.bf16.msra.mxu0 %v13062_v26  ;;  %9519 = vmatpush1.bf16.msra.mxu1 %v13065_v28  ;;  %v13131_v26 = vld [vmem:[%s14539_s28 + $0xf30] ss:$20 sps:$4 sm:$0xff]   ;;  %v13136_v28 = vld [vmem:[%s14539_s28 + $0xf54] ss:$20 sps:$4 sm:$0xff]  }
 0x18e   : > { %8864 = vmatprep.subr.bf16.mxu0 %v13070_v29  ;;  %9520 = vmatprep.subr.bf16.mxu1 %v13073_v30  ;;  %v13139_v29 = vld [vmem:[%s14539_s28 + $0xf5c] ss:$20 sps:$4 sm:$0xff]  }
 0x18f   : > { %v13134_v30 = vld [vmem:[%s14539_s28 + $0xf50] ss:$20 sps:$4 sm:$0xff]  }
 0x191   : > { %8865 = vmatpush1.bf16.msra.mxu0 %v13068_v31  ;;  %9521 = vmatpush1.bf16.msra.mxu1 %v13071_v32  ;;  %v13137_v31 = vld [vmem:[%s14539_s28 + $0xf58] ss:$20 sps:$4 sm:$0xff]   ;;  %v13142_v32 = vld [vmem:[%s14539_s28 + $0xf7c] ss:$20 sps:$4 sm:$0xff]  }
 0x192   : > { %8866 = vmatprep.subr.bf16.mxu0 %v13076_v35  ;;  %9522 = vmatprep.subr.bf16.mxu1 %v13079_v36  ;;  %v13145_v35 = vld [vmem:[%s14539_s28 + $0xf84] ss:$20 sps:$4 sm:$0xff]  }
 0x193   : > { %v13140_v36 = vld [vmem:[%s14539_s28 + $0xf78] ss:$20 sps:$4 sm:$0xff]  }
 0x195   : > { %8867 = vmatpush1.bf16.msra.mxu0 %v13074_v16  ;;  %9523 = vmatpush1.bf16.msra.mxu1 %v13077_v38  ;;  %v13143_v16 = vld [vmem:[%s14539_s28 + $0xf80] ss:$20 sps:$4 sm:$0xff]   ;;  %v13148_v38 = vld [vmem:[%s14539_s28 + $0xfa4] ss:$20 sps:$4 sm:$0xff]  }
 0x196   : > { %8868 = vmatprep.subr.bf16.mxu0 %v13082_v39  ;;  %9524 = vmatprep.subr.bf16.mxu1 %v13085_v40  ;;  %v13151_v39 = vld [vmem:[%s14539_s28 + $0xfac] ss:$20 sps:$4 sm:$0xff]  }
 0x197   : > { %v13146_v40 = vld [vmem:[%s14539_s28 + $0xfa0] ss:$20 sps:$4 sm:$0xff]  }
 0x199   : > { %8869 = vmatpush1.bf16.msra.mxu0 %v13080_v41  ;;  %9525 = vmatpush1.bf16.msra.mxu1 %v13083_v42  ;;  %v13149_v41 = vld [vmem:[%s14539_s28 + $0xfa8] ss:$20 sps:$4 sm:$0xff]   ;;  %v13154_v42 = vld [vmem:[%s14539_s28 + $0xfcc] ss:$20 sps:$4 sm:$0xff]  }
 0x19a   : > { %8870 = vmatprep.subr.bf16.mxu0 %v13088_v44  ;;  %9526 = vmatprep.subr.bf16.mxu1 %v13091_v46  ;;  %v13157_v44 = vld [vmem:[%s14539_s28 + $0xfd4] ss:$20 sps:$4 sm:$0xff]  }
 0x19b   : > { %v13152_v46 = vld [vmem:[%s14539_s28 + $0xfc8] ss:$20 sps:$4 sm:$0xff]  }
 0x19d   : > { %8871 = vmatpush1.bf16.msra.mxu0 %v13086_v47  ;;  %9527 = vmatpush1.bf16.msra.mxu1 %v13089_v48  ;;  %v13155_v47 = vld [vmem:[%s14539_s28 + $0xfd0] ss:$20 sps:$4 sm:$0xff]   ;;  %v13160_v48 = vld [vmem:[%s14539_s28 + $0xff4] ss:$20 sps:$4 sm:$0xff]  }
 0x19e   : > { %8872 = vmatprep.subr.bf16.mxu0 %v13094_v50  ;;  %9528 = vmatprep.subr.bf16.mxu1 %v13097_v53  ;;  %v13163_v50 = vld [vmem:[%s14539_s28 + $0xffc] ss:$20 sps:$4 sm:$0xff]  }
 0x19f   : > { %v13158_v53 = vld [vmem:[%s14539_s28 + $0xff0] ss:$20 sps:$4 sm:$0xff]  }
 0x1a1   : > { %8873 = vmatpush1.bf16.msra.mxu0 %v13092_v54  ;;  %9529 = vmatpush1.bf16.msra.mxu1 %v13095_v55  ;;  %v13161_v54 = vld [vmem:[%s14539_s28 + $0xff8] ss:$20 sps:$4 sm:$0xff]   ;;  %v13166_v55 = vld [vmem:[%s14539_s28 + $0x101c] ss:$20 sps:$4 sm:$0xff]  }
 0x1a2   : > { %8874 = vmatprep.subr.bf16.mxu0 %v13100_v56  ;;  %9530 = vmatprep.subr.bf16.mxu1 %v13103_v57  ;;  %v13169_v56 = vld [vmem:[%s14539_s28 + $0x1024] ss:$20 sps:$4 sm:$0xff]  }
 0x1a3   : > { %v13164_v57 = vld [vmem:[%s14539_s28 + $0x1018] ss:$20 sps:$4 sm:$0xff]  }
 0x1a5   : > { %8875 = vmatpush1.bf16.msra.mxu0 %v13098_v58  ;;  %9531 = vmatpush1.bf16.msra.mxu1 %v13101_v59  ;;  %v13167_v58 = vld [vmem:[%s14539_s28 + $0x1020] ss:$20 sps:$4 sm:$0xff]   ;;  %v13172_v59 = vld [vmem:[%s14539_s28 + $0x1044] ss:$20 sps:$4 sm:$0xff]  }
 0x1a6   : > { %8876 = vmatprep.subr.bf16.mxu0 %v13106_v61  ;;  %9532 = vmatprep.subr.bf16.mxu1 %v13109_v63  ;;  %v13175_v61 = vld [vmem:[%s14539_s28 + $0x104c] ss:$20 sps:$4 sm:$0xff]  }
 0x1a7   : > { %v13170_v63 = vld [vmem:[%s14539_s28 + $0x1040] ss:$20 sps:$4 sm:$0xff]  }
 0x1a9   : > { %8877 = vmatpush1.bf16.msra.mxu0 %v13104_v0  ;;  %9533 = vmatpush1.bf16.msra.mxu1 %v13107_v1  ;;  %v13173_v0 = vld [vmem:[%s14539_s28 + $0x1048] ss:$20 sps:$4 sm:$0xff]   ;;  %v13178_v1 = vld [vmem:[%s14539_s28 + $0x106c] ss:$20 sps:$4 sm:$0xff]  }
 0x1aa   : > { %8878 = vmatprep.subr.bf16.mxu0 %v13112_v2  ;;  %9534 = vmatprep.subr.bf16.mxu1 %v13115_v34  ;;  %v13181_v2 = vld [vmem:[%s14539_s28 + $0x1074] ss:$20 sps:$4 sm:$0xff]  }
 0x1ab   : > { %v13176_v34 = vld [vmem:[%s14539_s28 + $0x1068] ss:$20 sps:$4 sm:$0xff]  }
 0x1ad   : > { %8879 = vmatpush1.bf16.msra.mxu0 %v13110_v6  ;;  %9535 = vmatpush1.bf16.msra.mxu1 %v13113_v7  ;;  %v13187_v6 = vld [vmem:[%s14539_s28 + $0x109c] ss:$20 sps:$4 sm:$0xff]  }
 0x1ae   : > { %8880 = vmatprep.subr.bf16.mxu0 %v13118_v8  ;;  %9536 = vmatprep.subr.bf16.mxu1 %v13121_v9  ;;  %v13182_v7 = vld [vmem:[%s14539_s28 + $0x1090] ss:$20 sps:$4 sm:$0xff]   ;;  %v13185_v8 = vld [vmem:[%s14539_s28 + $0x1098] ss:$20 sps:$4 sm:$0xff]  }
 0x1af   : > { %v13190_v9 = vld [vmem:[%s14539_s28 + $0x10bc] ss:$20 sps:$4 sm:$0xff]  }
 0x1b1   : > { %8881 = vmatpush1.bf16.msra.mxu0 %v13116_v11  ;;  %9537 = vmatpush1.bf16.msra.mxu1 %v13119_v12  ;;  %v13193_v11 = vld [vmem:[%s14539_s28 + $0x10c4] ss:$20 sps:$4 sm:$0xff]  }
 0x1b2   : > { %8891 = vmatprep.subr.bf16.mxu0 %v13124_v14  ;;  %9547 = vmatprep.subr.bf16.mxu1 %v13127_v15  ;;  %v13188_v12 = vld [vmem:[%s14539_s28 + $0x10b8] ss:$20 sps:$4 sm:$0xff]   ;;  %v13191_v14 = vld [vmem:[%s14539_s28 + $0x10c0] ss:$20 sps:$4 sm:$0xff]  }
 0x1b3   : > { %v13196_v15 = vld [vmem:[%s14539_s28 + $0x10e4] ss:$20 sps:$4 sm:$0xff]  }
 0x1b4   : > { %8883 = vmatmul.mubr.bf16.vlgmr.msra.gmra.mrb[0].mxu0 %v15029_v52  ;;  %9539 = vmatmul.mubr.bf16.vlgmr.msra.gmra.mrb[0].mxu1 %v15029_v52 }
 0x1b5   : > { %8892 = vmatpush1.bf16.msra.mxu0 %v13122_v19  ;;  %9548 = vmatpush1.bf16.msra.mxu1 %v13125_v20  ;;  %v13194_v19 = vld [vmem:[%s14539_s28 + $0x10e0] ss:$20 sps:$4 sm:$0xff]   ;;  %v13197_v20 = vld [vmem:[%s14539_s28 + $0x10e8] ss:$20 sps:$4 sm:$0xff]  }
 0x1b6   : > { %8893 = vmatprep.subr.bf16.mxu0 %v13130_v21  ;;  %9549 = vmatprep.subr.bf16.mxu1 %v13133_v22  ;;  %v13202_v21 = vld [vmem:[%s14539_s28 + $0x110c] ss:$20 sps:$4 sm:$0xff]   ;;  %v13205_v22 = vld [vmem:[%s14539_s28 + $0x1114] ss:$20 sps:$4 sm:$0xff]  }
 0x1b7   : > { %8923 = vmatprep.mubr.bf16.mxu0 %v15036_v24  ;;  %9579 = vmatprep.mubr.bf16.mxu1 %v15036_v24 }
 0x1b9   : > { %8894 = vmatpush1.bf16.msra.mxu0 %v13128_v25  ;;  %9550 = vmatpush1.bf16.msra.mxu1 %v13131_v26  ;;  %v13200_v25 = vld [vmem:[%s14539_s28 + $0x1108] ss:$20 sps:$4 sm:$0xff]   ;;  %v13203_v26 = vld [vmem:[%s14539_s28 + $0x1110] ss:$20 sps:$4 sm:$0xff]  }
 0x1ba   : > { %8895 = vmatprep.subr.bf16.mxu0 %v13136_v28  ;;  %9551 = vmatprep.subr.bf16.mxu1 %v13139_v29  ;;  %v13208_v28 = vld [vmem:[%s14539_s28 + $0x1134] ss:$20 sps:$4 sm:$0xff]   ;;  %v13211_v29 = vld [vmem:[%s14539_s28 + $0x113c] ss:$20 sps:$4 sm:$0xff]  }
 0x1bd   : > { %8896 = vmatpush1.bf16.msra.mxu0 %v13134_v30  ;;  %9552 = vmatpush1.bf16.msra.mxu1 %v13137_v31  ;;  %v13206_v30 = vld [vmem:[%s14539_s28 + $0x1130] ss:$20 sps:$4 sm:$0xff]   ;;  %v13209_v31 = vld [vmem:[%s14539_s28 + $0x1138] ss:$20 sps:$4 sm:$0xff]  }
 0x1be   : > { %8897 = vmatprep.subr.bf16.mxu0 %v13142_v32  ;;  %9553 = vmatprep.subr.bf16.mxu1 %v13145_v35  ;;  %v13214_v32 = vld [vmem:[%s14539_s28 + $0x115c] ss:$20 sps:$4 sm:$0xff]   ;;  %v13217_v35 = vld [vmem:[%s14539_s28 + $0x1164] ss:$20 sps:$4 sm:$0xff]  }
 0x1c1   : > { %8898 = vmatpush1.bf16.msra.mxu0 %v13140_v36  ;;  %9554 = vmatpush1.bf16.msra.mxu1 %v13143_v16  ;;  %v13212_v36 = vld [vmem:[%s14539_s28 + $0x1158] ss:$20 sps:$4 sm:$0xff]   ;;  %v13215_v16 = vld [vmem:[%s14539_s28 + $0x1160] ss:$20 sps:$4 sm:$0xff]  }
 0x1c2   : > { %8899 = vmatprep.subr.bf16.mxu0 %v13148_v38  ;;  %9555 = vmatprep.subr.bf16.mxu1 %v13151_v39  ;;  %v13221_v38 = vld [vmem:[%s14539_s28 + $0x1184] ss:$20 sps:$4 sm:$0xff]   ;;  %v13224_v39 = vld [vmem:[%s14539_s28 + $0x118c] ss:$20 sps:$4 sm:$0xff]  }
 0x1c5   : > { %8900 = vmatpush1.bf16.msra.mxu0 %v13146_v40  ;;  %9556 = vmatpush1.bf16.msra.mxu1 %v13149_v41  ;;  %v15104_v40 = vrot.slane %v15019_v10, %v14598_v49  ;;  %v13219_v41 = vld [vmem:[%s14539_s28 + $0x1180] ss:$20 sps:$4 sm:$0xff]   ;;  %v13225_v10 = vld [vmem:[%s14539_s28 + $0x11a8] ss:$20 sps:$4 sm:$0xff]  }
 0x1c6   : > { %8901 = vmatprep.subr.bf16.mxu0 %v13154_v42  ;;  %9557 = vmatprep.subr.bf16.mxu1 %v13157_v44  ;;  %v13222_v42 = vld [vmem:[%s14539_s28 + $0x1188] ss:$20 sps:$4 sm:$0xff]   ;;  %v13227_v44 = vld [vmem:[%s14539_s28 + $0x11ac] ss:$20 sps:$4 sm:$0xff]  }
 0x1c9   : > { %8902 = vmatpush1.bf16.msra.mxu0 %v13152_v46  ;;  %9558 = vmatpush1.bf16.msra.mxu1 %v13155_v47  ;;  %v13230_v46 = vld [vmem:[%s14539_s28 + $0x11b4] ss:$20 sps:$4 sm:$0xff]   ;;  %v15112_v47 = vcombine.high %v15036_v24, %v15036_v24 }
 0x1ca   : > { %8903 = vmatprep.subr.bf16.mxu0 %v13160_v48  ;;  %9559 = vmatprep.subr.bf16.mxu1 %v13163_v50  ;;  %v13228_v48 = vld [vmem:[%s14539_s28 + $0x11b0] ss:$20 sps:$4 sm:$0xff]   ;;  %v13233_v50 = vld [vmem:[%s14539_s28 + $0x11d4] ss:$20 sps:$4 sm:$0xff]  }
 0x1cd   : > { %8904 = vmatpush1.bf16.msra.mxu0 %v13158_v53  ;;  %9560 = vmatpush1.bf16.msra.mxu1 %v13161_v54  ;;  %v13236_v53 = vld [vmem:[%s14539_s28 + $0x11dc] ss:$20 sps:$4 sm:$0xff]  }
 0x1ce   : > { %8905 = vmatprep.subr.bf16.mxu0 %v13166_v55  ;;  %9561 = vmatprep.subr.bf16.mxu1 %v13169_v56  ;;  %v13231_v54 = vld [vmem:[%s14539_s28 + $0x11d0] ss:$20 sps:$4 sm:$0xff]   ;;  %v13234_v55 = vld [vmem:[%s14539_s28 + $0x11d8] ss:$20 sps:$4 sm:$0xff]  }
 0x1cf   : > { %v13239_v56 = vld [vmem:[%s14539_s28 + $0x11fc] ss:$20 sps:$4 sm:$0xff]  }
 0x1d1   : > { %8906 = vmatpush1.bf16.msra.mxu0 %v13164_v57  ;;  %9562 = vmatpush1.bf16.msra.mxu1 %v13167_v58  ;;  %v13242_v57 = vld [vmem:[%s14539_s28 + $0x1204] ss:$20 sps:$4 sm:$0xff]  }
 0x1d2   : > { %8907 = vmatprep.subr.bf16.mxu0 %v13172_v59  ;;  %9563 = vmatprep.subr.bf16.mxu1 %v13175_v61  ;;  %v13237_v58 = vld [vmem:[%s14539_s28 + $0x11f8] ss:$20 sps:$4 sm:$0xff]   ;;  %v13240_v59 = vld [vmem:[%s14539_s28 + $0x1200] ss:$20 sps:$4 sm:$0xff]  }
 0x1d3   : > { %v13245_v61 = vld [vmem:[%s14539_s28 + $0x1224] ss:$20 sps:$4 sm:$0xff]  }
 0x1d5   : > { %8908 = vmatpush1.bf16.msra.mxu0 %v13170_v63  ;;  %9564 = vmatpush1.bf16.msra.mxu1 %v13173_v0  ;;  %v13248_v63 = vld [vmem:[%s14539_s28 + $0x122c] ss:$20 sps:$4 sm:$0xff]  }
 0x1d6   : > { %8909 = vmatprep.subr.bf16.mxu0 %v13178_v1  ;;  %9565 = vmatprep.subr.bf16.mxu1 %v13181_v2  ;;  %v13243_v0 = vld [vmem:[%s14539_s28 + $0x1220] ss:$20 sps:$4 sm:$0xff]   ;;  %v13246_v1 = vld [vmem:[%s14539_s28 + $0x1228] ss:$20 sps:$4 sm:$0xff]  }
 0x1d7   : > { %v13251_v2 = vld [vmem:[%s14539_s28 + $0x124c] ss:$20 sps:$4 sm:$0xff]  }
 0x1d9   : > { %8910 = vmatpush1.bf16.msra.mxu0 %v13176_v34  ;;  %9566 = vmatpush1.bf16.msra.mxu1 %v13179_v4  ;;  %v13254_v34 = vld [vmem:[%s14539_s28 + $0x1254] ss:$20 sps:$4 sm:$0xff]  }
 0x1da   : > { %8911 = vmatprep.subr.bf16.mxu0 %v13184_v5  ;;  %9567 = vmatprep.subr.bf16.mxu1 %v13187_v6  ;;  %v13249_v4 = vld [vmem:[%s14539_s28 + $0x1248] ss:$20 sps:$4 sm:$0xff]   ;;  %v13252_v5 = vld [vmem:[%s14539_s28 + $0x1250] ss:$20 sps:$4 sm:$0xff]  }
 0x1db   : > { %v13257_v6 = vld [vmem:[%s14539_s28 + $0x1274] ss:$20 sps:$4 sm:$0xff]  }
 0x1dd   : > { %8912 = vmatpush1.bf16.msra.mxu0 %v13182_v7  ;;  %9568 = vmatpush1.bf16.msra.mxu1 %v13185_v8  ;;  %v13260_v7 = vld [vmem:[%s14539_s28 + $0x127c] ss:$20 sps:$4 sm:$0xff]  }
 0x1de   : > { %8913 = vmatprep.subr.bf16.mxu0 %v13190_v9  ;;  %9569 = vmatprep.subr.bf16.mxu1 %v13193_v11  ;;  %v13255_v8 = vld [vmem:[%s14539_s28 + $0x1270] ss:$20 sps:$4 sm:$0xff]   ;;  %v13258_v9 = vld [vmem:[%s14539_s28 + $0x1278] ss:$20 sps:$4 sm:$0xff]  }
 0x1df   : > { %v13263_v11 = vld [vmem:[%s14539_s28 + $0x129c] ss:$20 sps:$4 sm:$0xff]  }
 0x1e1   : > { %8914 = vmatpush1.bf16.msra.mxu0 %v13188_v12  ;;  %9570 = vmatpush1.bf16.msra.mxu1 %v13191_v14  ;;  %v13266_v12 = vld [vmem:[%s14539_s28 + $0x12a4] ss:$20 sps:$4 sm:$0xff]  }
 0x1e2   : > { %8915 = vmatprep.subr.bf16.mxu0 %v13196_v15  ;;  %9571 = vmatprep.subr.bf16.mxu1 %v13199_v18  ;;  %v13261_v14 = vld [vmem:[%s14539_s28 + $0x1298] ss:$20 sps:$4 sm:$0xff]   ;;  %v13264_v15 = vld [vmem:[%s14539_s28 + $0x12a0] ss:$20 sps:$4 sm:$0xff]  }
 0x1e3   : > { %v13269_v18 = vld [vmem:[%s14539_s28 + $0x12c4] ss:$20 sps:$4 sm:$0xff]  }
 0x1e5   : > { %8916 = vmatpush1.bf16.msra.mxu0 %v13194_v19  ;;  %9572 = vmatpush1.bf16.msra.mxu1 %v13197_v20  ;;  %v13272_v19 = vld [vmem:[%s14539_s28 + $0x12cc] ss:$20 sps:$4 sm:$0xff]  }
 0x1e6   : > { %8917 = vmatprep.subr.bf16.mxu0 %v13202_v21  ;;  %9573 = vmatprep.subr.bf16.mxu1 %v13205_v22  ;;  %v13267_v20 = vld [vmem:[%s14539_s28 + $0x12c0] ss:$20 sps:$4 sm:$0xff]   ;;  %v13270_v21 = vld [vmem:[%s14539_s28 + $0x12c8] ss:$20 sps:$4 sm:$0xff]  }
 0x1e7   : > { %v13275_v22 = vld [vmem:[%s14539_s28 + $0x12ec] ss:$20 sps:$4 sm:$0xff]  }
 0x1e9   : > { %8918 = vmatpush1.bf16.msra.mxu0 %v13200_v25  ;;  %9574 = vmatpush1.bf16.msra.mxu1 %v13203_v26  ;;  %v13278_v25 = vld [vmem:[%s14539_s28 + $0x12f4] ss:$20 sps:$4 sm:$0xff]  }
 0x1ea   : > { %8919 = vmatprep.subr.bf16.mxu0 %v13208_v28  ;;  %9575 = vmatprep.subr.bf16.mxu1 %v13211_v29  ;;  %v13273_v26 = vld [vmem:[%s14539_s28 + $0x12e8] ss:$20 sps:$4 sm:$0xff]   ;;  %v13276_v28 = vld [vmem:[%s14539_s28 + $0x12f0] ss:$20 sps:$4 sm:$0xff]  }
 0x1eb   : > { %v13281_v29 = vld [vmem:[%s14539_s28 + $0x1314] ss:$20 sps:$4 sm:$0xff]  }
 0x1ed   : > { %8920 = vmatpush1.bf16.msra.mxu0 %v13206_v30  ;;  %9576 = vmatpush1.bf16.msra.mxu1 %v13209_v31  ;;  %v13284_v30 = vld [vmem:[%s14539_s28 + $0x131c] ss:$20 sps:$4 sm:$0xff]  }
 0x1ee   : > { %8921 = vmatprep.subr.bf16.mxu0 %v13214_v32  ;;  %9577 = vmatprep.subr.bf16.mxu1 %v13217_v35  ;;  %v13279_v31 = vld [vmem:[%s14539_s28 + $0x1310] ss:$20 sps:$4 sm:$0xff]   ;;  %v13282_v32 = vld [vmem:[%s14539_s28 + $0x1318] ss:$20 sps:$4 sm:$0xff]  }
 0x1ef   : > { %v13287_v35 = vld [vmem:[%s14539_s28 + $0x133c] ss:$20 sps:$4 sm:$0xff]  }
 0x1f1   : > { %8922 = vmatpush1.bf16.msra.mxu0 %v13212_v36  ;;  %9578 = vmatpush1.bf16.msra.mxu1 %v13215_v16  ;;  %v13290_v36 = vld [vmem:[%s14539_s28 + $0x1344] ss:$20 sps:$4 sm:$0xff]  }
 0x1f2   : > { %8932 = vmatprep.subr.bf16.mxu0 %v13221_v38  ;;  %9588 = vmatprep.subr.bf16.mxu1 %v13224_v39  ;;  %v13285_v16 = vld [vmem:[%s14539_s28 + $0x1338] ss:$20 sps:$4 sm:$0xff]   ;;  %v13288_v38 = vld [vmem:[%s14539_s28 + $0x1340] ss:$20 sps:$4 sm:$0xff]  }
 0x1f3   : > { %v13293_v39 = vld [vmem:[%s14539_s28 + $0x1364] ss:$20 sps:$4 sm:$0xff]  }
 0x1f4   : > { %8924 = vmatmul.mubr.bf16.vlgmr.msra.gmra.mrb[0].mxu0 %v15104_v40  ;;  %9580 = vmatmul.mubr.bf16.vlgmr.msra.gmra.mrb[0].mxu1 %v15104_v40 }
 0x1f5   : > { %8933 = vmatpush1.bf16.msra.mxu0 %v13219_v41  ;;  %9589 = vmatpush1.bf16.msra.mxu1 %v13222_v42  ;;  %v13296_v41 = vld [vmem:[%s14539_s28 + $0x136c] ss:$20 sps:$4 sm:$0xff]  }
 0x1f6   : > { %8934 = vmatprep.subr.bf16.mxu0 %v13227_v44  ;;  %9590 = vmatprep.subr.bf16.mxu1 %v13230_v46  ;;  %v13291_v42 = vld [vmem:[%s14539_s28 + $0x1360] ss:$20 sps:$4 sm:$0xff]   ;;  %v13294_v44 = vld [vmem:[%s14539_s28 + $0x1368] ss:$20 sps:$4 sm:$0xff]  }
 0x1f7   : > { %8964 = vmatprep.mubr.bf16.mxu0 %v15112_v47  ;;  %9620 = vmatprep.mubr.bf16.mxu1 %v15112_v47  ;;  %v13299_v46 = vld [vmem:[%s14539_s28 + $0x138c] ss:$20 sps:$4 sm:$0xff]  }
 0x1f9   : > { %8935 = vmatpush1.bf16.msra.mxu0 %v13225_v10  ;;  %9591 = vmatpush1.bf16.msra.mxu1 %v13228_v48  ;;  %v13302_v10 = vld [vmem:[%s14539_s28 + $0x1394] ss:$20 sps:$4 sm:$0xff]  }
 0x1fa   : > { %8936 = vmatprep.subr.bf16.mxu0 %v13233_v50  ;;  %9592 = vmatprep.subr.bf16.mxu1 %v13236_v53  ;;  %v13297_v48 = vld [vmem:[%s14539_s28 + $0x1388] ss:$20 sps:$4 sm:$0xff]   ;;  %v13300_v50 = vld [vmem:[%s14539_s28 + $0x1390] ss:$20 sps:$4 sm:$0xff]  }
 0x1fb   : > { %v13305_v53 = vld [vmem:[%s14539_s28 + $0x13b4] ss:$20 sps:$4 sm:$0xff]  }
 0x1fd   : > { %8937 = vmatpush1.bf16.msra.mxu0 %v13231_v54  ;;  %9593 = vmatpush1.bf16.msra.mxu1 %v13234_v55  ;;  %v13308_v54 = vld [vmem:[%s14539_s28 + $0x13bc] ss:$20 sps:$4 sm:$0xff]  }
 0x1fe   : > { %8938 = vmatprep.subr.bf16.mxu0 %v13239_v56  ;;  %9594 = vmatprep.subr.bf16.mxu1 %v13242_v57  ;;  %v15171_v55 = vld.sshfl [vmem:[%s14595_s29 + $0x10] sm:$0xff pattern:$0x75316420]  ;;  %v13306_v57 = vld [vmem:[%s14539_s28 + $0x13b8] ss:$20 sps:$4 sm:$0xff]  }
 0x1ff   : > { %v13303_v56 = vld [vmem:[%s14539_s28 + $0x13b0] ss:$20 sps:$4 sm:$0xff]  }
 0x201   : > { %8939 = vmatpush1.bf16.msra.mxu0 %v13237_v58  ;;  %9595 = vmatpush1.bf16.msra.mxu1 %v13240_v59  ;;  %v13311_v58 = vld [vmem:[%s14539_s28 + $0x13dc] ss:$20 sps:$4 sm:$0xff]   ;;  %v13314_v59 = vld [vmem:[%s14539_s28 + $0x13e4] ss:$20 sps:$4 sm:$0xff]  }
 0x202   : > { %8940 = vmatprep.subr.bf16.mxu0 %v13245_v61  ;;  %9596 = vmatprep.subr.bf16.mxu1 %v13248_v63  ;;  %v13309_v61 = vld [vmem:[%s14539_s28 + $0x13d8] ss:$20 sps:$4 sm:$0xff]   ;;  %v13312_v63 = vld [vmem:[%s14539_s28 + $0x13e0] ss:$20 sps:$4 sm:$0xff]  }
 0x205   : > { %8941 = vmatpush1.bf16.msra.mxu0 %v13243_v0  ;;  %9597 = vmatpush1.bf16.msra.mxu1 %v13246_v1  ;;  %v13317_v0 = vld [vmem:[%s14539_s28 + $0x1404] ss:$20 sps:$4 sm:$0xff]   ;;  %v13320_v1 = vld [vmem:[%s14539_s28 + $0x140c] ss:$20 sps:$4 sm:$0xff]  }
 0x206   : > { %8942 = vmatprep.subr.bf16.mxu0 %v13251_v2  ;;  %9598 = vmatprep.subr.bf16.mxu1 %v13254_v34  ;;  %v1874_v2 = vcombine.high %v15171_v55, %v15171_v55  ;;  %v15185_v34 = vcombine.high %v15104_v40, %v15104_v40 }
 0x209   : > { %8943 = vmatpush1.bf16.msra.mxu0 %v13249_v4  ;;  %9599 = vmatpush1.bf16.msra.mxu1 %v13252_v5  ;;  %v13315_v4 = vld [vmem:[%s14539_s28 + $0x1400] ss:$20 sps:$4 sm:$0xff]   ;;  %v13318_v5 = vld [vmem:[%s14539_s28 + $0x1408] ss:$20 sps:$4 sm:$0xff]  }
 0x20a   : > { %8944 = vmatprep.subr.bf16.mxu0 %v13257_v6  ;;  %9600 = vmatprep.subr.bf16.mxu1 %v13260_v7  ;;  %v13323_v6 = vld [vmem:[%s14539_s28 + $0x142c] ss:$20 sps:$4 sm:$0xff]   ;;  %v13326_v7 = vld [vmem:[%s14539_s28 + $0x1434] ss:$20 sps:$4 sm:$0xff]  }
 0x20d   : > { %8945 = vmatpush1.bf16.msra.mxu0 %v13255_v8  ;;  %9601 = vmatpush1.bf16.msra.mxu1 %v13258_v9  ;;  %v15192_v8 = vrot.slane %v1874_v2, %v14598_v49  ;;  %v13321_v9 = vld [vmem:[%s14539_s28 + $0x1428] ss:$20 sps:$4 sm:$0xff]   ;;  %v13386_v2 = vld [vmem:[%s14539_s28 + $0x15c4] ss:$20 sps:$4 sm:$0xff]  }
 0x20e   : > { %8946 = vmatprep.subr.bf16.mxu0 %v13263_v11  ;;  %9602 = vmatprep.subr.bf16.mxu1 %v13266_v12  ;;  %v13324_v11 = vld [vmem:[%s14539_s28 + $0x1430] ss:$20 sps:$4 sm:$0xff]   ;;  %v13329_v12 = vld [vmem:[%s14539_s28 + $0x1454] ss:$20 sps:$4 sm:$0xff]  }
 0x211   : > { %8947 = vmatpush1.bf16.msra.mxu0 %v13261_v14  ;;  %9603 = vmatpush1.bf16.msra.mxu1 %v13264_v15  ;;  %v13332_v14 = vld [vmem:[%s14539_s28 + $0x145c] ss:$20 sps:$4 sm:$0xff]  }
 0x212   : > { %8948 = vmatprep.subr.bf16.mxu0 %v13269_v18  ;;  %9604 = vmatprep.subr.bf16.mxu1 %v13272_v19  ;;  %v13327_v15 = vld [vmem:[%s14539_s28 + $0x1450] ss:$20 sps:$4 sm:$0xff]   ;;  %v13330_v18 = vld [vmem:[%s14539_s28 + $0x1458] ss:$20 sps:$4 sm:$0xff]  }
 0x213   : > { %v13335_v19 = vld [vmem:[%s14539_s28 + $0x147c] ss:$20 sps:$4 sm:$0xff]  }
 0x215   : > { %8949 = vmatpush1.bf16.msra.mxu0 %v13267_v20  ;;  %9605 = vmatpush1.bf16.msra.mxu1 %v13270_v21  ;;  %v13338_v20 = vld [vmem:[%s14539_s28 + $0x1484] ss:$20 sps:$4 sm:$0xff]  }
 0x216   : > { %8950 = vmatprep.subr.bf16.mxu0 %v13275_v22  ;;  %9606 = vmatprep.subr.bf16.mxu1 %v13278_v25  ;;  %v13333_v21 = vld [vmem:[%s14539_s28 + $0x1478] ss:$20 sps:$4 sm:$0xff]   ;;  %v13336_v22 = vld [vmem:[%s14539_s28 + $0x1480] ss:$20 sps:$4 sm:$0xff]  }
 0x217   : > { %v13341_v25 = vld [vmem:[%s14539_s28 + $0x14a4] ss:$20 sps:$4 sm:$0xff]  }
 0x219   : > { %8951 = vmatpush1.bf16.msra.mxu0 %v13273_v26  ;;  %9607 = vmatpush1.bf16.msra.mxu1 %v13276_v28  ;;  %v13344_v26 = vld [vmem:[%s14539_s28 + $0x14ac] ss:$20 sps:$4 sm:$0xff]  }
 0x21a   : > { %8952 = vmatprep.subr.bf16.mxu0 %v13281_v29  ;;  %9608 = vmatprep.subr.bf16.mxu1 %v13284_v30  ;;  %v13339_v28 = vld [vmem:[%s14539_s28 + $0x14a0] ss:$20 sps:$4 sm:$0xff]   ;;  %v13342_v29 = vld [vmem:[%s14539_s28 + $0x14a8] ss:$20 sps:$4 sm:$0xff]  }
 0x21b   : > { %v13347_v30 = vld [vmem:[%s14539_s28 + $0x14cc] ss:$20 sps:$4 sm:$0xff]  }
 0x21d   : > { %8953 = vmatpush1.bf16.msra.mxu0 %v13279_v31  ;;  %9609 = vmatpush1.bf16.msra.mxu1 %v13282_v32  ;;  %v13350_v31 = vld [vmem:[%s14539_s28 + $0x14d4] ss:$20 sps:$4 sm:$0xff]  }
 0x21e   : > { %8954 = vmatprep.subr.bf16.mxu0 %v13287_v35  ;;  %9610 = vmatprep.subr.bf16.mxu1 %v13290_v36  ;;  %v13345_v32 = vld [vmem:[%s14539_s28 + $0x14c8] ss:$20 sps:$4 sm:$0xff]   ;;  %v13348_v35 = vld [vmem:[%s14539_s28 + $0x14d0] ss:$20 sps:$4 sm:$0xff]  }
 0x21f   : > { %v13353_v36 = vld [vmem:[%s14539_s28 + $0x14f4] ss:$20 sps:$4 sm:$0xff]  }
 0x221   : > { %8955 = vmatpush1.bf16.msra.mxu0 %v13285_v16  ;;  %9611 = vmatpush1.bf16.msra.mxu1 %v13288_v38  ;;  %v13356_v16 = vld [vmem:[%s14539_s28 + $0x14fc] ss:$20 sps:$4 sm:$0xff]  }
 0x222   : > { %8956 = vmatprep.subr.bf16.mxu0 %v13293_v39  ;;  %9612 = vmatprep.subr.bf16.mxu1 %v13296_v41  ;;  %v13351_v38 = vld [vmem:[%s14539_s28 + $0x14f0] ss:$20 sps:$4 sm:$0xff]   ;;  %v13354_v39 = vld [vmem:[%s14539_s28 + $0x14f8] ss:$20 sps:$4 sm:$0xff]  }
 0x223   : > { %v13359_v41 = vld [vmem:[%s14539_s28 + $0x151c] ss:$20 sps:$4 sm:$0xff]  }
 0x225   : > { %8957 = vmatpush1.bf16.msra.mxu0 %v13291_v42  ;;  %9613 = vmatpush1.bf16.msra.mxu1 %v13294_v44  ;;  %v13362_v42 = vld [vmem:[%s14539_s28 + $0x1524] ss:$20 sps:$4 sm:$0xff]  }
 0x226   : > { %8958 = vmatprep.subr.bf16.mxu0 %v13299_v46  ;;  %9614 = vmatprep.subr.bf16.mxu1 %v13302_v10  ;;  %v13357_v44 = vld [vmem:[%s14539_s28 + $0x1518] ss:$20 sps:$4 sm:$0xff]   ;;  %v13360_v46 = vld [vmem:[%s14539_s28 + $0x1520] ss:$20 sps:$4 sm:$0xff]  }
 0x227   : > { %v13365_v10 = vld [vmem:[%s14539_s28 + $0x1544] ss:$20 sps:$4 sm:$0xff]  }
 0x229   : > { %8959 = vmatpush1.bf16.msra.mxu0 %v13297_v48  ;;  %9615 = vmatpush1.bf16.msra.mxu1 %v13300_v50  ;;  %v13368_v48 = vld [vmem:[%s14539_s28 + $0x154c] ss:$20 sps:$4 sm:$0xff]  }
 0x22a   : > { %8960 = vmatprep.subr.bf16.mxu0 %v13305_v53  ;;  %9616 = vmatprep.subr.bf16.mxu1 %v13308_v54  ;;  %v13363_v50 = vld [vmem:[%s14539_s28 + $0x1540] ss:$20 sps:$4 sm:$0xff]   ;;  %v13366_v53 = vld [vmem:[%s14539_s28 + $0x1548] ss:$20 sps:$4 sm:$0xff]  }
 0x22b   : > { %v13371_v54 = vld [vmem:[%s14539_s28 + $0x156c] ss:$20 sps:$4 sm:$0xff]  }
 0x22d   : > { %8961 = vmatpush1.bf16.msra.mxu0 %v13303_v56  ;;  %9617 = vmatpush1.bf16.msra.mxu1 %v13306_v57  ;;  %v13374_v56 = vld [vmem:[%s14539_s28 + $0x1574] ss:$20 sps:$4 sm:$0xff]  }
 0x22e   : > { %8962 = vmatprep.subr.bf16.mxu0 %v13311_v58  ;;  %9618 = vmatprep.subr.bf16.mxu1 %v13314_v59  ;;  %v13369_v57 = vld [vmem:[%s14539_s28 + $0x1568] ss:$20 sps:$4 sm:$0xff]   ;;  %v13372_v58 = vld [vmem:[%s14539_s28 + $0x1570] ss:$20 sps:$4 sm:$0xff]  }
 0x22f   : > { %v13377_v59 = vld [vmem:[%s14539_s28 + $0x1594] ss:$20 sps:$4 sm:$0xff]  }
 0x231   : > { %8963 = vmatpush1.bf16.msra.mxu0 %v13309_v61  ;;  %9619 = vmatpush1.bf16.msra.mxu1 %v13312_v63  ;;  %v13380_v61 = vld [vmem:[%s14539_s28 + $0x159c] ss:$20 sps:$4 sm:$0xff]  }
 0x232   : > { %8973 = vmatprep.subr.bf16.mxu0 %v13317_v0  ;;  %9629 = vmatprep.subr.bf16.mxu1 %v13320_v1  ;;  %v13375_v63 = vld [vmem:[%s14539_s28 + $0x1590] ss:$20 sps:$4 sm:$0xff]   ;;  %v13378_v0 = vld [vmem:[%s14539_s28 + $0x1598] ss:$20 sps:$4 sm:$0xff]  }
 0x233   : > { %v13383_v1 = vld [vmem:[%s14539_s28 + $0x15bc] ss:$20 sps:$4 sm:$0xff]  }
 0x234   : > { %8965 = vmatmul.mubr.bf16.vlgmr.msra.gmra.mrb[0].mxu0 %v15185_v34  ;;  %9621 = vmatmul.mubr.bf16.vlgmr.msra.gmra.mrb[0].mxu1 %v15185_v34 }
 0x235   : > { %8974 = vmatpush1.bf16.msra.mxu0 %v13315_v4  ;;  %9630 = vmatpush1.bf16.msra.mxu1 %v13318_v5  ;;  %v13381_v4 = vld [vmem:[%s14539_s28 + $0x15b8] ss:$20 sps:$4 sm:$0xff]   ;;  %v13384_v5 = vld [vmem:[%s14539_s28 + $0x15c0] ss:$20 sps:$4 sm:$0xff]  }
 0x236   : > { %8975 = vmatprep.subr.bf16.mxu0 %v13323_v6  ;;  %9631 = vmatprep.subr.bf16.mxu1 %v13326_v7  ;;  %v13389_v6 = vld [vmem:[%s14539_s28 + $0x15e4] ss:$20 sps:$4 sm:$0xff]   ;;  %v13392_v7 = vld [vmem:[%s14539_s28 + $0x15ec] ss:$20 sps:$4 sm:$0xff]  }
 0x237   : > { %9005 = vmatprep.mubr.bf16.mxu0 %v15192_v8  ;;  %9661 = vmatprep.mubr.bf16.mxu1 %v15192_v8 }
 0x239   : > { %8976 = vmatpush1.bf16.msra.mxu0 %v13321_v9  ;;  %9632 = vmatpush1.bf16.msra.mxu1 %v13324_v11  ;;  %v13387_v9 = vld [vmem:[%s14539_s28 + $0x15e0] ss:$20 sps:$4 sm:$0xff]   ;;  %v13390_v11 = vld [vmem:[%s14539_s28 + $0x15e8] ss:$20 sps:$4 sm:$0xff]  }
 0x23a   : > { %8977 = vmatprep.subr.bf16.mxu0 %v13329_v12  ;;  %9633 = vmatprep.subr.bf16.mxu1 %v13332_v14  ;;  %v13395_v12 = vld [vmem:[%s14539_s28 + $0x160c] ss:$20 sps:$4 sm:$0xff]   ;;  %v13398_v14 = vld [vmem:[%s14539_s28 + $0x1614] ss:$20 sps:$4 sm:$0xff]  }
 0x23d   : > { %8978 = vmatpush1.bf16.msra.mxu0 %v13327_v15  ;;  %9634 = vmatpush1.bf16.msra.mxu1 %v13330_v18  ;;  %v13393_v15 = vld [vmem:[%s14539_s28 + $0x1608] ss:$20 sps:$4 sm:$0xff]   ;;  %v13396_v18 = vld [vmem:[%s14539_s28 + $0x1610] ss:$20 sps:$4 sm:$0xff]  }
 0x23e   : > { %8979 = vmatprep.subr.bf16.mxu0 %v13335_v19  ;;  %9635 = vmatprep.subr.bf16.mxu1 %v13338_v20  ;;  %v13401_v19 = vld [vmem:[%s14539_s28 + $0x1634] ss:$20 sps:$4 sm:$0xff]   ;;  %v13404_v20 = vld [vmem:[%s14539_s28 + $0x163c] ss:$20 sps:$4 sm:$0xff]  }
 0x241   : > { %8980 = vmatpush1.bf16.msra.mxu0 %v13333_v21  ;;  %9636 = vmatpush1.bf16.msra.mxu1 %v13336_v22  ;;  %v13399_v21 = vld [vmem:[%s14539_s28 + $0x1630] ss:$20 sps:$4 sm:$0xff]   ;;  %v13402_v22 = vld [vmem:[%s14539_s28 + $0x1638] ss:$20 sps:$4 sm:$0xff]  }
 0x242   : > { %8981 = vmatprep.subr.bf16.mxu0 %v13341_v25  ;;  %9637 = vmatprep.subr.bf16.mxu1 %v13344_v26  ;;  %v13407_v25 = vld [vmem:[%s14539_s28 + $0x165c] ss:$20 sps:$4 sm:$0xff]   ;;  %v13410_v26 = vld [vmem:[%s14539_s28 + $0x1664] ss:$20 sps:$4 sm:$0xff]  }
 0x245   : > { %8982 = vmatpush1.bf16.msra.mxu0 %v13339_v28  ;;  %9638 = vmatpush1.bf16.msra.mxu1 %v13342_v29  ;;  %v13405_v28 = vld [vmem:[%s14539_s28 + $0x1658] ss:$20 sps:$4 sm:$0xff]   ;;  %v13408_v29 = vld [vmem:[%s14539_s28 + $0x1660] ss:$20 sps:$4 sm:$0xff]  }
 0x246   : > { %8983 = vmatprep.subr.bf16.mxu0 %v13347_v30  ;;  %9639 = vmatprep.subr.bf16.mxu1 %v13350_v31  ;;  %v13413_v30 = vld [vmem:[%s14539_s28 + $0x1684] ss:$20 sps:$4 sm:$0xff]   ;;  %v13416_v31 = vld [vmem:[%s14539_s28 + $0x168c] ss:$20 sps:$4 sm:$0xff]  }
 0x249   : > { %8984 = vmatpush1.bf16.msra.mxu0 %v13345_v32  ;;  %9640 = vmatpush1.bf16.msra.mxu1 %v13348_v35  ;;  %v15260_v32 = vrot.slane %v15171_v55, %v14598_v49  ;;  %v13411_v35 = vld [vmem:[%s14539_s28 + $0x1680] ss:$20 sps:$4 sm:$0xff]   ;;  %v13417_v55 = vld [vmem:[%s14539_s28 + $0x16a8] ss:$20 sps:$4 sm:$0xff]  }
 0x24a   : > { %8985 = vmatprep.subr.bf16.mxu0 %v13353_v36  ;;  %9641 = vmatprep.subr.bf16.mxu1 %v13356_v16  ;;  %v13414_v36 = vld [vmem:[%s14539_s28 + $0x1688] ss:$20 sps:$4 sm:$0xff]   ;;  %v13419_v16 = vld [vmem:[%s14539_s28 + $0x16ac] ss:$20 sps:$4 sm:$0xff]  }
 0x24d   : > { %8986 = vmatpush1.bf16.msra.mxu0 %v13351_v38  ;;  %9642 = vmatpush1.bf16.msra.mxu1 %v13354_v39  ;;  %v13422_v38 = vld [vmem:[%s14539_s28 + $0x16b4] ss:$20 sps:$4 sm:$0xff]   ;;  %v15268_v39 = vcombine.high %v15192_v8, %v15192_v8 }
 0x24e   : > { %8987 = vmatprep.subr.bf16.mxu0 %v13359_v41  ;;  %9643 = vmatprep.subr.bf16.mxu1 %v13362_v42  ;;  %v13420_v41 = vld [vmem:[%s14539_s28 + $0x16b0] ss:$20 sps:$4 sm:$0xff]   ;;  %v13425_v42 = vld [vmem:[%s14539_s28 + $0x16d4] ss:$20 sps:$4 sm:$0xff]  }
 0x251   : > { %8988 = vmatpush1.bf16.msra.mxu0 %v13357_v44  ;;  %9644 = vmatpush1.bf16.msra.mxu1 %v13360_v46  ;;  %v13428_v44 = vld [vmem:[%s14539_s28 + $0x16dc] ss:$20 sps:$4 sm:$0xff]  }
 0x252   : > { %8989 = vmatprep.subr.bf16.mxu0 %v13365_v10  ;;  %9645 = vmatprep.subr.bf16.mxu1 %v13368_v48  ;;  %v13423_v46 = vld [vmem:[%s14539_s28 + $0x16d0] ss:$20 sps:$4 sm:$0xff]   ;;  %v13426_v10 = vld [vmem:[%s14539_s28 + $0x16d8] ss:$20 sps:$4 sm:$0xff]  }
 0x253   : > { %v13431_v48 = vld [vmem:[%s14539_s28 + $0x16fc] ss:$20 sps:$4 sm:$0xff]  }
 0x255   : > { %8990 = vmatpush1.bf16.msra.mxu0 %v13363_v50  ;;  %9646 = vmatpush1.bf16.msra.mxu1 %v13366_v53  ;;  %v13434_v50 = vld [vmem:[%s14539_s28 + $0x1704] ss:$20 sps:$4 sm:$0xff]  }
 0x256   : > { %8991 = vmatprep.subr.bf16.mxu0 %v13371_v54  ;;  %9647 = vmatprep.subr.bf16.mxu1 %v13374_v56  ;;  %v13429_v53 = vld [vmem:[%s14539_s28 + $0x16f8] ss:$20 sps:$4 sm:$0xff]   ;;  %v13432_v54 = vld [vmem:[%s14539_s28 + $0x1700] ss:$20 sps:$4 sm:$0xff]  }
 0x257   : > { %v13437_v56 = vld [vmem:[%s14539_s28 + $0x1724] ss:$20 sps:$4 sm:$0xff]  }
 0x259   : > { %8992 = vmatpush1.bf16.msra.mxu0 %v13369_v57  ;;  %9648 = vmatpush1.bf16.msra.mxu1 %v13372_v58  ;;  %v13440_v57 = vld [vmem:[%s14539_s28 + $0x172c] ss:$20 sps:$4 sm:$0xff]  }
 0x25a   : > { %8993 = vmatprep.subr.bf16.mxu0 %v13377_v59  ;;  %9649 = vmatprep.subr.bf16.mxu1 %v13380_v61  ;;  %v13435_v58 = vld [vmem:[%s14539_s28 + $0x1720] ss:$20 sps:$4 sm:$0xff]   ;;  %v13438_v59 = vld [vmem:[%s14539_s28 + $0x1728] ss:$20 sps:$4 sm:$0xff]  }
 0x25b   : > { %v13443_v61 = vld [vmem:[%s14539_s28 + $0x174c] ss:$20 sps:$4 sm:$0xff]  }
 0x25d   : > { %8994 = vmatpush1.bf16.msra.mxu0 %v13375_v63  ;;  %9650 = vmatpush1.bf16.msra.mxu1 %v13378_v0  ;;  %v13446_v63 = vld [vmem:[%s14539_s28 + $0x1754] ss:$20 sps:$4 sm:$0xff]  }
 0x25e   : > { %8995 = vmatprep.subr.bf16.mxu0 %v13383_v1  ;;  %9651 = vmatprep.subr.bf16.mxu1 %v13386_v2  ;;  %v13441_v0 = vld [vmem:[%s14539_s28 + $0x1748] ss:$20 sps:$4 sm:$0xff]   ;;  %v13444_v1 = vld [vmem:[%s14539_s28 + $0x1750] ss:$20 sps:$4 sm:$0xff]  }
 0x25f   : > { %v13449_v2 = vld [vmem:[%s14539_s28 + $0x1774] ss:$20 sps:$4 sm:$0xff]  }
 0x261   : > { %8996 = vmatpush1.bf16.msra.mxu0 %v13381_v4  ;;  %9652 = vmatpush1.bf16.msra.mxu1 %v13384_v5  ;;  %v13452_v4 = vld [vmem:[%s14539_s28 + $0x177c] ss:$20 sps:$4 sm:$0xff]  }
 0x262   : > { %8997 = vmatprep.subr.bf16.mxu0 %v13389_v6  ;;  %9653 = vmatprep.subr.bf16.mxu1 %v13392_v7  ;;  %v13447_v5 = vld [vmem:[%s14539_s28 + $0x1770] ss:$20 sps:$4 sm:$0xff]   ;;  %v13450_v6 = vld [vmem:[%s14539_s28 + $0x1778] ss:$20 sps:$4 sm:$0xff]  }
 0x263   : > { %v13455_v7 = vld [vmem:[%s14539_s28 + $0x179c] ss:$20 sps:$4 sm:$0xff]  }
 0x265   : > { %8998 = vmatpush1.bf16.msra.mxu0 %v13387_v9  ;;  %9654 = vmatpush1.bf16.msra.mxu1 %v13390_v11  ;;  %v13458_v9 = vld [vmem:[%s14539_s28 + $0x17a4] ss:$20 sps:$4 sm:$0xff]  }
 0x266   : > { %8999 = vmatprep.subr.bf16.mxu0 %v13395_v12  ;;  %9655 = vmatprep.subr.bf16.mxu1 %v13398_v14  ;;  %v13453_v11 = vld [vmem:[%s14539_s28 + $0x1798] ss:$20 sps:$4 sm:$0xff]   ;;  %v13456_v12 = vld [vmem:[%s14539_s28 + $0x17a0] ss:$20 sps:$4 sm:$0xff]  }
 0x267   : > { %v13461_v14 = vld [vmem:[%s14539_s28 + $0x17c4] ss:$20 sps:$4 sm:$0xff]  }
 0x269   : > { %9000 = vmatpush1.bf16.msra.mxu0 %v13393_v15  ;;  %9656 = vmatpush1.bf16.msra.mxu1 %v13396_v18  ;;  %v13464_v15 = vld [vmem:[%s14539_s28 + $0x17cc] ss:$20 sps:$4 sm:$0xff]  }
 0x26a   : > { %9001 = vmatprep.subr.bf16.mxu0 %v13401_v19  ;;  %9657 = vmatprep.subr.bf16.mxu1 %v13404_v20  ;;  %v13459_v18 = vld [vmem:[%s14539_s28 + $0x17c0] ss:$20 sps:$4 sm:$0xff]   ;;  %v13462_v19 = vld [vmem:[%s14539_s28 + $0x17c8] ss:$20 sps:$4 sm:$0xff]  }
 0x26b   : > { %v13467_v20 = vld [vmem:[%s14539_s28 + $0x17ec] ss:$20 sps:$4 sm:$0xff]  }
 0x26d   : > { %9002 = vmatpush1.bf16.msra.mxu0 %v13399_v21  ;;  %9658 = vmatpush1.bf16.msra.mxu1 %v13402_v22  ;;  %v13470_v21 = vld [vmem:[%s14539_s28 + $0x17f4] ss:$20 sps:$4 sm:$0xff]  }
 0x26e   : > { %9003 = vmatprep.subr.bf16.mxu0 %v13407_v25  ;;  %9659 = vmatprep.subr.bf16.mxu1 %v13410_v26  ;;  %v13465_v22 = vld [vmem:[%s14539_s28 + $0x17e8] ss:$20 sps:$4 sm:$0xff]   ;;  %v13468_v25 = vld [vmem:[%s14539_s28 + $0x17f0] ss:$20 sps:$4 sm:$0xff]  }
 0x26f   : > { %v13473_v26 = vld [vmem:[%s14539_s28 + $0x1814] ss:$20 sps:$4 sm:$0xff]  }
 0x271   : > { %9004 = vmatpush1.bf16.msra.mxu0 %v13405_v28  ;;  %9660 = vmatpush1.bf16.msra.mxu1 %v13408_v29  ;;  %v13476_v28 = vld [vmem:[%s14539_s28 + $0x181c] ss:$20 sps:$4 sm:$0xff]  }
 0x272   : > { %9014 = vmatprep.subr.bf16.mxu0 %v13413_v30  ;;  %9670 = vmatprep.subr.bf16.mxu1 %v13416_v31  ;;  %v13471_v29 = vld [vmem:[%s14539_s28 + $0x1810] ss:$20 sps:$4 sm:$0xff]   ;;  %v13474_v30 = vld [vmem:[%s14539_s28 + $0x1818] ss:$20 sps:$4 sm:$0xff]  }
 0x273   : > { %v13479_v31 = vld [vmem:[%s14539_s28 + $0x183c] ss:$20 sps:$4 sm:$0xff]  }
 0x274   : > { %9006 = vmatmul.mubr.bf16.vlgmr.msra.gmra.mrb[0].mxu0 %v15260_v32  ;;  %9662 = vmatmul.mubr.bf16.vlgmr.msra.gmra.mrb[0].mxu1 %v15260_v32 }
 0x275   : > { %9015 = vmatpush1.bf16.msra.mxu0 %v13411_v35  ;;  %9671 = vmatpush1.bf16.msra.mxu1 %v13414_v36  ;;  %v13482_v35 = vld [vmem:[%s14539_s28 + $0x1844] ss:$20 sps:$4 sm:$0xff]  }
 0x276   : > { %9016 = vmatprep.subr.bf16.mxu0 %v13419_v16  ;;  %9672 = vmatprep.subr.bf16.mxu1 %v13422_v38  ;;  %v13477_v36 = vld [vmem:[%s14539_s28 + $0x1838] ss:$20 sps:$4 sm:$0xff]   ;;  %v13480_v16 = vld [vmem:[%s14539_s28 + $0x1840] ss:$20 sps:$4 sm:$0xff]  }
 0x277   : > { %9046 = vmatprep.mubr.bf16.mxu0 %v15268_v39  ;;  %9702 = vmatprep.mubr.bf16.mxu1 %v15268_v39  ;;  %v13485_v38 = vld [vmem:[%s14539_s28 + $0x1864] ss:$20 sps:$4 sm:$0xff]  }
 0x279   : > { %9017 = vmatpush1.bf16.msra.mxu0 %v13417_v55  ;;  %9673 = vmatpush1.bf16.msra.mxu1 %v13420_v41  ;;  %v13488_v55 = vld [vmem:[%s14539_s28 + $0x186c] ss:$20 sps:$4 sm:$0xff]  }
 0x27a   : > { %9018 = vmatprep.subr.bf16.mxu0 %v13425_v42  ;;  %9674 = vmatprep.subr.bf16.mxu1 %v13428_v44  ;;  %v13483_v41 = vld [vmem:[%s14539_s28 + $0x1860] ss:$20 sps:$4 sm:$0xff]   ;;  %v13486_v42 = vld [vmem:[%s14539_s28 + $0x1868] ss:$20 sps:$4 sm:$0xff]  }
 0x27b   : > { %v13491_v44 = vld [vmem:[%s14539_s28 + $0x188c] ss:$20 sps:$4 sm:$0xff]  }
 0x27d   : > { %9019 = vmatpush1.bf16.msra.mxu0 %v13423_v46  ;;  %9675 = vmatpush1.bf16.msra.mxu1 %v13426_v10  ;;  %v13494_v46 = vld [vmem:[%s14539_s28 + $0x1894] ss:$20 sps:$4 sm:$0xff]  }
 0x27e   : > { %9020 = vmatprep.subr.bf16.mxu0 %v13431_v48  ;;  %9676 = vmatprep.subr.bf16.mxu1 %v13434_v50  ;;  %v13489_v10 = vld [vmem:[%s14539_s28 + $0x1888] ss:$20 sps:$4 sm:$0xff]   ;;  %v13492_v48 = vld [vmem:[%s14539_s28 + $0x1890] ss:$20 sps:$4 sm:$0xff]  }
 0x27f   : > { %v13497_v50 = vld [vmem:[%s14539_s28 + $0x18b4] ss:$20 sps:$4 sm:$0xff]  }
 0x281   : > { %9021 = vmatpush1.bf16.msra.mxu0 %v13429_v53  ;;  %9677 = vmatpush1.bf16.msra.mxu1 %v13432_v54  ;;  %v13500_v53 = vld [vmem:[%s14539_s28 + $0x18bc] ss:$20 sps:$4 sm:$0xff]  }
 0x282   : > { %9022 = vmatprep.subr.bf16.mxu0 %v13437_v56  ;;  %9678 = vmatprep.subr.bf16.mxu1 %v13440_v57  ;;  %v14342_v54 = vld [vmem:[%s14595_s29 + $0x10] sm:$0xff] }
 0x283   : > { %v1859_v56 = vcombine.high %v14342_v54, %v14342_v54  ;;  %v13495_v57 = vld [vmem:[%s14539_s28 + $0x18b0] ss:$20 sps:$4 sm:$0xff]   ;;  %v13552_v54 = vld [vmem:[%s14539_s28 + $0x1a20] ss:$20 sps:$4 sm:$0xff]  }
 0x285   : > { %9023 = vmatpush1.bf16.msra.mxu0 %v13435_v58  ;;  %9679 = vmatpush1.bf16.msra.mxu1 %v13438_v59  ;;  %v13498_v58 = vld [vmem:[%s14539_s28 + $0x18b8] ss:$20 sps:$4 sm:$0xff]   ;;  %v13503_v59 = vld [vmem:[%s14539_s28 + $0x18dc] ss:$20 sps:$4 sm:$0xff]  }
 0x286   : > { %9024 = vmatprep.subr.bf16.mxu0 %v13443_v61  ;;  %9680 = vmatprep.subr.bf16.mxu1 %v13446_v63  ;;  %v13506_v61 = vld [vmem:[%s14539_s28 + $0x18e4] ss:$20 sps:$4 sm:$0xff]   ;;  %v15332_v63 = vrot.slane %v1859_v56, %v14598_v49 }
 0x287   : > { %v13557_v56 = vld [vmem:[%s14539_s28 + $0x1a44] ss:$20 sps:$4 sm:$0xff]  }
 0x289   : > { %9025 = vmatpush1.bf16.msra.mxu0 %v13441_v0  ;;  %9681 = vmatpush1.bf16.msra.mxu1 %v13444_v1  ;;  %v13501_v0 = vld [vmem:[%s14539_s28 + $0x18d8] ss:$20 sps:$4 sm:$0xff]   ;;  %v13504_v1 = vld [vmem:[%s14539_s28 + $0x18e0] ss:$20 sps:$4 sm:$0xff]  }
 0x28a   : > { %9026 = vmatprep.subr.bf16.mxu0 %v13449_v2  ;;  %9682 = vmatprep.subr.bf16.mxu1 %v13452_v4  ;;  %v13509_v2 = vld [vmem:[%s14539_s28 + $0x1904] ss:$20 sps:$4 sm:$0xff]   ;;  %v13512_v4 = vld [vmem:[%s14539_s28 + $0x190c] ss:$20 sps:$4 sm:$0xff]  }
 0x28d   : > { %9027 = vmatpush1.bf16.msra.mxu0 %v13447_v5  ;;  %9683 = vmatpush1.bf16.msra.mxu1 %v13450_v6  ;;  %v1875_v5 = vcombine.high %v15332_v63, %v15332_v63  ;;  %v15342_v6 = vcombine.high %v15260_v32, %v15260_v32 }
 0x28e   : > { %9028 = vmatprep.subr.bf16.mxu0 %v13455_v7  ;;  %9684 = vmatprep.subr.bf16.mxu1 %v13458_v9  ;;  %v13507_v7 = vld [vmem:[%s14539_s28 + $0x1900] ss:$20 sps:$4 sm:$0xff]   ;;  %v13510_v9 = vld [vmem:[%s14539_s28 + $0x1908] ss:$20 sps:$4 sm:$0xff]  }
 0x291   : > { %9029 = vmatpush1.bf16.msra.mxu0 %v13453_v11  ;;  %9685 = vmatpush1.bf16.msra.mxu1 %v13456_v12  ;;  %v13515_v11 = vld [vmem:[%s14539_s28 + $0x192c] ss:$20 sps:$4 sm:$0xff]   ;;  %v13518_v12 = vld [vmem:[%s14539_s28 + $0x1934] ss:$20 sps:$4 sm:$0xff]  }
 0x292   : > { %9030 = vmatprep.subr.bf16.mxu0 %v13461_v14  ;;  %9686 = vmatprep.subr.bf16.mxu1 %v13464_v15  ;;  %v15349_v14 = vrot.slane %v1875_v5, %v14598_v49  ;;  %v13513_v15 = vld [vmem:[%s14539_s28 + $0x1928] ss:$20 sps:$4 sm:$0xff]  }
 0x293   : > { %v13572_v5 = vld [vmem:[%s14539_s28 + $0x1a9c] ss:$20 sps:$4 sm:$0xff]  }
 0x295   : > { %9031 = vmatpush1.bf16.msra.mxu0 %v13459_v18  ;;  %9687 = vmatpush1.bf16.msra.mxu1 %v13462_v19  ;;  %v13516_v18 = vld [vmem:[%s14539_s28 + $0x1930] ss:$20 sps:$4 sm:$0xff]   ;;  %v13521_v19 = vld [vmem:[%s14539_s28 + $0x1954] ss:$20 sps:$4 sm:$0xff]  }
 0x296   : > { %9032 = vmatprep.subr.bf16.mxu0 %v13467_v20  ;;  %9688 = vmatprep.subr.bf16.mxu1 %v13470_v21  ;;  %v13524_v20 = vld [vmem:[%s14539_s28 + $0x195c] ss:$20 sps:$4 sm:$0xff]  }
 0x297   : > { %v13519_v21 = vld [vmem:[%s14539_s28 + $0x1950] ss:$20 sps:$4 sm:$0xff]  }
 0x299   : > { %9033 = vmatpush1.bf16.msra.mxu0 %v13465_v22  ;;  %9689 = vmatpush1.bf16.msra.mxu1 %v13468_v25  ;;  %v13522_v22 = vld [vmem:[%s14539_s28 + $0x1958] ss:$20 sps:$4 sm:$0xff]   ;;  %v13527_v25 = vld [vmem:[%s14539_s28 + $0x197c] ss:$20 sps:$4 sm:$0xff]  }
 0x29a   : > { %9034 = vmatprep.subr.bf16.mxu0 %v13473_v26  ;;  %9690 = vmatprep.subr.bf16.mxu1 %v13476_v28  ;;  %v13530_v26 = vld [vmem:[%s14539_s28 + $0x1984] ss:$20 sps:$4 sm:$0xff]  }
 0x29b   : > { %v13525_v28 = vld [vmem:[%s14539_s28 + $0x1978] ss:$20 sps:$4 sm:$0xff]  }
 0x29d   : > { %9035 = vmatpush1.bf16.msra.mxu0 %v13471_v29  ;;  %9691 = vmatpush1.bf16.msra.mxu1 %v13474_v30  ;;  %v13528_v29 = vld [vmem:[%s14539_s28 + $0x1980] ss:$20 sps:$4 sm:$0xff]   ;;  %v13533_v30 = vld [vmem:[%s14539_s28 + $0x19a4] ss:$20 sps:$4 sm:$0xff]  }
 0x29e   : > { %9036 = vmatprep.subr.bf16.mxu0 %v13479_v31  ;;  %9692 = vmatprep.subr.bf16.mxu1 %v13482_v35  ;;  %v13536_v31 = vld [vmem:[%s14539_s28 + $0x19ac] ss:$20 sps:$4 sm:$0xff]  }
 0x29f   : > { %v13531_v35 = vld [vmem:[%s14539_s28 + $0x19a0] ss:$20 sps:$4 sm:$0xff]  }
 0x2a1   : > { %9037 = vmatpush1.bf16.msra.mxu0 %v13477_v36  ;;  %9693 = vmatpush1.bf16.msra.mxu1 %v13480_v16  ;;  %v13534_v36 = vld [vmem:[%s14539_s28 + $0x19a8] ss:$20 sps:$4 sm:$0xff]   ;;  %v13539_v16 = vld [vmem:[%s14539_s28 + $0x19cc] ss:$20 sps:$4 sm:$0xff]  }
 0x2a2   : > { %9038 = vmatprep.subr.bf16.mxu0 %v13485_v38  ;;  %9694 = vmatprep.subr.bf16.mxu1 %v13488_v55  ;;  %v13542_v38 = vld [vmem:[%s14539_s28 + $0x19d4] ss:$20 sps:$4 sm:$0xff]  }
 0x2a3   : > { %v13537_v55 = vld [vmem:[%s14539_s28 + $0x19c8] ss:$20 sps:$4 sm:$0xff]  }
 0x2a5   : > { %9039 = vmatpush1.bf16.msra.mxu0 %v13483_v41  ;;  %9695 = vmatpush1.bf16.msra.mxu1 %v13486_v42  ;;  %v13540_v41 = vld [vmem:[%s14539_s28 + $0x19d0] ss:$20 sps:$4 sm:$0xff]   ;;  %v13545_v42 = vld [vmem:[%s14539_s28 + $0x19f4] ss:$20 sps:$4 sm:$0xff]  }
 0x2a6   : > { %9040 = vmatprep.subr.bf16.mxu0 %v13491_v44  ;;  %9696 = vmatprep.subr.bf16.mxu1 %v13494_v46  ;;  %v13548_v44 = vld [vmem:[%s14539_s28 + $0x19fc] ss:$20 sps:$4 sm:$0xff]  }
 0x2a7   : > { %v13543_v46 = vld [vmem:[%s14539_s28 + $0x19f0] ss:$20 sps:$4 sm:$0xff]  }
 0x2a9   : > { %9041 = vmatpush1.bf16.msra.mxu0 %v13489_v10  ;;  %9697 = vmatpush1.bf16.msra.mxu1 %v13492_v48  ;;  %v13546_v10 = vld [vmem:[%s14539_s28 + $0x19f8] ss:$20 sps:$4 sm:$0xff]   ;;  %v13551_v48 = vld [vmem:[%s14539_s28 + $0x1a1c] ss:$20 sps:$4 sm:$0xff]  }
 0x2aa   : > { %9042 = vmatprep.subr.bf16.mxu0 %v13497_v50  ;;  %9698 = vmatprep.subr.bf16.mxu1 %v13500_v53  ;;  %v13554_v50 = vld [vmem:[%s14539_s28 + $0x1a24] ss:$20 sps:$4 sm:$0xff]  }
 0x2ab   : > { %v13549_v53 = vld [vmem:[%s14539_s28 + $0x1a18] ss:$20 sps:$4 sm:$0xff]  }
 0x2ad   : > { %9043 = vmatpush1.bf16.msra.mxu0 %v13495_v57  ;;  %9699 = vmatpush1.bf16.msra.mxu1 %v13498_v58  ;;  %v13560_v57 = vld [vmem:[%s14539_s28 + $0x1a4c] ss:$20 sps:$4 sm:$0xff]  }
 0x2ae   : > { %9044 = vmatprep.subr.bf16.mxu0 %v13503_v59  ;;  %9700 = vmatprep.subr.bf16.mxu1 %v13506_v61  ;;  %v13555_v58 = vld [vmem:[%s14539_s28 + $0x1a40] ss:$20 sps:$4 sm:$0xff]   ;;  %v13558_v59 = vld [vmem:[%s14539_s28 + $0x1a48] ss:$20 sps:$4 sm:$0xff]  }
 0x2af   : > { %v13563_v61 = vld [vmem:[%s14539_s28 + $0x1a6c] ss:$20 sps:$4 sm:$0xff]  }
 0x2b1   : > { %9045 = vmatpush1.bf16.msra.mxu0 %v13501_v0  ;;  %9701 = vmatpush1.bf16.msra.mxu1 %v13504_v1  ;;  %v13566_v0 = vld [vmem:[%s14539_s28 + $0x1a74] ss:$20 sps:$4 sm:$0xff]  }
 0x2b2   : > { %9055 = vmatprep.subr.bf16.mxu0 %v13509_v2  ;;  %9711 = vmatprep.subr.bf16.mxu1 %v13512_v4  ;;  %v13561_v1 = vld [vmem:[%s14539_s28 + $0x1a68] ss:$20 sps:$4 sm:$0xff]   ;;  %v13564_v2 = vld [vmem:[%s14539_s28 + $0x1a70] ss:$20 sps:$4 sm:$0xff]  }
 0x2b3   : > { %v13569_v4 = vld [vmem:[%s14539_s28 + $0x1a94] ss:$20 sps:$4 sm:$0xff]  }
 0x2b4   : > { %9047 = vmatmul.mubr.bf16.vlgmr.msra.gmra.mrb[0].mxu0 %v15342_v6  ;;  %9703 = vmatmul.mubr.bf16.vlgmr.msra.gmra.mrb[0].mxu1 %v15342_v6 }
 0x2b5   : > { %9056 = vmatpush1.bf16.msra.mxu0 %v13507_v7  ;;  %9712 = vmatpush1.bf16.msra.mxu1 %v13510_v9  ;;  %v13567_v7 = vld [vmem:[%s14539_s28 + $0x1a90] ss:$20 sps:$4 sm:$0xff]   ;;  %v13570_v9 = vld [vmem:[%s14539_s28 + $0x1a98] ss:$20 sps:$4 sm:$0xff]  }
 0x2b6   : > { %9057 = vmatprep.subr.bf16.mxu0 %v13515_v11  ;;  %9713 = vmatprep.subr.bf16.mxu1 %v13518_v12  ;;  %v13575_v11 = vld [vmem:[%s14539_s28 + $0x1abc] ss:$20 sps:$4 sm:$0xff]   ;;  %v13578_v12 = vld [vmem:[%s14539_s28 + $0x1ac4] ss:$20 sps:$4 sm:$0xff]  }
 0x2b7   : > { %9087 = vmatprep.mubr.bf16.mxu0 %v15349_v14  ;;  %9743 = vmatprep.mubr.bf16.mxu1 %v15349_v14 }
 0x2b9   : > { %9058 = vmatpush1.bf16.msra.mxu0 %v13513_v15  ;;  %9714 = vmatpush1.bf16.msra.mxu1 %v13516_v18  ;;  %v13573_v15 = vld [vmem:[%s14539_s28 + $0x1ab8] ss:$20 sps:$4 sm:$0xff]   ;;  %v13576_v18 = vld [vmem:[%s14539_s28 + $0x1ac0] ss:$20 sps:$4 sm:$0xff]  }
 0x2ba   : > { %9059 = vmatprep.subr.bf16.mxu0 %v13521_v19  ;;  %9715 = vmatprep.subr.bf16.mxu1 %v13524_v20  ;;  %v13581_v19 = vld [vmem:[%s14539_s28 + $0x1ae4] ss:$20 sps:$4 sm:$0xff]   ;;  %v13584_v20 = vld [vmem:[%s14539_s28 + $0x1aec] ss:$20 sps:$4 sm:$0xff]  }
 0x2bd   : > { %9060 = vmatpush1.bf16.msra.mxu0 %v13519_v21  ;;  %9716 = vmatpush1.bf16.msra.mxu1 %v13522_v22  ;;  %v13579_v21 = vld [vmem:[%s14539_s28 + $0x1ae0] ss:$20 sps:$4 sm:$0xff]   ;;  %v13582_v22 = vld [vmem:[%s14539_s28 + $0x1ae8] ss:$20 sps:$4 sm:$0xff]  }
 0x2be   : > { %9061 = vmatprep.subr.bf16.mxu0 %v13527_v25  ;;  %9717 = vmatprep.subr.bf16.mxu1 %v13530_v26  ;;  %v13587_v25 = vld [vmem:[%s14539_s28 + $0x1b0c] ss:$20 sps:$4 sm:$0xff]   ;;  %v13590_v26 = vld [vmem:[%s14539_s28 + $0x1b14] ss:$20 sps:$4 sm:$0xff]  }
 0x2c1   : > { %9062 = vmatpush1.bf16.msra.mxu0 %v13525_v28  ;;  %9718 = vmatpush1.bf16.msra.mxu1 %v13528_v29  ;;  %v13585_v28 = vld [vmem:[%s14539_s28 + $0x1b08] ss:$20 sps:$4 sm:$0xff]   ;;  %v13588_v29 = vld [vmem:[%s14539_s28 + $0x1b10] ss:$20 sps:$4 sm:$0xff]  }
 0x2c2   : > { %9063 = vmatprep.subr.bf16.mxu0 %v13533_v30  ;;  %9719 = vmatprep.subr.bf16.mxu1 %v13536_v31  ;;  %v13593_v30 = vld [vmem:[%s14539_s28 + $0x1b34] ss:$20 sps:$4 sm:$0xff]   ;;  %v13596_v31 = vld [vmem:[%s14539_s28 + $0x1b3c] ss:$20 sps:$4 sm:$0xff]  }
 0x2c5   : > { %9064 = vmatpush1.bf16.msra.mxu0 %v13531_v35  ;;  %9720 = vmatpush1.bf16.msra.mxu1 %v13534_v36  ;;  %v13591_v35 = vld [vmem:[%s14539_s28 + $0x1b30] ss:$20 sps:$4 sm:$0xff]   ;;  %v13594_v36 = vld [vmem:[%s14539_s28 + $0x1b38] ss:$20 sps:$4 sm:$0xff]  }
 0x2c6   : > { %9065 = vmatprep.subr.bf16.mxu0 %v13539_v16  ;;  %9721 = vmatprep.subr.bf16.mxu1 %v13542_v38  ;;  %v13599_v16 = vld [vmem:[%s14539_s28 + $0x1b5c] ss:$20 sps:$4 sm:$0xff]   ;;  %v13602_v38 = vld [vmem:[%s14539_s28 + $0x1b64] ss:$20 sps:$4 sm:$0xff]  }
 0x2c9   : > { %9066 = vmatpush1.bf16.msra.mxu0 %v13537_v55  ;;  %9722 = vmatpush1.bf16.msra.mxu1 %v13540_v41  ;;  %v13597_v55 = vld [vmem:[%s14539_s28 + $0x1b58] ss:$20 sps:$4 sm:$0xff]   ;;  %v13600_v41 = vld [vmem:[%s14539_s28 + $0x1b60] ss:$20 sps:$4 sm:$0xff]  }
 0x2ca   : > { %9067 = vmatprep.subr.bf16.mxu0 %v13545_v42  ;;  %9723 = vmatprep.subr.bf16.mxu1 %v13548_v44  ;;  %v13606_v42 = vld [vmem:[%s14539_s28 + $0x1b84] ss:$20 sps:$4 sm:$0xff]   ;;  %v13609_v44 = vld [vmem:[%s14539_s28 + $0x1b8c] ss:$20 sps:$4 sm:$0xff]  }
 0x2cd   : > { %9068 = vmatpush1.bf16.msra.mxu0 %v13543_v46  ;;  %9724 = vmatpush1.bf16.msra.mxu1 %v13546_v10  ;;  %v15417_v46 = vrot.slane %v15332_v63, %v14598_v49  ;;  %v13604_v10 = vld [vmem:[%s14539_s28 + $0x1b80] ss:$20 sps:$4 sm:$0xff]   ;;  %v13610_v63 = vld [vmem:[%s14539_s28 + $0x1ba8] ss:$20 sps:$4 sm:$0xff]  }
 0x2ce   : > { %9069 = vmatprep.subr.bf16.mxu0 %v13551_v48  ;;  %9725 = vmatprep.subr.bf16.mxu1 %v13554_v50  ;;  %v13607_v48 = vld [vmem:[%s14539_s28 + $0x1b88] ss:$20 sps:$4 sm:$0xff]   ;;  %v13612_v50 = vld [vmem:[%s14539_s28 + $0x1bac] ss:$20 sps:$4 sm:$0xff]  }
 0x2d1   : > { %9070 = vmatpush1.bf16.msra.mxu0 %v13549_v53  ;;  %9726 = vmatpush1.bf16.msra.mxu1 %v13552_v54  ;;  %v13615_v53 = vld [vmem:[%s14539_s28 + $0x1bb4] ss:$20 sps:$4 sm:$0xff]   ;;  %v15425_v54 = vcombine.high %v15349_v14, %v15349_v14 }
 0x2d2   : > { %9071 = vmatprep.subr.bf16.mxu0 %v13557_v56  ;;  %9727 = vmatprep.subr.bf16.mxu1 %v13560_v57  ;;  %v13613_v56 = vld [vmem:[%s14539_s28 + $0x1bb0] ss:$20 sps:$4 sm:$0xff]   ;;  %v13618_v57 = vld [vmem:[%s14539_s28 + $0x1bd4] ss:$20 sps:$4 sm:$0xff]  }
 0x2d5   : > { %9072 = vmatpush1.bf16.msra.mxu0 %v13555_v58  ;;  %9728 = vmatpush1.bf16.msra.mxu1 %v13558_v59  ;;  %v13621_v58 = vld [vmem:[%s14539_s28 + $0x1bdc] ss:$20 sps:$4 sm:$0xff]  }
 0x2d6   : > { %9073 = vmatprep.subr.bf16.mxu0 %v13563_v61  ;;  %9729 = vmatprep.subr.bf16.mxu1 %v13566_v0  ;;  %v13616_v59 = vld [vmem:[%s14539_s28 + $0x1bd0] ss:$20 sps:$4 sm:$0xff]   ;;  %v13619_v61 = vld [vmem:[%s14539_s28 + $0x1bd8] ss:$20 sps:$4 sm:$0xff]  }
 0x2d7   : > { %v13624_v0 = vld [vmem:[%s14539_s28 + $0x1bfc] ss:$20 sps:$4 sm:$0xff]  }
 0x2d9   : > { %9074 = vmatpush1.bf16.msra.mxu0 %v13561_v1  ;;  %9730 = vmatpush1.bf16.msra.mxu1 %v13564_v2  ;;  %v13627_v1 = vld [vmem:[%s14539_s28 + $0x1c04] ss:$20 sps:$4 sm:$0xff]  }
 0x2da   : > { %9075 = vmatprep.subr.bf16.mxu0 %v13569_v4  ;;  %9731 = vmatprep.subr.bf16.mxu1 %v13572_v5  ;;  %v13622_v2 = vld [vmem:[%s14539_s28 + $0x1bf8] ss:$20 sps:$4 sm:$0xff]   ;;  %v13625_v4 = vld [vmem:[%s14539_s28 + $0x1c00] ss:$20 sps:$4 sm:$0xff]  }
 0x2db   : > { %v13630_v5 = vld [vmem:[%s14539_s28 + $0x1c24] ss:$20 sps:$4 sm:$0xff]  }
 0x2dd   : > { %9076 = vmatpush1.bf16.msra.mxu0 %v13567_v7  ;;  %9732 = vmatpush1.bf16.msra.mxu1 %v13570_v9  ;;  %v13633_v7 = vld [vmem:[%s14539_s28 + $0x1c2c] ss:$20 sps:$4 sm:$0xff]  }
 0x2de   : > { %9077 = vmatprep.subr.bf16.mxu0 %v13575_v11  ;;  %9733 = vmatprep.subr.bf16.mxu1 %v13578_v12  ;;  %v13628_v9 = vld [vmem:[%s14539_s28 + $0x1c20] ss:$20 sps:$4 sm:$0xff]   ;;  %v13631_v11 = vld [vmem:[%s14539_s28 + $0x1c28] ss:$20 sps:$4 sm:$0xff]  }
 0x2df   : > { %v13636_v12 = vld [vmem:[%s14539_s28 + $0x1c4c] ss:$20 sps:$4 sm:$0xff]  }
 0x2e1   : > { %9078 = vmatpush1.bf16.msra.mxu0 %v13573_v15  ;;  %9734 = vmatpush1.bf16.msra.mxu1 %v13576_v18  ;;  %v13639_v15 = vld [vmem:[%s14539_s28 + $0x1c54] ss:$20 sps:$4 sm:$0xff]  }
 0x2e2   : > { %9079 = vmatprep.subr.bf16.mxu0 %v13581_v19  ;;  %9735 = vmatprep.subr.bf16.mxu1 %v13584_v20  ;;  %v13634_v18 = vld [vmem:[%s14539_s28 + $0x1c48] ss:$20 sps:$4 sm:$0xff]   ;;  %v13637_v19 = vld [vmem:[%s14539_s28 + $0x1c50] ss:$20 sps:$4 sm:$0xff]  }
 0x2e3   : > { %v13642_v20 = vld [vmem:[%s14539_s28 + $0x1c74] ss:$20 sps:$4 sm:$0xff]  }
 0x2e5   : > { %9080 = vmatpush1.bf16.msra.mxu0 %v13579_v21  ;;  %9736 = vmatpush1.bf16.msra.mxu1 %v13582_v22  ;;  %v13645_v21 = vld [vmem:[%s14539_s28 + $0x1c7c] ss:$20 sps:$4 sm:$0xff]  }
 0x2e6   : > { %9081 = vmatprep.subr.bf16.mxu0 %v13587_v25  ;;  %9737 = vmatprep.subr.bf16.mxu1 %v13590_v26  ;;  %v13640_v22 = vld [vmem:[%s14539_s28 + $0x1c70] ss:$20 sps:$4 sm:$0xff]   ;;  %v13643_v25 = vld [vmem:[%s14539_s28 + $0x1c78] ss:$20 sps:$4 sm:$0xff]  }
 0x2e7   : > { %v13648_v26 = vld [vmem:[%s14539_s28 + $0x1c9c] ss:$20 sps:$4 sm:$0xff]  }
 0x2e9   : > { %9082 = vmatpush1.bf16.msra.mxu0 %v13585_v28  ;;  %9738 = vmatpush1.bf16.msra.mxu1 %v13588_v29  ;;  %v13651_v28 = vld [vmem:[%s14539_s28 + $0x1ca4] ss:$20 sps:$4 sm:$0xff]  }
 0x2ea   : > { %9083 = vmatprep.subr.bf16.mxu0 %v13593_v30  ;;  %9739 = vmatprep.subr.bf16.mxu1 %v13596_v31  ;;  %v13646_v29 = vld [vmem:[%s14539_s28 + $0x1c98] ss:$20 sps:$4 sm:$0xff]   ;;  %v13649_v30 = vld [vmem:[%s14539_s28 + $0x1ca0] ss:$20 sps:$4 sm:$0xff]  }
 0x2eb   : > { %v13654_v31 = vld [vmem:[%s14539_s28 + $0x1cc4] ss:$20 sps:$4 sm:$0xff]  }
 0x2ed   : > { %9084 = vmatpush1.bf16.msra.mxu0 %v13591_v35  ;;  %9740 = vmatpush1.bf16.msra.mxu1 %v13594_v36  ;;  %v13657_v35 = vld [vmem:[%s14539_s28 + $0x1ccc] ss:$20 sps:$4 sm:$0xff]  }
 0x2ee   : > { %9085 = vmatprep.subr.bf16.mxu0 %v13599_v16  ;;  %9741 = vmatprep.subr.bf16.mxu1 %v13602_v38  ;;  %v13652_v36 = vld [vmem:[%s14539_s28 + $0x1cc0] ss:$20 sps:$4 sm:$0xff]   ;;  %v13655_v16 = vld [vmem:[%s14539_s28 + $0x1cc8] ss:$20 sps:$4 sm:$0xff]  }
 0x2ef   : > { %v13660_v38 = vld [vmem:[%s14539_s28 + $0x1cec] ss:$20 sps:$4 sm:$0xff]  }
 0x2f1   : > { %9086 = vmatpush1.bf16.msra.mxu0 %v13597_v55  ;;  %9742 = vmatpush1.bf16.msra.mxu1 %v13600_v41  ;;  %v13663_v55 = vld [vmem:[%s14539_s28 + $0x1cf4] ss:$20 sps:$4 sm:$0xff]  }
 0x2f2   : > { %9096 = vmatprep.subr.bf16.mxu0 %v13606_v42  ;;  %9752 = vmatprep.subr.bf16.mxu1 %v13609_v44  ;;  %v13658_v41 = vld [vmem:[%s14539_s28 + $0x1ce8] ss:$20 sps:$4 sm:$0xff]   ;;  %v13661_v42 = vld [vmem:[%s14539_s28 + $0x1cf0] ss:$20 sps:$4 sm:$0xff]  }
 0x2f3   : > { %v13666_v44 = vld [vmem:[%s14539_s28 + $0x1d14] ss:$20 sps:$4 sm:$0xff]  }
 0x2f4   : > { %9088 = vmatmul.mubr.bf16.vlgmr.msra.gmra.mrb[0].mxu0 %v15417_v46  ;;  %9744 = vmatmul.mubr.bf16.vlgmr.msra.gmra.mrb[0].mxu1 %v15417_v46 }
 0x2f5   : > { %9097 = vmatpush1.bf16.msra.mxu0 %v13604_v10  ;;  %9753 = vmatpush1.bf16.msra.mxu1 %v13607_v48  ;;  %v13669_v10 = vld [vmem:[%s14539_s28 + $0x1d1c] ss:$20 sps:$4 sm:$0xff]  }
 0x2f6   : > { %9098 = vmatprep.subr.bf16.mxu0 %v13612_v50  ;;  %9754 = vmatprep.subr.bf16.mxu1 %v13615_v53  ;;  %v13664_v48 = vld [vmem:[%s14539_s28 + $0x1d10] ss:$20 sps:$4 sm:$0xff]   ;;  %v13667_v50 = vld [vmem:[%s14539_s28 + $0x1d18] ss:$20 sps:$4 sm:$0xff]  }
 0x2f7   : > { %9128 = vmatprep.mubr.bf16.mxu0 %v15425_v54  ;;  %9784 = vmatprep.mubr.bf16.mxu1 %v15425_v54  ;;  %v13672_v53 = vld [vmem:[%s14539_s28 + $0x1d3c] ss:$20 sps:$4 sm:$0xff]  }
 0x2f9   : > { %9099 = vmatpush1.bf16.msra.mxu0 %v13610_v63  ;;  %9755 = vmatpush1.bf16.msra.mxu1 %v13613_v56  ;;  %v13675_v63 = vld [vmem:[%s14539_s28 + $0x1d44] ss:$20 sps:$4 sm:$0xff]  }
 0x2fa   : > { %9100 = vmatprep.subr.bf16.mxu0 %v13618_v57  ;;  %9756 = vmatprep.subr.bf16.mxu1 %v13621_v58  ;;  %v13670_v56 = vld [vmem:[%s14539_s28 + $0x1d38] ss:$20 sps:$4 sm:$0xff]   ;;  %v13673_v57 = vld [vmem:[%s14539_s28 + $0x1d40] ss:$20 sps:$4 sm:$0xff]  }
 0x2fb   : > { %v13678_v58 = vld [vmem:[%s14539_s28 + $0x1d64] ss:$20 sps:$4 sm:$0xff]  }
 0x2fd   : > { %9101 = vmatpush1.bf16.msra.mxu0 %v13616_v59  ;;  %9757 = vmatpush1.bf16.msra.mxu1 %v13619_v61  ;;  %v13681_v59 = vld [vmem:[%s14539_s28 + $0x1d6c] ss:$20 sps:$4 sm:$0xff]  }
 0x2fe   : > { %9102 = vmatprep.subr.bf16.mxu0 %v13624_v0  ;;  %9758 = vmatprep.subr.bf16.mxu1 %v13627_v1  ;;  %v13676_v61 = vld [vmem:[%s14539_s28 + $0x1d60] ss:$20 sps:$4 sm:$0xff]   ;;  %v13679_v0 = vld [vmem:[%s14539_s28 + $0x1d68] ss:$20 sps:$4 sm:$0xff]  }
 0x2ff   : > { %v13684_v1 = vld [vmem:[%s14539_s28 + $0x1d8c] ss:$20 sps:$4 sm:$0xff]  }
 0x301   : > { %9103 = vmatpush1.bf16.msra.mxu0 %v13622_v2  ;;  %9759 = vmatpush1.bf16.msra.mxu1 %v13625_v4  ;;  %v13687_v2 = vld [vmem:[%s14539_s28 + $0x1d94] ss:$20 sps:$4 sm:$0xff]  }
 0x302   : > { %9104 = vmatprep.subr.bf16.mxu0 %v13630_v5  ;;  %9760 = vmatprep.subr.bf16.mxu1 %v13633_v7  ;;  %v13682_v4 = vld [vmem:[%s14539_s28 + $0x1d88] ss:$20 sps:$4 sm:$0xff]   ;;  %v13685_v5 = vld [vmem:[%s14539_s28 + $0x1d90] ss:$20 sps:$4 sm:$0xff]  }
 0x303   : > { %v13690_v7 = vld [vmem:[%s14539_s28 + $0x1db4] ss:$20 sps:$4 sm:$0xff]  }
 0x305   : > { %9105 = vmatpush1.bf16.msra.mxu0 %v13628_v9  ;;  %9761 = vmatpush1.bf16.msra.mxu1 %v13631_v11  ;;  %v13693_v9 = vld [vmem:[%s14539_s28 + $0x1dbc] ss:$20 sps:$4 sm:$0xff]  }
 0x306   : > { %9106 = vmatprep.subr.bf16.mxu0 %v13636_v12  ;;  %9762 = vmatprep.subr.bf16.mxu1 %v13639_v15  ;;  %v15484_v11 = vld [vmem:[%s14595_s29 + $0x18] sm:$0xff]  ;;  %v13688_v12 = vld [vmem:[%s14539_s28 + $0x1db0] ss:$20 sps:$4 sm:$0xff]  }
 0x307   : > { %v13691_v15 = vld [vmem:[%s14539_s28 + $0x1db8] ss:$20 sps:$4 sm:$0xff]  }
 0x309   : > { %9107 = vmatpush1.bf16.msra.mxu0 %v13634_v18  ;;  %9763 = vmatpush1.bf16.msra.mxu1 %v13637_v19  ;;  %v13696_v18 = vld [vmem:[%s14539_s28 + $0x1ddc] ss:$20 sps:$4 sm:$0xff]   ;;  %v13699_v19 = vld [vmem:[%s14539_s28 + $0x1de4] ss:$20 sps:$4 sm:$0xff]  }
 0x30a   : > { %9108 = vmatprep.subr.bf16.mxu0 %v13642_v20  ;;  %9764 = vmatprep.subr.bf16.mxu1 %v13645_v21  ;;  %v15492_v20 = vrot.slane %v15484_v11, %v14598_v49  ;;  %v13694_v21 = vld [vmem:[%s14539_s28 + $0x1dd8] ss:$20 sps:$4 sm:$0xff]  }
 0x30d   : > { %9109 = vmatpush1.bf16.msra.mxu0 %v13640_v22  ;;  %9765 = vmatpush1.bf16.msra.mxu1 %v13643_v25  ;;  %v13697_v22 = vld [vmem:[%s14539_s28 + $0x1de0] ss:$20 sps:$4 sm:$0xff]   ;;  %v13702_v25 = vld [vmem:[%s14539_s28 + $0x1e04] ss:$20 sps:$4 sm:$0xff]  }
 0x30e   : > { %9110 = vmatprep.subr.bf16.mxu0 %v13648_v26  ;;  %9766 = vmatprep.subr.bf16.mxu1 %v13651_v28  ;;  %v13705_v26 = vld [vmem:[%s14539_s28 + $0x1e0c] ss:$20 sps:$4 sm:$0xff]   ;;  %v1923_v28 = vcombine.high %v15492_v20, %v15492_v20 }
 0x311   : > { %9111 = vmatpush1.bf16.msra.mxu0 %v13646_v29  ;;  %9767 = vmatpush1.bf16.msra.mxu1 %v13649_v30  ;;  %v15502_v29 = vcombine.high %v15417_v46, %v15417_v46  ;;  %v13700_v30 = vld [vmem:[%s14539_s28 + $0x1e00] ss:$20 sps:$4 sm:$0xff]  }
 0x312   : > { %9112 = vmatprep.subr.bf16.mxu0 %v13654_v31  ;;  %9768 = vmatprep.subr.bf16.mxu1 %v13657_v35  ;;  %v13703_v31 = vld [vmem:[%s14539_s28 + $0x1e08] ss:$20 sps:$4 sm:$0xff]   ;;  %v13708_v35 = vld [vmem:[%s14539_s28 + $0x1e2c] ss:$20 sps:$4 sm:$0xff]  }
 0x315   : > { %9113 = vmatpush1.bf16.msra.mxu0 %v13652_v36  ;;  %9769 = vmatpush1.bf16.msra.mxu1 %v13655_v16  ;;  %v13711_v36 = vld [vmem:[%s14539_s28 + $0x1e34] ss:$20 sps:$4 sm:$0xff]   ;;  %v15509_v16 = vrot.slane %v1923_v28, %v14598_v49  ;;  %v13756_v28 = vld [vmem:[%s14539_s28 + $0x1f6c] ss:$20 sps:$4 sm:$0xff]  }
 0x316   : > { %9114 = vmatprep.subr.bf16.mxu0 %v13660_v38  ;;  %9770 = vmatprep.subr.bf16.mxu1 %v13663_v55  ;;  %v13706_v38 = vld [vmem:[%s14539_s28 + $0x1e28] ss:$20 sps:$4 sm:$0xff]   ;;  %v13709_v55 = vld [vmem:[%s14539_s28 + $0x1e30] ss:$20 sps:$4 sm:$0xff]  }
 0x319   : > { %9115 = vmatpush1.bf16.msra.mxu0 %v13658_v41  ;;  %9771 = vmatpush1.bf16.msra.mxu1 %v13661_v42  ;;  %v13714_v41 = vld [vmem:[%s14539_s28 + $0x1e54] ss:$20 sps:$4 sm:$0xff]   ;;  %v13717_v42 = vld [vmem:[%s14539_s28 + $0x1e5c] ss:$20 sps:$4 sm:$0xff]  }
 0x31a   : > { %9116 = vmatprep.subr.bf16.mxu0 %v13666_v44  ;;  %9772 = vmatprep.subr.bf16.mxu1 %v13669_v10  ;;  %v13712_v44 = vld [vmem:[%s14539_s28 + $0x1e50] ss:$20 sps:$4 sm:$0xff]   ;;  %v13715_v10 = vld [vmem:[%s14539_s28 + $0x1e58] ss:$20 sps:$4 sm:$0xff]  }
 0x31d   : > { %9117 = vmatpush1.bf16.msra.mxu0 %v13664_v48  ;;  %9773 = vmatpush1.bf16.msra.mxu1 %v13667_v50  ;;  %v13720_v48 = vld [vmem:[%s14539_s28 + $0x1e7c] ss:$20 sps:$4 sm:$0xff]   ;;  %v13723_v50 = vld [vmem:[%s14539_s28 + $0x1e84] ss:$20 sps:$4 sm:$0xff]  }
 0x31e   : > { %9118 = vmatprep.subr.bf16.mxu0 %v13672_v53  ;;  %9774 = vmatprep.subr.bf16.mxu1 %v13675_v63  ;;  %v13718_v53 = vld [vmem:[%s14539_s28 + $0x1e78] ss:$20 sps:$4 sm:$0xff]   ;;  %v13721_v63 = vld [vmem:[%s14539_s28 + $0x1e80] ss:$20 sps:$4 sm:$0xff]  }
 0x321   : > { %9119 = vmatpush1.bf16.msra.mxu0 %v13670_v56  ;;  %9775 = vmatpush1.bf16.msra.mxu1 %v13673_v57  ;;  %v13726_v56 = vld [vmem:[%s14539_s28 + $0x1ea4] ss:$20 sps:$4 sm:$0xff]   ;;  %v13729_v57 = vld [vmem:[%s14539_s28 + $0x1eac] ss:$20 sps:$4 sm:$0xff]  }
 0x322   : > { %9120 = vmatprep.subr.bf16.mxu0 %v13678_v58  ;;  %9776 = vmatprep.subr.bf16.mxu1 %v13681_v59  ;;  %v13724_v58 = vld [vmem:[%s14539_s28 + $0x1ea0] ss:$20 sps:$4 sm:$0xff]   ;;  %v13727_v59 = vld [vmem:[%s14539_s28 + $0x1ea8] ss:$20 sps:$4 sm:$0xff]  }
 0x325   : > { %9121 = vmatpush1.bf16.msra.mxu0 %v13676_v61  ;;  %9777 = vmatpush1.bf16.msra.mxu1 %v13679_v0  ;;  %v13732_v61 = vld [vmem:[%s14539_s28 + $0x1ecc] ss:$20 sps:$4 sm:$0xff]   ;;  %v13735_v0 = vld [vmem:[%s14539_s28 + $0x1ed4] ss:$20 sps:$4 sm:$0xff]  }
 0x326   : > { %9122 = vmatprep.subr.bf16.mxu0 %v13684_v1  ;;  %9778 = vmatprep.subr.bf16.mxu1 %v13687_v2  ;;  %v13730_v1 = vld [vmem:[%s14539_s28 + $0x1ec8] ss:$20 sps:$4 sm:$0xff]   ;;  %v13733_v2 = vld [vmem:[%s14539_s28 + $0x1ed0] ss:$20 sps:$4 sm:$0xff]  }
 0x329   : > { %9123 = vmatpush1.bf16.msra.mxu0 %v13682_v4  ;;  %9779 = vmatpush1.bf16.msra.mxu1 %v13685_v5  ;;  %v13738_v4 = vld [vmem:[%s14539_s28 + $0x1ef4] ss:$20 sps:$4 sm:$0xff]   ;;  %v13741_v5 = vld [vmem:[%s14539_s28 + $0x1efc] ss:$20 sps:$4 sm:$0xff]  }
 0x32a   : > { %9124 = vmatprep.subr.bf16.mxu0 %v13690_v7  ;;  %9780 = vmatprep.subr.bf16.mxu1 %v13693_v9  ;;  %v13736_v7 = vld [vmem:[%s14539_s28 + $0x1ef0] ss:$20 sps:$4 sm:$0xff]   ;;  %v13739_v9 = vld [vmem:[%s14539_s28 + $0x1ef8] ss:$20 sps:$4 sm:$0xff]  }
 0x32d   : > { %9125 = vmatpush1.bf16.msra.mxu0 %v13688_v12  ;;  %9781 = vmatpush1.bf16.msra.mxu1 %v13691_v15  ;;  %v13744_v12 = vld [vmem:[%s14539_s28 + $0x1f1c] ss:$20 sps:$4 sm:$0xff]   ;;  %v13747_v15 = vld [vmem:[%s14539_s28 + $0x1f24] ss:$20 sps:$4 sm:$0xff]  }
 0x32e   : > { %9126 = vmatprep.subr.bf16.mxu0 %v13696_v18  ;;  %9782 = vmatprep.subr.bf16.mxu1 %v13699_v19  ;;  %v13742_v18 = vld [vmem:[%s14539_s28 + $0x1f18] ss:$20 sps:$4 sm:$0xff]   ;;  %v13745_v19 = vld [vmem:[%s14539_s28 + $0x1f20] ss:$20 sps:$4 sm:$0xff]  }
 0x331   : > { %9127 = vmatpush1.bf16.msra.mxu0 %v13694_v21  ;;  %9783 = vmatpush1.bf16.msra.mxu1 %v13697_v22  ;;  %v13750_v21 = vld [vmem:[%s14539_s28 + $0x1f44] ss:$20 sps:$4 sm:$0xff]   ;;  %v13753_v22 = vld [vmem:[%s14539_s28 + $0x1f4c] ss:$20 sps:$4 sm:$0xff]  }
 0x332   : > { %9137 = vmatprep.subr.bf16.mxu0 %v13702_v25  ;;  %9793 = vmatprep.subr.bf16.mxu1 %v13705_v26  ;;  %v13748_v25 = vld [vmem:[%s14539_s28 + $0x1f40] ss:$20 sps:$4 sm:$0xff]   ;;  %v13751_v26 = vld [vmem:[%s14539_s28 + $0x1f48] ss:$20 sps:$4 sm:$0xff]  }
 0x334   : > { %9129 = vmatmul.mubr.bf16.vlgmr.msra.gmra.mrb[0].mxu0 %v15502_v29  ;;  %9785 = vmatmul.mubr.bf16.vlgmr.msra.gmra.mrb[0].mxu1 %v15502_v29 }
 0x335   : > { %9138 = vmatpush1.bf16.msra.mxu0 %v13700_v30  ;;  %9794 = vmatpush1.bf16.msra.mxu1 %v13703_v31  ;;  %v13759_v30 = vld [vmem:[%s14539_s28 + $0x1f74] ss:$20 sps:$4 sm:$0xff]  }
 0x336   : > { %9139 = vmatprep.subr.bf16.mxu0 %v13708_v35  ;;  %9795 = vmatprep.subr.bf16.mxu1 %v13711_v36  ;;  %v13754_v31 = vld [vmem:[%s14539_s28 + $0x1f68] ss:$20 sps:$4 sm:$0xff]   ;;  %v13757_v35 = vld [vmem:[%s14539_s28 + $0x1f70] ss:$20 sps:$4 sm:$0xff]  }
 0x337   : > { %9169 = vmatprep.mubr.bf16.mxu0 %v15509_v16  ;;  %9825 = vmatprep.mubr.bf16.mxu1 %v15509_v16  ;;  %v13762_v36 = vld [vmem:[%s14539_s28 + $0x1f94] ss:$20 sps:$4 sm:$0xff]  }
 0x339   : > { %9140 = vmatpush1.bf16.msra.mxu0 %v13706_v38  ;;  %9796 = vmatpush1.bf16.msra.mxu1 %v13709_v55  ;;  %v13765_v38 = vld [vmem:[%s14539_s28 + $0x1f9c] ss:$20 sps:$4 sm:$0xff]  }
 0x33a   : > { %9141 = vmatprep.subr.bf16.mxu0 %v13714_v41  ;;  %9797 = vmatprep.subr.bf16.mxu1 %v13717_v42  ;;  %v13760_v55 = vld [vmem:[%s14539_s28 + $0x1f90] ss:$20 sps:$4 sm:$0xff]   ;;  %v13763_v41 = vld [vmem:[%s14539_s28 + $0x1f98] ss:$20 sps:$4 sm:$0xff]  }
 0x33b   : > { %v13768_v42 = vld [vmem:[%s14539_s28 + $0x1fbc] ss:$20 sps:$4 sm:$0xff]  }
 0x33d   : > { %9142 = vmatpush1.bf16.msra.mxu0 %v13712_v44  ;;  %9798 = vmatpush1.bf16.msra.mxu1 %v13715_v10  ;;  %v13771_v44 = vld [vmem:[%s14539_s28 + $0x1fc4] ss:$20 sps:$4 sm:$0xff]  }
 0x33e   : > { %9143 = vmatprep.subr.bf16.mxu0 %v13720_v48  ;;  %9799 = vmatprep.subr.bf16.mxu1 %v13723_v50  ;;  %v13766_v10 = vld [vmem:[%s14539_s28 + $0x1fb8] ss:$20 sps:$4 sm:$0xff]   ;;  %v13769_v48 = vld [vmem:[%s14539_s28 + $0x1fc0] ss:$20 sps:$4 sm:$0xff]  }
 0x33f   : > { %v13774_v50 = vld [vmem:[%s14539_s28 + $0x1fe4] ss:$20 sps:$4 sm:$0xff]  }
 0x341   : > { %9144 = vmatpush1.bf16.msra.mxu0 %v13718_v53  ;;  %9800 = vmatpush1.bf16.msra.mxu1 %v13721_v63  ;;  %v13777_v53 = vld [vmem:[%s14539_s28 + $0x1fec] ss:$20 sps:$4 sm:$0xff]  }
 0x342   : > { %9145 = vmatprep.subr.bf16.mxu0 %v13726_v56  ;;  %9801 = vmatprep.subr.bf16.mxu1 %v13729_v57  ;;  %v13772_v63 = vld [vmem:[%s14539_s28 + $0x1fe0] ss:$20 sps:$4 sm:$0xff]   ;;  %v13775_v56 = vld [vmem:[%s14539_s28 + $0x1fe8] ss:$20 sps:$4 sm:$0xff]  }
 0x343   : > { %v13780_v57 = vld [vmem:[%s14539_s28 + $0x200c] ss:$20 sps:$4 sm:$0xff]  }
 0x345   : > { %9146 = vmatpush1.bf16.msra.mxu0 %v13724_v58  ;;  %9802 = vmatpush1.bf16.msra.mxu1 %v13727_v59  ;;  %v13783_v58 = vld [vmem:[%s14539_s28 + $0x2014] ss:$20 sps:$4 sm:$0xff]  }
 0x346   : > { %9147 = vmatprep.subr.bf16.mxu0 %v13732_v61  ;;  %9803 = vmatprep.subr.bf16.mxu1 %v13735_v0  ;;  %v13778_v59 = vld [vmem:[%s14539_s28 + $0x2008] ss:$20 sps:$4 sm:$0xff]   ;;  %v13781_v61 = vld [vmem:[%s14539_s28 + $0x2010] ss:$20 sps:$4 sm:$0xff]  }
 0x347   : > { %v13786_v0 = vld [vmem:[%s14539_s28 + $0x2034] ss:$20 sps:$4 sm:$0xff]  }
 0x349   : > { %9148 = vmatpush1.bf16.msra.mxu0 %v13730_v1  ;;  %9804 = vmatpush1.bf16.msra.mxu1 %v13733_v2  ;;  %v13789_v1 = vld [vmem:[%s14539_s28 + $0x203c] ss:$20 sps:$4 sm:$0xff]  }
 0x34a   : > { %9149 = vmatprep.subr.bf16.mxu0 %v13738_v4  ;;  %9805 = vmatprep.subr.bf16.mxu1 %v13741_v5  ;;  %v13784_v2 = vld [vmem:[%s14539_s28 + $0x2030] ss:$20 sps:$4 sm:$0xff]   ;;  %v13787_v4 = vld [vmem:[%s14539_s28 + $0x2038] ss:$20 sps:$4 sm:$0xff]  }
 0x34b   : > { %v13792_v5 = vld [vmem:[%s14539_s28 + $0x205c] ss:$20 sps:$4 sm:$0xff]  }
 0x34d   : > { %9150 = vmatpush1.bf16.msra.mxu0 %v13736_v7  ;;  %9806 = vmatpush1.bf16.msra.mxu1 %v13739_v9  ;;  %v13795_v7 = vld [vmem:[%s14539_s28 + $0x2064] ss:$20 sps:$4 sm:$0xff]  }
 0x34e   : > { %9151 = vmatprep.subr.bf16.mxu0 %v13744_v12  ;;  %9807 = vmatprep.subr.bf16.mxu1 %v13747_v15  ;;  %v13790_v9 = vld [vmem:[%s14539_s28 + $0x2058] ss:$20 sps:$4 sm:$0xff]   ;;  %v13793_v12 = vld [vmem:[%s14539_s28 + $0x2060] ss:$20 sps:$4 sm:$0xff]  }
 0x34f   : > { %v13798_v15 = vld [vmem:[%s14539_s28 + $0x2084] ss:$20 sps:$4 sm:$0xff]  }
 0x351   : > { %9152 = vmatpush1.bf16.msra.mxu0 %v13742_v18  ;;  %9808 = vmatpush1.bf16.msra.mxu1 %v13745_v19  ;;  %v13801_v18 = vld [vmem:[%s14539_s28 + $0x208c] ss:$20 sps:$4 sm:$0xff]   ;;  %v15577_v19 = vrot.slane %v15492_v20, %v14598_v49  ;;  %v13802_v20 = vld [vmem:[%s14539_s28 + $0x20a8] ss:$20 sps:$4 sm:$0xff]  }
 0x352   : > { %9153 = vmatprep.subr.bf16.mxu0 %v13750_v21  ;;  %9809 = vmatprep.subr.bf16.mxu1 %v13753_v22  ;;  %v13796_v21 = vld [vmem:[%s14539_s28 + $0x2080] ss:$20 sps:$4 sm:$0xff]   ;;  %v13799_v22 = vld [vmem:[%s14539_s28 + $0x2088] ss:$20 sps:$4 sm:$0xff]  }
 0x355   : > { %9154 = vmatpush1.bf16.msra.mxu0 %v13748_v25  ;;  %9810 = vmatpush1.bf16.msra.mxu1 %v13751_v26  ;;  %v13804_v25 = vld [vmem:[%s14539_s28 + $0x20ac] ss:$20 sps:$4 sm:$0xff]   ;;  %v13807_v26 = vld [vmem:[%s14539_s28 + $0x20b4] ss:$20 sps:$4 sm:$0xff]  }
 0x356   : > { %9155 = vmatprep.subr.bf16.mxu0 %v13756_v28  ;;  %9811 = vmatprep.subr.bf16.mxu1 %v13759_v30  ;;  %v15585_v28 = vcombine.high %v15509_v16, %v15509_v16  ;;  %v13805_v30 = vld [vmem:[%s14539_s28 + $0x20b0] ss:$20 sps:$4 sm:$0xff]  }
 0x359   : > { %9156 = vmatpush1.bf16.msra.mxu0 %v13754_v31  ;;  %9812 = vmatpush1.bf16.msra.mxu1 %v13757_v35  ;;  %v13810_v31 = vld [vmem:[%s14539_s28 + $0x20d4] ss:$20 sps:$4 sm:$0xff]   ;;  %v13813_v35 = vld [vmem:[%s14539_s28 + $0x20dc] ss:$20 sps:$4 sm:$0xff]  }
 0x35a   : > { %9157 = vmatprep.subr.bf16.mxu0 %v13762_v36  ;;  %9813 = vmatprep.subr.bf16.mxu1 %v13765_v38  ;;  %v13808_v36 = vld [vmem:[%s14539_s28 + $0x20d0] ss:$20 sps:$4 sm:$0xff]   ;;  %v13811_v38 = vld [vmem:[%s14539_s28 + $0x20d8] ss:$20 sps:$4 sm:$0xff]  }
 0x35d   : > { %9158 = vmatpush1.bf16.msra.mxu0 %v13760_v55  ;;  %9814 = vmatpush1.bf16.msra.mxu1 %v13763_v41  ;;  %v13816_v55 = vld [vmem:[%s14539_s28 + $0x20fc] ss:$20 sps:$4 sm:$0xff]   ;;  %v13819_v41 = vld [vmem:[%s14539_s28 + $0x2104] ss:$20 sps:$4 sm:$0xff]  }
 0x35e   : > { %9159 = vmatprep.subr.bf16.mxu0 %v13768_v42  ;;  %9815 = vmatprep.subr.bf16.mxu1 %v13771_v44  ;;  %v13814_v42 = vld [vmem:[%s14539_s28 + $0x20f8] ss:$20 sps:$4 sm:$0xff]   ;;  %v13817_v44 = vld [vmem:[%s14539_s28 + $0x2100] ss:$20 sps:$4 sm:$0xff]  }
 0x361   : > { %9160 = vmatpush1.bf16.msra.mxu0 %v13766_v10  ;;  %9816 = vmatpush1.bf16.msra.mxu1 %v13769_v48  ;;  %v13822_v10 = vld [vmem:[%s14539_s28 + $0x2124] ss:$20 sps:$4 sm:$0xff]   ;;  %v13825_v48 = vld [vmem:[%s14539_s28 + $0x212c] ss:$20 sps:$4 sm:$0xff]  }
 0x362   : > { %9161 = vmatprep.subr.bf16.mxu0 %v13774_v50  ;;  %9817 = vmatprep.subr.bf16.mxu1 %v13777_v53  ;;  %v13820_v50 = vld [vmem:[%s14539_s28 + $0x2120] ss:$20 sps:$4 sm:$0xff]   ;;  %v13823_v53 = vld [vmem:[%s14539_s28 + $0x2128] ss:$20 sps:$4 sm:$0xff]  }
 0x365   : > { %9162 = vmatpush1.bf16.msra.mxu0 %v13772_v63  ;;  %9818 = vmatpush1.bf16.msra.mxu1 %v13775_v56  ;;  %v13828_v63 = vld [vmem:[%s14539_s28 + $0x214c] ss:$20 sps:$4 sm:$0xff]   ;;  %v13831_v56 = vld [vmem:[%s14539_s28 + $0x2154] ss:$20 sps:$4 sm:$0xff]  }
 0x366   : > { %9163 = vmatprep.subr.bf16.mxu0 %v13780_v57  ;;  %9819 = vmatprep.subr.bf16.mxu1 %v13783_v58  ;;  %v13826_v57 = vld [vmem:[%s14539_s28 + $0x2148] ss:$20 sps:$4 sm:$0xff]   ;;  %v13829_v58 = vld [vmem:[%s14539_s28 + $0x2150] ss:$20 sps:$4 sm:$0xff]  }
 0x369   : > { %9164 = vmatpush1.bf16.msra.mxu0 %v13778_v59  ;;  %9820 = vmatpush1.bf16.msra.mxu1 %v13781_v61  ;;  %v13834_v59 = vld [vmem:[%s14539_s28 + $0x2174] ss:$20 sps:$4 sm:$0xff]   ;;  %v13837_v61 = vld [vmem:[%s14539_s28 + $0x217c] ss:$20 sps:$4 sm:$0xff]  }
 0x36a   : > { %9165 = vmatprep.subr.bf16.mxu0 %v13786_v0  ;;  %9821 = vmatprep.subr.bf16.mxu1 %v13789_v1  ;;  %v13832_v0 = vld [vmem:[%s14539_s28 + $0x2170] ss:$20 sps:$4 sm:$0xff]   ;;  %v13835_v1 = vld [vmem:[%s14539_s28 + $0x2178] ss:$20 sps:$4 sm:$0xff]  }
 0x36d   : > { %9166 = vmatpush1.bf16.msra.mxu0 %v13784_v2  ;;  %9822 = vmatpush1.bf16.msra.mxu1 %v13787_v4  ;;  %v13840_v2 = vld [vmem:[%s14539_s28 + $0x219c] ss:$20 sps:$4 sm:$0xff]   ;;  %v13843_v4 = vld [vmem:[%s14539_s28 + $0x21a4] ss:$20 sps:$4 sm:$0xff]  }
 0x36e   : > { %9167 = vmatprep.subr.bf16.mxu0 %v13792_v5  ;;  %9823 = vmatprep.subr.bf16.mxu1 %v13795_v7  ;;  %v13838_v5 = vld [vmem:[%s14539_s28 + $0x2198] ss:$20 sps:$4 sm:$0xff]   ;;  %v13841_v7 = vld [vmem:[%s14539_s28 + $0x21a0] ss:$20 sps:$4 sm:$0xff]  }
 0x371   : > { %9168 = vmatpush1.bf16.msra.mxu0 %v13790_v9  ;;  %9824 = vmatpush1.bf16.msra.mxu1 %v13793_v12  ;;  %v13846_v9 = vld [vmem:[%s14539_s28 + $0x21c4] ss:$20 sps:$4 sm:$0xff]   ;;  %v13849_v12 = vld [vmem:[%s14539_s28 + $0x21cc] ss:$20 sps:$4 sm:$0xff]  }
 0x372   : > { %9178 = vmatprep.subr.bf16.mxu0 %v13798_v15  ;;  %9834 = vmatprep.subr.bf16.mxu1 %v13801_v18  ;;  %v13844_v15 = vld [vmem:[%s14539_s28 + $0x21c0] ss:$20 sps:$4 sm:$0xff]   ;;  %v13847_v18 = vld [vmem:[%s14539_s28 + $0x21c8] ss:$20 sps:$4 sm:$0xff]  }
 0x374   : > { %9170 = vmatmul.mubr.bf16.vlgmr.msra.gmra.mrb[0].mxu0 %v15577_v19  ;;  %9826 = vmatmul.mubr.bf16.vlgmr.msra.gmra.mrb[0].mxu1 %v15577_v19 }
 0x375   : > { %9179 = vmatpush1.bf16.msra.mxu0 %v13796_v21  ;;  %9835 = vmatpush1.bf16.msra.mxu1 %v13799_v22  ;;  %v13852_v21 = vld [vmem:[%s14539_s28 + $0x21ec] ss:$20 sps:$4 sm:$0xff]   ;;  %v13855_v22 = vld [vmem:[%s14539_s28 + $0x21f4] ss:$20 sps:$4 sm:$0xff]  }
 0x376   : > { %9180 = vmatprep.subr.bf16.mxu0 %v13804_v25  ;;  %9836 = vmatprep.subr.bf16.mxu1 %v13807_v26  ;;  %v13850_v25 = vld [vmem:[%s14539_s28 + $0x21e8] ss:$20 sps:$4 sm:$0xff]   ;;  %v13853_v26 = vld [vmem:[%s14539_s28 + $0x21f0] ss:$20 sps:$4 sm:$0xff]  }
 0x377   : > { %9210 = vmatprep.mubr.bf16.mxu0 %v15585_v28  ;;  %9866 = vmatprep.mubr.bf16.mxu1 %v15585_v28 }
 0x379   : > { %9181 = vmatpush1.bf16.msra.mxu0 %v13802_v20  ;;  %9837 = vmatpush1.bf16.msra.mxu1 %v13805_v30  ;;  %v13858_v20 = vld [vmem:[%s14539_s28 + $0x2214] ss:$20 sps:$4 sm:$0xff]   ;;  %v13861_v30 = vld [vmem:[%s14539_s28 + $0x221c] ss:$20 sps:$4 sm:$0xff]  }
 0x37a   : > { %9182 = vmatprep.subr.bf16.mxu0 %v13810_v31  ;;  %9838 = vmatprep.subr.bf16.mxu1 %v13813_v35  ;;  %v13856_v31 = vld [vmem:[%s14539_s28 + $0x2210] ss:$20 sps:$4 sm:$0xff]   ;;  %v13859_v35 = vld [vmem:[%s14539_s28 + $0x2218] ss:$20 sps:$4 sm:$0xff]  }
 0x37d   : > { %9183 = vmatpush1.bf16.msra.mxu0 %v13808_v36  ;;  %9839 = vmatpush1.bf16.msra.mxu1 %v13811_v38  ;;  %v13864_v36 = vld [vmem:[%s14539_s28 + $0x223c] ss:$20 sps:$4 sm:$0xff]   ;;  %v13867_v38 = vld [vmem:[%s14539_s28 + $0x2244] ss:$20 sps:$4 sm:$0xff]  }
 0x37e   : > { %9184 = vmatprep.subr.bf16.mxu0 %v13816_v55  ;;  %9840 = vmatprep.subr.bf16.mxu1 %v13819_v41  ;;  %v13862_v55 = vld [vmem:[%s14539_s28 + $0x2238] ss:$20 sps:$4 sm:$0xff]   ;;  %v13865_v41 = vld [vmem:[%s14539_s28 + $0x2240] ss:$20 sps:$4 sm:$0xff]  }
 0x381   : > { %9185 = vmatpush1.bf16.msra.mxu0 %v13814_v42  ;;  %9841 = vmatpush1.bf16.msra.mxu1 %v13817_v44  ;;  %v13870_v42 = vld [vmem:[%s14539_s28 + $0x2264] ss:$20 sps:$4 sm:$0xff]   ;;  %v13873_v44 = vld [vmem:[%s14539_s28 + $0x226c] ss:$20 sps:$4 sm:$0xff]  }
 0x382   : > { %9186 = vmatprep.subr.bf16.mxu0 %v13822_v10  ;;  %9842 = vmatprep.subr.bf16.mxu1 %v13825_v48  ;;  %v13868_v10 = vld [vmem:[%s14539_s28 + $0x2260] ss:$20 sps:$4 sm:$0xff]   ;;  %v13871_v48 = vld [vmem:[%s14539_s28 + $0x2268] ss:$20 sps:$4 sm:$0xff]  }
 0x385   : > { %9187 = vmatpush1.bf16.msra.mxu0 %v13820_v50  ;;  %9843 = vmatpush1.bf16.msra.mxu1 %v13823_v53  ;;  %v13876_v50 = vld [vmem:[%s14539_s28 + $0x228c] ss:$20 sps:$4 sm:$0xff]   ;;  %v13879_v53 = vld [vmem:[%s14539_s28 + $0x2294] ss:$20 sps:$4 sm:$0xff]  }
 0x386   : > { %9188 = vmatprep.subr.bf16.mxu0 %v13828_v63  ;;  %9844 = vmatprep.subr.bf16.mxu1 %v13831_v56  ;;  %v13874_v63 = vld [vmem:[%s14539_s28 + $0x2288] ss:$20 sps:$4 sm:$0xff]   ;;  %v13877_v56 = vld [vmem:[%s14539_s28 + $0x2290] ss:$20 sps:$4 sm:$0xff]  }
 0x389   : > { %9189 = vmatpush1.bf16.msra.mxu0 %v13826_v57  ;;  %9845 = vmatpush1.bf16.msra.mxu1 %v13829_v58  ;;  %v13882_v57 = vld [vmem:[%s14539_s28 + $0x22b4] ss:$20 sps:$4 sm:$0xff]   ;;  %v13885_v58 = vld [vmem:[%s14539_s28 + $0x22bc] ss:$20 sps:$4 sm:$0xff]  }
 0x38a   : > { %9190 = vmatprep.subr.bf16.mxu0 %v13834_v59  ;;  %9846 = vmatprep.subr.bf16.mxu1 %v13837_v61  ;;  %v1908_v59 = vcombine.high %v15484_v11, %v15484_v11  ;;  %v13880_v61 = vld [vmem:[%s14539_s28 + $0x22b0] ss:$20 sps:$4 sm:$0xff]   ;;  %v13886_v11 = vld [vmem:[%s14539_s28 + $0x22d8] ss:$20 sps:$4 sm:$0xff]  }
 0x38d   : > { %9191 = vmatpush1.bf16.msra.mxu0 %v13832_v0  ;;  %9847 = vmatpush1.bf16.msra.mxu1 %v13835_v1  ;;  %v13883_v0 = vld [vmem:[%s14539_s28 + $0x22b8] ss:$20 sps:$4 sm:$0xff]   ;;  %v13888_v1 = vld [vmem:[%s14539_s28 + $0x22dc] ss:$20 sps:$4 sm:$0xff]  }
 0x38e   : > { %9192 = vmatprep.subr.bf16.mxu0 %v13840_v2  ;;  %9848 = vmatprep.subr.bf16.mxu1 %v13843_v4  ;;  %v13891_v2 = vld [vmem:[%s14539_s28 + $0x22e4] ss:$20 sps:$4 sm:$0xff]   ;;  %v15650_v4 = vrot.slane %v1908_v59, %v14598_v49  ;;  %v13930_v59 = vld [vmem:[%s14539_s28 + $0x23f4] ss:$20 sps:$4 sm:$0xff]  }
 0x391   : > { %9193 = vmatpush1.bf16.msra.mxu0 %v13838_v5  ;;  %9849 = vmatpush1.bf16.msra.mxu1 %v13841_v7  ;;  %v13889_v5 = vld [vmem:[%s14539_s28 + $0x22e0] ss:$20 sps:$4 sm:$0xff]   ;;  %v13894_v7 = vld [vmem:[%s14539_s28 + $0x2304] ss:$20 sps:$4 sm:$0xff]  }
 0x392   : > { %9194 = vmatprep.subr.bf16.mxu0 %v13846_v9  ;;  %9850 = vmatprep.subr.bf16.mxu1 %v13849_v12  ;;  %v13897_v9 = vld [vmem:[%s14539_s28 + $0x230c] ss:$20 sps:$4 sm:$0xff]   ;;  %v1924_v12 = vcombine.high %v15650_v4, %v15650_v4 }
 0x395   : > { %9195 = vmatpush1.bf16.msra.mxu0 %v13844_v15  ;;  %9851 = vmatpush1.bf16.msra.mxu1 %v13847_v18  ;;  %v15660_v15 = vcombine.high %v15577_v19, %v15577_v19  ;;  %v13892_v18 = vld [vmem:[%s14539_s28 + $0x2300] ss:$20 sps:$4 sm:$0xff]  }
 0x396   : > { %9196 = vmatprep.subr.bf16.mxu0 %v13852_v21  ;;  %9852 = vmatprep.subr.bf16.mxu1 %v13855_v22  ;;  %v13895_v21 = vld [vmem:[%s14539_s28 + $0x2308] ss:$20 sps:$4 sm:$0xff]   ;;  %v13900_v22 = vld [vmem:[%s14539_s28 + $0x232c] ss:$20 sps:$4 sm:$0xff]  }
 0x399   : > { %9197 = vmatpush1.bf16.msra.mxu0 %v13850_v25  ;;  %9853 = vmatpush1.bf16.msra.mxu1 %v13853_v26  ;;  %v13903_v25 = vld [vmem:[%s14539_s28 + $0x2334] ss:$20 sps:$4 sm:$0xff]   ;;  %v15667_v26 = vrot.slane %v1924_v12, %v14598_v49  ;;  %v13945_v12 = vld [vmem:[%s14539_s28 + $0x244c] ss:$20 sps:$4 sm:$0xff]  }
 0x39a   : > { %9198 = vmatprep.subr.bf16.mxu0 %v13858_v20  ;;  %9854 = vmatprep.subr.bf16.mxu1 %v13861_v30  ;;  %v13898_v20 = vld [vmem:[%s14539_s28 + $0x2328] ss:$20 sps:$4 sm:$0xff]   ;;  %v13901_v30 = vld [vmem:[%s14539_s28 + $0x2330] ss:$20 sps:$4 sm:$0xff]  }
 0x39d   : > { %9199 = vmatpush1.bf16.msra.mxu0 %v13856_v31  ;;  %9855 = vmatpush1.bf16.msra.mxu1 %v13859_v35  ;;  %v13906_v31 = vld [vmem:[%s14539_s28 + $0x2354] ss:$20 sps:$4 sm:$0xff]   ;;  %v13909_v35 = vld [vmem:[%s14539_s28 + $0x235c] ss:$20 sps:$4 sm:$0xff]  }
 0x39e   : > { %9200 = vmatprep.subr.bf16.mxu0 %v13864_v36  ;;  %9856 = vmatprep.subr.bf16.mxu1 %v13867_v38  ;;  %v13904_v36 = vld [vmem:[%s14539_s28 + $0x2350] ss:$20 sps:$4 sm:$0xff]   ;;  %v13907_v38 = vld [vmem:[%s14539_s28 + $0x2358] ss:$20 sps:$4 sm:$0xff]  }
 0x3a1   : > { %9201 = vmatpush1.bf16.msra.mxu0 %v13862_v55  ;;  %9857 = vmatpush1.bf16.msra.mxu1 %v13865_v41  ;;  %v13912_v55 = vld [vmem:[%s14539_s28 + $0x237c] ss:$20 sps:$4 sm:$0xff]   ;;  %v13915_v41 = vld [vmem:[%s14539_s28 + $0x2384] ss:$20 sps:$4 sm:$0xff]  }
 0x3a2   : > { %9202 = vmatprep.subr.bf16.mxu0 %v13870_v42  ;;  %9858 = vmatprep.subr.bf16.mxu1 %v13873_v44  ;;  %v13910_v42 = vld [vmem:[%s14539_s28 + $0x2378] ss:$20 sps:$4 sm:$0xff]   ;;  %v13913_v44 = vld [vmem:[%s14539_s28 + $0x2380] ss:$20 sps:$4 sm:$0xff]  }
 0x3a5   : > { %9203 = vmatpush1.bf16.msra.mxu0 %v13868_v10  ;;  %9859 = vmatpush1.bf16.msra.mxu1 %v13871_v48  ;;  %v13918_v10 = vld [vmem:[%s14539_s28 + $0x23a4] ss:$20 sps:$4 sm:$0xff]   ;;  %v13921_v48 = vld [vmem:[%s14539_s28 + $0x23ac] ss:$20 sps:$4 sm:$0xff]  }
 0x3a6   : > { %9204 = vmatprep.subr.bf16.mxu0 %v13876_v50  ;;  %9860 = vmatprep.subr.bf16.mxu1 %v13879_v53  ;;  %v13916_v50 = vld [vmem:[%s14539_s28 + $0x23a0] ss:$20 sps:$4 sm:$0xff]   ;;  %v13919_v53 = vld [vmem:[%s14539_s28 + $0x23a8] ss:$20 sps:$4 sm:$0xff]  }
 0x3a9   : > { %9205 = vmatpush1.bf16.msra.mxu0 %v13874_v63  ;;  %9861 = vmatpush1.bf16.msra.mxu1 %v13877_v56  ;;  %v13924_v63 = vld [vmem:[%s14539_s28 + $0x23cc] ss:$20 sps:$4 sm:$0xff]   ;;  %v13927_v56 = vld [vmem:[%s14539_s28 + $0x23d4] ss:$20 sps:$4 sm:$0xff]  }
 0x3aa   : > { %9206 = vmatprep.subr.bf16.mxu0 %v13882_v57  ;;  %9862 = vmatprep.subr.bf16.mxu1 %v13885_v58  ;;  %v13922_v57 = vld [vmem:[%s14539_s28 + $0x23c8] ss:$20 sps:$4 sm:$0xff]   ;;  %v13925_v58 = vld [vmem:[%s14539_s28 + $0x23d0] ss:$20 sps:$4 sm:$0xff]  }
 0x3ad   : > { %9207 = vmatpush1.bf16.msra.mxu0 %v13880_v61  ;;  %9863 = vmatpush1.bf16.msra.mxu1 %v13883_v0  ;;  %v13933_v61 = vld [vmem:[%s14539_s28 + $0x23fc] ss:$20 sps:$4 sm:$0xff]  }
 0x3ae   : > { %9208 = vmatprep.subr.bf16.mxu0 %v13888_v1  ;;  %9864 = vmatprep.subr.bf16.mxu1 %v13891_v2  ;;  %v13928_v0 = vld [vmem:[%s14539_s28 + $0x23f0] ss:$20 sps:$4 sm:$0xff]   ;;  %v13931_v1 = vld [vmem:[%s14539_s28 + $0x23f8] ss:$20 sps:$4 sm:$0xff]  }
 0x3af   : > { %v13936_v2 = vld [vmem:[%s14539_s28 + $0x241c] ss:$20 sps:$4 sm:$0xff]  }
 0x3b1   : > { %9209 = vmatpush1.bf16.msra.mxu0 %v13886_v11  ;;  %9865 = vmatpush1.bf16.msra.mxu1 %v13889_v5  ;;  %v13939_v11 = vld [vmem:[%s14539_s28 + $0x2424] ss:$20 sps:$4 sm:$0xff]  }
 0x3b2   : > { %9219 = vmatprep.subr.bf16.mxu0 %v13894_v7  ;;  %9875 = vmatprep.subr.bf16.mxu1 %v13897_v9  ;;  %v13934_v5 = vld [vmem:[%s14539_s28 + $0x2418] ss:$20 sps:$4 sm:$0xff]   ;;  %v13937_v7 = vld [vmem:[%s14539_s28 + $0x2420] ss:$20 sps:$4 sm:$0xff]  }
 0x3b3   : > { %v13942_v9 = vld [vmem:[%s14539_s28 + $0x2444] ss:$20 sps:$4 sm:$0xff]  }
 0x3b4   : > { %9211 = vmatmul.mubr.bf16.vlgmr.msra.gmra.mrb[0].mxu0 %v15660_v15  ;;  %9867 = vmatmul.mubr.bf16.vlgmr.msra.gmra.mrb[0].mxu1 %v15660_v15 }
 0x3b5   : > { %9220 = vmatpush1.bf16.msra.mxu0 %v13892_v18  ;;  %9876 = vmatpush1.bf16.msra.mxu1 %v13895_v21  ;;  %v13940_v18 = vld [vmem:[%s14539_s28 + $0x2440] ss:$20 sps:$4 sm:$0xff]   ;;  %v13943_v21 = vld [vmem:[%s14539_s28 + $0x2448] ss:$20 sps:$4 sm:$0xff]  }
 0x3b6   : > { %9221 = vmatprep.subr.bf16.mxu0 %v13900_v22  ;;  %9877 = vmatprep.subr.bf16.mxu1 %v13903_v25  ;;  %v13948_v22 = vld [vmem:[%s14539_s28 + $0x246c] ss:$20 sps:$4 sm:$0xff]   ;;  %v13951_v25 = vld [vmem:[%s14539_s28 + $0x2474] ss:$20 sps:$4 sm:$0xff]  }
 0x3b7   : > { %9251 = vmatprep.mubr.bf16.mxu0 %v15667_v26  ;;  %9907 = vmatprep.mubr.bf16.mxu1 %v15667_v26 }
 0x3b9   : > { %9222 = vmatpush1.bf16.msra.mxu0 %v13898_v20  ;;  %9878 = vmatpush1.bf16.msra.mxu1 %v13901_v30  ;;  %v13946_v20 = vld [vmem:[%s14539_s28 + $0x2468] ss:$20 sps:$4 sm:$0xff]   ;;  %v13949_v30 = vld [vmem:[%s14539_s28 + $0x2470] ss:$20 sps:$4 sm:$0xff]  }
 0x3ba   : > { %9223 = vmatprep.subr.bf16.mxu0 %v13906_v31  ;;  %9879 = vmatprep.subr.bf16.mxu1 %v13909_v35  ;;  %v13954_v31 = vld [vmem:[%s14539_s28 + $0x2494] ss:$20 sps:$4 sm:$0xff]   ;;  %v13957_v35 = vld [vmem:[%s14539_s28 + $0x249c] ss:$20 sps:$4 sm:$0xff]  }
 0x3bd   : > { %9224 = vmatpush1.bf16.msra.mxu0 %v13904_v36  ;;  %9880 = vmatpush1.bf16.msra.mxu1 %v13907_v38  ;;  %v13952_v36 = vld [vmem:[%s14539_s28 + $0x2490] ss:$20 sps:$4 sm:$0xff]   ;;  %v13955_v38 = vld [vmem:[%s14539_s28 + $0x2498] ss:$20 sps:$4 sm:$0xff]  }
 0x3be   : > { %9225 = vmatprep.subr.bf16.mxu0 %v13912_v55  ;;  %9881 = vmatprep.subr.bf16.mxu1 %v13915_v41  ;;  %v13960_v55 = vld [vmem:[%s14539_s28 + $0x24bc] ss:$20 sps:$4 sm:$0xff]   ;;  %v13963_v41 = vld [vmem:[%s14539_s28 + $0x24c4] ss:$20 sps:$4 sm:$0xff]  }
 0x3c1   : > { %9226 = vmatpush1.bf16.msra.mxu0 %v13910_v42  ;;  %9882 = vmatpush1.bf16.msra.mxu1 %v13913_v44  ;;  %v13958_v42 = vld [vmem:[%s14539_s28 + $0x24b8] ss:$20 sps:$4 sm:$0xff]   ;;  %v13961_v44 = vld [vmem:[%s14539_s28 + $0x24c0] ss:$20 sps:$4 sm:$0xff]  }
 0x3c2   : > { %9227 = vmatprep.subr.bf16.mxu0 %v13918_v10  ;;  %9883 = vmatprep.subr.bf16.mxu1 %v13921_v48  ;;  %v13966_v10 = vld [vmem:[%s14539_s28 + $0x24e4] ss:$20 sps:$4 sm:$0xff]   ;;  %v13969_v48 = vld [vmem:[%s14539_s28 + $0x24ec] ss:$20 sps:$4 sm:$0xff]  }
 0x3c5   : > { %9228 = vmatpush1.bf16.msra.mxu0 %v13916_v50  ;;  %9884 = vmatpush1.bf16.msra.mxu1 %v13919_v53  ;;  %v13964_v50 = vld [vmem:[%s14539_s28 + $0x24e0] ss:$20 sps:$4 sm:$0xff]   ;;  %v13967_v53 = vld [vmem:[%s14539_s28 + $0x24e8] ss:$20 sps:$4 sm:$0xff]  }
 0x3c6   : > { %9229 = vmatprep.subr.bf16.mxu0 %v13924_v63  ;;  %9885 = vmatprep.subr.bf16.mxu1 %v13927_v56  ;;  %v13972_v63 = vld [vmem:[%s14539_s28 + $0x250c] ss:$20 sps:$4 sm:$0xff]   ;;  %v13975_v56 = vld [vmem:[%s14539_s28 + $0x2514] ss:$20 sps:$4 sm:$0xff]  }
 0x3c9   : > { %9230 = vmatpush1.bf16.msra.mxu0 %v13922_v57  ;;  %9886 = vmatpush1.bf16.msra.mxu1 %v13925_v58  ;;  %v13970_v57 = vld [vmem:[%s14539_s28 + $0x2508] ss:$20 sps:$4 sm:$0xff]   ;;  %v13973_v58 = vld [vmem:[%s14539_s28 + $0x2510] ss:$20 sps:$4 sm:$0xff]  }
 0x3ca   : > { %9231 = vmatprep.subr.bf16.mxu0 %v13930_v59  ;;  %9887 = vmatprep.subr.bf16.mxu1 %v13933_v61  ;;  %v13978_v59 = vld [vmem:[%s14539_s28 + $0x2534] ss:$20 sps:$4 sm:$0xff]   ;;  %v13981_v61 = vld [vmem:[%s14539_s28 + $0x253c] ss:$20 sps:$4 sm:$0xff]  }
 0x3cd   : > { %9232 = vmatpush1.bf16.msra.mxu0 %v13928_v0  ;;  %9888 = vmatpush1.bf16.msra.mxu1 %v13931_v1  ;;  %v13976_v0 = vld [vmem:[%s14539_s28 + $0x2530] ss:$20 sps:$4 sm:$0xff]   ;;  %v13979_v1 = vld [vmem:[%s14539_s28 + $0x2538] ss:$20 sps:$4 sm:$0xff]  }
 0x3ce   : > { %9233 = vmatprep.subr.bf16.mxu0 %v13936_v2  ;;  %9889 = vmatprep.subr.bf16.mxu1 %v13939_v11  ;;  %v13984_v2 = vld [vmem:[%s14539_s28 + $0x255c] ss:$20 sps:$4 sm:$0xff]   ;;  %v13987_v11 = vld [vmem:[%s14539_s28 + $0x2564] ss:$20 sps:$4 sm:$0xff]  }
 0x3d1   : > { %9234 = vmatpush1.bf16.msra.mxu0 %v13934_v5  ;;  %9890 = vmatpush1.bf16.msra.mxu1 %v13937_v7  ;;  %v13982_v5 = vld [vmem:[%s14539_s28 + $0x2558] ss:$20 sps:$4 sm:$0xff]   ;;  %v13985_v7 = vld [vmem:[%s14539_s28 + $0x2560] ss:$20 sps:$4 sm:$0xff]  }
 0x3d2   : > { %9235 = vmatprep.subr.bf16.mxu0 %v13942_v9  ;;  %9891 = vmatprep.subr.bf16.mxu1 %v13945_v12  ;;  %v13991_v9 = vld [vmem:[%s14539_s28 + $0x2584] ss:$20 sps:$4 sm:$0xff]   ;;  %v13994_v12 = vld [vmem:[%s14539_s28 + $0x258c] ss:$20 sps:$4 sm:$0xff]  }
 0x3d5   : > { %9236 = vmatpush1.bf16.msra.mxu0 %v13940_v18  ;;  %9892 = vmatpush1.bf16.msra.mxu1 %v13943_v21  ;;  %v15735_v18 = vrot.slane %v15650_v4, %v14598_v49  ;;  %v13989_v21 = vld [vmem:[%s14539_s28 + $0x2580] ss:$20 sps:$4 sm:$0xff]   ;;  %v13995_v49 = vld [vmem:[%s14539_s28 + $0x25a8] ss:$20 sps:$4 sm:$0xff]   ;;  %v13998_v4 = vld [vmem:[%s14539_s28 + $0x25b0] ss:$20 sps:$4 sm:$0xff]  }
 0x3d6   : > { %9237 = vmatprep.subr.bf16.mxu0 %v13948_v22  ;;  %9893 = vmatprep.subr.bf16.mxu1 %v13951_v25  ;;  %v13992_v22 = vld [vmem:[%s14539_s28 + $0x2588] ss:$20 sps:$4 sm:$0xff]   ;;  %v13997_v25 = vld [vmem:[%s14539_s28 + $0x25ac] ss:$20 sps:$4 sm:$0xff]  }
 0x3d9   : > { %9238 = vmatpush1.bf16.msra.mxu0 %v13946_v20  ;;  %9894 = vmatpush1.bf16.msra.mxu1 %v13949_v30  ;;  %v14000_v20 = vld [vmem:[%s14539_s28 + $0x25b4] ss:$20 sps:$4 sm:$0xff]   ;;  %v15743_v30 = vcombine.high %v15667_v26, %v15667_v26 }
 0x3da   : > { %9239 = vmatprep.subr.bf16.mxu0 %v13954_v31  ;;  %9895 = vmatprep.subr.bf16.mxu1 %v13957_v35  ;;  %v14003_v31 = vld [vmem:[%s14539_s28 + $0x25d4] ss:$20 sps:$4 sm:$0xff]   ;;  %v14006_v35 = vld [vmem:[%s14539_s28 + $0x25dc] ss:$20 sps:$4 sm:$0xff]  }
 0x3dd   : > { %9240 = vmatpush1.bf16.msra.mxu0 %v13952_v36  ;;  %9896 = vmatpush1.bf16.msra.mxu1 %v13955_v38  ;;  %v14001_v36 = vld [vmem:[%s14539_s28 + $0x25d0] ss:$20 sps:$4 sm:$0xff]   ;;  %v14004_v38 = vld [vmem:[%s14539_s28 + $0x25d8] ss:$20 sps:$4 sm:$0xff]  }
 0x3de   : > { %9241 = vmatprep.subr.bf16.mxu0 %v13960_v55  ;;  %9897 = vmatprep.subr.bf16.mxu1 %v13963_v41  ;;  %v14009_v55 = vld [vmem:[%s14539_s28 + $0x25fc] ss:$20 sps:$4 sm:$0xff]   ;;  %v14012_v41 = vld [vmem:[%s14539_s28 + $0x2604] ss:$20 sps:$4 sm:$0xff]  }
 0x3e1   : > { %9242 = vmatpush1.bf16.msra.mxu0 %v13958_v42  ;;  %9898 = vmatpush1.bf16.msra.mxu1 %v13961_v44  ;;  %v14007_v42 = vld [vmem:[%s14539_s28 + $0x25f8] ss:$20 sps:$4 sm:$0xff]   ;;  %v14010_v44 = vld [vmem:[%s14539_s28 + $0x2600] ss:$20 sps:$4 sm:$0xff]  }
 0x3e2   : > { %9243 = vmatprep.subr.bf16.mxu0 %v13966_v10  ;;  %9899 = vmatprep.subr.bf16.mxu1 %v13969_v48  ;;  %v14015_v10 = vld [vmem:[%s14539_s28 + $0x2624] ss:$20 sps:$4 sm:$0xff]   ;;  %v14018_v48 = vld [vmem:[%s14539_s28 + $0x262c] ss:$20 sps:$4 sm:$0xff]  }
 0x3e5   : > { %9244 = vmatpush1.bf16.msra.mxu0 %v13964_v50  ;;  %9900 = vmatpush1.bf16.msra.mxu1 %v13967_v53  ;;  %v14013_v50 = vld [vmem:[%s14539_s28 + $0x2620] ss:$20 sps:$4 sm:$0xff]   ;;  %v14016_v53 = vld [vmem:[%s14539_s28 + $0x2628] ss:$20 sps:$4 sm:$0xff]  }
 0x3e6   : > { %9245 = vmatprep.subr.bf16.mxu0 %v13972_v63  ;;  %9901 = vmatprep.subr.bf16.mxu1 %v13975_v56  ;;  %v14021_v63 = vld [vmem:[%s14539_s28 + $0x264c] ss:$20 sps:$4 sm:$0xff]   ;;  %v14024_v56 = vld [vmem:[%s14539_s28 + $0x2654] ss:$20 sps:$4 sm:$0xff]  }
 0x3e9   : > { %9246 = vmatpush1.bf16.msra.mxu0 %v13970_v57  ;;  %9902 = vmatpush1.bf16.msra.mxu1 %v13973_v58  ;;  %v14019_v57 = vld [vmem:[%s14539_s28 + $0x2648] ss:$20 sps:$4 sm:$0xff]   ;;  %v14022_v58 = vld [vmem:[%s14539_s28 + $0x2650] ss:$20 sps:$4 sm:$0xff]  }
 0x3ea   : > { %9247 = vmatprep.subr.bf16.mxu0 %v13978_v59  ;;  %9903 = vmatprep.subr.bf16.mxu1 %v13981_v61  ;;  %v14027_v59 = vld [vmem:[%s14539_s28 + $0x2674] ss:$20 sps:$4 sm:$0xff]   ;;  %v14030_v61 = vld [vmem:[%s14539_s28 + $0x267c] ss:$20 sps:$4 sm:$0xff]  }
 0x3ed   : > { %9248 = vmatpush1.bf16.msra.mxu0 %v13976_v0  ;;  %9904 = vmatpush1.bf16.msra.mxu1 %v13979_v1  ;;  %v14025_v0 = vld [vmem:[%s14539_s28 + $0x2670] ss:$20 sps:$4 sm:$0xff]   ;;  %v14028_v1 = vld [vmem:[%s14539_s28 + $0x2678] ss:$20 sps:$4 sm:$0xff]  }
 0x3ee   : > { %9249 = vmatprep.subr.bf16.mxu0 %v13984_v2  ;;  %9905 = vmatprep.subr.bf16.mxu1 %v13987_v11  ;;  %v14033_v2 = vld [vmem:[%s14539_s28 + $0x269c] ss:$20 sps:$4 sm:$0xff]   ;;  %v14036_v11 = vld [vmem:[%s14539_s28 + $0x26a4] ss:$20 sps:$4 sm:$0xff]  }
 0x3f1   : > { %9250 = vmatpush1.bf16.msra.mxu0 %v13982_v5  ;;  %9906 = vmatpush1.bf16.msra.mxu1 %v13985_v7  ;;  %v14031_v5 = vld [vmem:[%s14539_s28 + $0x2698] ss:$20 sps:$4 sm:$0xff]   ;;  %v14034_v7 = vld [vmem:[%s14539_s28 + $0x26a0] ss:$20 sps:$4 sm:$0xff]  }
 0x3f2   : > { %9260 = vmatprep.subr.bf16.mxu0 %v13991_v9  ;;  %9916 = vmatprep.subr.bf16.mxu1 %v13994_v12  ;;  %v14039_v9 = vld [vmem:[%s14539_s28 + $0x26c4] ss:$20 sps:$4 sm:$0xff]   ;;  %v14042_v12 = vld [vmem:[%s14539_s28 + $0x26cc] ss:$20 sps:$4 sm:$0xff]  }
 0x3f4   : > { %9252 = vmatmul.mubr.bf16.vlgmr.msra.gmra.mrb[0].mxu0 %v15735_v18  ;;  %9908 = vmatmul.mubr.bf16.vlgmr.msra.gmra.mrb[0].mxu1 %v15735_v18 }
 0x3f5   : > { %9261 = vmatpush1.bf16.msra.mxu0 %v13989_v21  ;;  %9917 = vmatpush1.bf16.msra.mxu1 %v13992_v22  ;;  %v14037_v21 = vld [vmem:[%s14539_s28 + $0x26c0] ss:$20 sps:$4 sm:$0xff]   ;;  %v14040_v22 = vld [vmem:[%s14539_s28 + $0x26c8] ss:$20 sps:$4 sm:$0xff]  }
 0x3f6   : > { %9262 = vmatprep.subr.bf16.mxu0 %v13997_v25  ;;  %9918 = vmatprep.subr.bf16.mxu1 %v14000_v20  ;;  %v14045_v25 = vld [vmem:[%s14539_s28 + $0x26ec] ss:$20 sps:$4 sm:$0xff]   ;;  %v14048_v20 = vld [vmem:[%s14539_s28 + $0x26f4] ss:$20 sps:$4 sm:$0xff]  }
 0x3f7   : > { %9292 = vmatprep.mubr.bf16.mxu0 %v15743_v30  ;;  %9948 = vmatprep.mubr.bf16.mxu1 %v15743_v30 }
 0x3f9   : > { %9263 = vmatpush1.bf16.msra.mxu0 %v13995_v49  ;;  %9919 = vmatpush1.bf16.msra.mxu1 %v13998_v4  ;;  %v14043_v49 = vld [vmem:[%s14539_s28 + $0x26e8] ss:$20 sps:$4 sm:$0xff]   ;;  %v14046_v4 = vld [vmem:[%s14539_s28 + $0x26f0] ss:$20 sps:$4 sm:$0xff]  }
 0x3fa   : > { %9264 = vmatprep.subr.bf16.mxu0 %v14003_v31  ;;  %9920 = vmatprep.subr.bf16.mxu1 %v14006_v35  ;;  %v14051_v31 = vld [vmem:[%s14539_s28 + $0x2714] ss:$20 sps:$4 sm:$0xff]   ;;  %v14054_v35 = vld [vmem:[%s14539_s28 + $0x271c] ss:$20 sps:$4 sm:$0xff]  }
 0x3fd   : > { %9265 = vmatpush1.bf16.msra.mxu0 %v14001_v36  ;;  %9921 = vmatpush1.bf16.msra.mxu1 %v14004_v38  ;;  %v14049_v36 = vld [vmem:[%s14539_s28 + $0x2710] ss:$20 sps:$4 sm:$0xff]   ;;  %v14052_v38 = vld [vmem:[%s14539_s28 + $0x2718] ss:$20 sps:$4 sm:$0xff]  }
 0x3fe   : > { %9266 = vmatprep.subr.bf16.mxu0 %v14009_v55  ;;  %9922 = vmatprep.subr.bf16.mxu1 %v14012_v41  ;;  %v14057_v55 = vld [vmem:[%s14539_s28 + $0x273c] ss:$20 sps:$4 sm:$0xff]   ;;  %v14060_v41 = vld [vmem:[%s14539_s28 + $0x2744] ss:$20 sps:$4 sm:$0xff]  }
 0x401   : > { %9267 = vmatpush1.bf16.msra.mxu0 %v14007_v42  ;;  %9923 = vmatpush1.bf16.msra.mxu1 %v14010_v44  ;;  %v14055_v42 = vld [vmem:[%s14539_s28 + $0x2738] ss:$20 sps:$4 sm:$0xff]   ;;  %v14058_v44 = vld [vmem:[%s14539_s28 + $0x2740] ss:$20 sps:$4 sm:$0xff]  }
 0x402   : > { %9268 = vmatprep.subr.bf16.mxu0 %v14015_v10  ;;  %9924 = vmatprep.subr.bf16.mxu1 %v14018_v48  ;;  %v14063_v10 = vld [vmem:[%s14539_s28 + $0x2764] ss:$20 sps:$4 sm:$0xff]   ;;  %v14066_v48 = vld [vmem:[%s14539_s28 + $0x276c] ss:$20 sps:$4 sm:$0xff]  }
 0x405   : > { %9269 = vmatpush1.bf16.msra.mxu0 %v14013_v50  ;;  %9925 = vmatpush1.bf16.msra.mxu1 %v14016_v53  ;;  %v14061_v50 = vld [vmem:[%s14539_s28 + $0x2760] ss:$20 sps:$4 sm:$0xff]   ;;  %v14064_v53 = vld [vmem:[%s14539_s28 + $0x2768] ss:$20 sps:$4 sm:$0xff]  }
 0x406   : > { %9270 = vmatprep.subr.bf16.mxu0 %v14021_v63  ;;  %9926 = vmatprep.subr.bf16.mxu1 %v14024_v56  ;;  %v14069_v63 = vld [vmem:[%s14539_s28 + $0x278c] ss:$20 sps:$4 sm:$0xff]   ;;  %v14072_v56 = vld [vmem:[%s14539_s28 + $0x2794] ss:$20 sps:$4 sm:$0xff]  }
 0x409   : > { %9271 = vmatpush1.bf16.msra.mxu0 %v14019_v57  ;;  %9927 = vmatpush1.bf16.msra.mxu1 %v14022_v58  ;;  %v14067_v57 = vld [vmem:[%s14539_s28 + $0x2788] ss:$20 sps:$4 sm:$0xff]   ;;  %v14070_v58 = vld [vmem:[%s14539_s28 + $0x2790] ss:$20 sps:$4 sm:$0xff]  }
 0x40a   : > { %9272 = vmatprep.subr.bf16.mxu0 %v14027_v59  ;;  %9928 = vmatprep.subr.bf16.mxu1 %v14030_v61  ;;  %v14075_v59 = vld [vmem:[%s14539_s28 + $0x27b4] ss:$20 sps:$4 sm:$0xff]   ;;  %v14078_v61 = vld [vmem:[%s14539_s28 + $0x27bc] ss:$20 sps:$4 sm:$0xff]  }
 0x40d   : > { %9273 = vmatpush1.bf16.msra.mxu0 %v14025_v0  ;;  %9929 = vmatpush1.bf16.msra.mxu1 %v14028_v1  ;;  %v14073_v0 = vld [vmem:[%s14539_s28 + $0x27b0] ss:$20 sps:$4 sm:$0xff]   ;;  %v14076_v1 = vld [vmem:[%s14539_s28 + $0x27b8] ss:$20 sps:$4 sm:$0xff]  }
 0x40e   : > { %9274 = vmatprep.subr.bf16.mxu0 %v14033_v2  ;;  %9930 = vmatprep.subr.bf16.mxu1 %v14036_v11  ;;  %v14081_v2 = vld [vmem:[%s14539_s28 + $0x27dc] ss:$20 sps:$4 sm:$0xff]   ;;  %v14084_v11 = vld [vmem:[%s14539_s28 + $0x27e4] ss:$20 sps:$4 sm:$0xff]  }
 0x411   : > { %9275 = vmatpush1.bf16.msra.mxu0 %v14031_v5  ;;  %9931 = vmatpush1.bf16.msra.mxu1 %v14034_v7  ;;  %v14079_v5 = vld [vmem:[%s14539_s28 + $0x27d8] ss:$20 sps:$4 sm:$0xff]   ;;  %v14082_v7 = vld [vmem:[%s14539_s28 + $0x27e0] ss:$20 sps:$4 sm:$0xff]  }
 0x412   : > { %9276 = vmatprep.subr.bf16.mxu0 %v14039_v9  ;;  %9932 = vmatprep.subr.bf16.mxu1 %v14042_v12  ;;  %v14085_v9 = vld [vmem:[%s14539_s28 + $0x150] ss:$20 sps:$4 sm:$0xff]  }
 0x413   : > { %v14086_v12 = vld [vmem:[%s14539_s28 + $0x3d0] ss:$20 sps:$4 sm:$0xff]  }
 0x415   : > { %9277 = vmatpush1.bf16.msra.mxu0 %v14037_v21  ;;  %9933 = vmatpush1.bf16.msra.mxu1 %v14040_v22  ;;  %v15811_v21 = vcombine.high %v15735_v18, %v15735_v18  ;;  %v14087_v22 = vld [vmem:[%s14539_s28 + $0x10] ss:$20 sps:$4 sm:$0xff]  }
 0x416   : > { %9278 = vmatprep.subr.bf16.mxu0 %v14045_v25  ;;  %9934 = vmatprep.subr.bf16.mxu1 %v14048_v20  ;;  %v14088_v25 = vld [vmem:[%s14539_s28 + $0x290] ss:$20 sps:$4 sm:$0xff]   ;;  %v14089_v20 = vld [vmem:[%s14539_s28 + $0x178] ss:$20 sps:$4 sm:$0xff]  }
 0x419   : > { %9279 = vmatpush1.bf16.msra.mxu0 %v14043_v49  ;;  %9935 = vmatpush1.bf16.msra.mxu1 %v14046_v4  ;;  %v14090_v49 = vld [vmem:[%s14539_s28 + $0x3f8] ss:$20 sps:$4 sm:$0xff]  }
 0x41a   : > { %9280 = vmatprep.subr.bf16.mxu0 %v14051_v31  ;;  %9936 = vmatprep.subr.bf16.mxu1 %v14054_v35  ;;  %v14091_v4 = vld [vmem:[%s14539_s28 + $0x38] ss:$20 sps:$4 sm:$0xff]   ;;  %v14093_v35 = vld [vmem:[%s14539_s28 + $0x1a0] ss:$20 sps:$4 sm:$0xff]  }
 0x41b   : > { %v14092_v31 = vld [vmem:[%s14539_s28 + $0x2b8] ss:$20 sps:$4 sm:$0xff]  }
 0x41d   : > { %9281 = vmatpush1.bf16.msra.mxu0 %v14049_v36  ;;  %9937 = vmatpush1.bf16.msra.mxu1 %v14052_v38  ;;  %v14094_v36 = vld [vmem:[%s14539_s28 + $0x420] ss:$20 sps:$4 sm:$0xff]  }
 0x41e   : > { %9282 = vmatprep.subr.bf16.mxu0 %v14057_v55  ;;  %9938 = vmatprep.subr.bf16.mxu1 %v14060_v41  ;;  %v14095_v38 = vld [vmem:[%s14539_s28 + $0x60] ss:$20 sps:$4 sm:$0xff]   ;;  %v14097_v41 = vld [vmem:[%s14539_s28 + $0x1c8] ss:$20 sps:$4 sm:$0xff]  }
 0x41f   : > { %v14096_v55 = vld [vmem:[%s14539_s28 + $0x2e0] ss:$20 sps:$4 sm:$0xff]  }
 0x421   : > { %9283 = vmatpush1.bf16.msra.mxu0 %v14055_v42  ;;  %9939 = vmatpush1.bf16.msra.mxu1 %v14058_v44  ;;  %v14098_v42 = vld [vmem:[%s14539_s28 + $0x448] ss:$20 sps:$4 sm:$0xff]  }
 0x422   : > { %9284 = vmatprep.subr.bf16.mxu0 %v14063_v10  ;;  %9940 = vmatprep.subr.bf16.mxu1 %v14066_v48  ;;  %v14099_v44 = vld [vmem:[%s14539_s28 + $0x88] ss:$20 sps:$4 sm:$0xff]   ;;  %v14102_v10 = vld [vmem:[%s14539_s28 + $0x470] ss:$20 sps:$4 sm:$0xff]  }
 0x423   : > { %v14103_v48 = vld [vmem:[%s14539_s28 + $0xb0] ss:$20 sps:$4 sm:$0xff]  }
 0x425   : > { %9285 = vmatpush1.bf16.msra.mxu0 %v14061_v50  ;;  %9941 = vmatpush1.bf16.msra.mxu1 %v14064_v53  ;;  %v14104_v50 = vld [vmem:[%s14539_s28 + $0x330] ss:$20 sps:$4 sm:$0xff]   ;;  %v14105_v53 = vld [vmem:[%s14539_s28 + $0x218] ss:$20 sps:$4 sm:$0xff]  }
 0x426   : > { %9286 = vmatprep.subr.bf16.mxu0 %v14069_v63  ;;  %9942 = vmatprep.subr.bf16.mxu1 %v14072_v56  ;;  %v14106_v63 = vld [vmem:[%s14539_s28 + $0x498] ss:$20 sps:$4 sm:$0xff]  }
 0x427   : > { %v14107_v56 = vld [vmem:[%s14539_s28 + $0xd8] ss:$20 sps:$4 sm:$0xff]  }
 0x429   : > { %9287 = vmatpush1.bf16.msra.mxu0 %v14067_v57  ;;  %9943 = vmatpush1.bf16.msra.mxu1 %v14070_v58  ;;  %v14108_v57 = vld [vmem:[%s14539_s28 + $0x358] ss:$20 sps:$4 sm:$0xff]   ;;  %v14109_v58 = vld [vmem:[%s14539_s28 + $0x240] ss:$20 sps:$4 sm:$0xff]  }
 0x42a   : > { %9288 = vmatprep.subr.bf16.mxu0 %v14075_v59  ;;  %9944 = vmatprep.subr.bf16.mxu1 %v14078_v61  ;;  %v14110_v59 = vld [vmem:[%s14539_s28 + $0x4c0] ss:$20 sps:$4 sm:$0xff]  }
 0x42b   : > { %v14111_v61 = vld [vmem:[%s14539_s28 + $0x100] ss:$20 sps:$4 sm:$0xff]  }
 0x42d   : > { %9289 = vmatpush1.bf16.msra.mxu0 %v14073_v0  ;;  %9945 = vmatpush1.bf16.msra.mxu1 %v14076_v1  ;;  %v14112_v0 = vld [vmem:[%s14539_s28 + $0x380] ss:$20 sps:$4 sm:$0xff]   ;;  %v14113_v1 = vld [vmem:[%s14539_s28 + $0x268] ss:$20 sps:$4 sm:$0xff]  }
 0x42e   : > { %9290 = vmatprep.subr.bf16.mxu0 %v14081_v2  ;;  %9946 = vmatprep.subr.bf16.mxu1 %v14084_v11  ;;  %v14114_v2 = vld [vmem:[%s14539_s28 + $0x4e8] ss:$20 sps:$4 sm:$0xff]  }
 0x42f   : > { %v14115_v11 = vld [vmem:[%s14539_s28 + $0x128] ss:$20 sps:$4 sm:$0xff]  }
 0x431   : > { %9291 = vmatpush1.bf16.msra.mxu0 %v14079_v5  ;;  %9947 = vmatpush1.bf16.msra.mxu1 %v14082_v7  ;;  %v14116_v5 = vld [vmem:[%s14539_s28 + $0x3a8] ss:$20 sps:$4 sm:$0xff]   ;;  %v14117_v7 = vld [vmem:[%s14539_s28 + $0x650] ss:$20 sps:$4 sm:$0xff]  }
 0x432   : > { %12009 = vmatprep.subr.bf16.mxu0 %v14085_v9  ;;  %12031 = vmatprep.subr.bf16.mxu1 %v14086_v12  ;;  %v14118_v9 = vld [vmem:[%s14539_s28 + $0x8d0] ss:$20 sps:$4 sm:$0xff]  }
 0x433   : > { %v14119_v12 = vld [vmem:[%s14539_s28 + $0x510] ss:$20 sps:$4 sm:$0xff]  }
 0x434   : > { %9293 = vmatmul.mubr.bf16.vlgmr.msra.gmra.mrb[0].mxu0 %v15811_v21  ;;  %9949 = vmatmul.mubr.bf16.vlgmr.msra.gmra.mrb[0].mxu1 %v15811_v21 }
 0x435   : > { %12010 = vmatpush3.bf16.msra.mxu0 %v14087_v22  ;;  %12032 = vmatpush3.bf16.msra.mxu1 %v14088_v25  ;;  %v14120_v22 = vld [vmem:[%s14539_s28 + $0x790] ss:$20 sps:$4 sm:$0xff]   ;;  %v14121_v25 = vld [vmem:[%s14539_s28 + $0x678] ss:$20 sps:$4 sm:$0xff]  }
 0x436   : > { %12011 = vmatprep.subr.bf16.mxu0 %v14089_v20  ;;  %12033 = vmatprep.subr.bf16.mxu1 %v14090_v49  ;;  %v14122_v20 = vld [vmem:[%s14539_s28 + $0x8f8] ss:$20 sps:$4 sm:$0xff]  }
 0x437   : > { %9989 = vmatprep.mubr.bf16.mxu0 %v14613_v60  ;;  %10029 = vmatprep.mubr.bf16.mxu1 %v14641_v17  ;;  %v14100_v60 = vld [vmem:[%s14539_s28 + $0x308] ss:$20 sps:$4 sm:$0xff]   ;;  %v14101_v17 = vld [vmem:[%s14539_s28 + $0x1f0] ss:$20 sps:$4 sm:$0xff]   ;;  %v14123_v49 = vld [vmem:[%s14539_s28 + $0x538] ss:$20 sps:$4 sm:$0xff]  }
 0x439   : > { %12012 = vmatpush3.bf16.msra.mxu0 %v14091_v4  ;;  %12034 = vmatpush3.bf16.msra.mxu1 %v14092_v31  ;;  %v14124_v4 = vld [vmem:[%s14539_s28 + $0x7b8] ss:$20 sps:$4 sm:$0xff]   ;;  %v14125_v31 = vld [vmem:[%s14539_s28 + $0x6a0] ss:$20 sps:$4 sm:$0xff]  }
 0x43a   : > { %12013 = vmatprep.subr.bf16.mxu0 %v14093_v35  ;;  %12035 = vmatprep.subr.bf16.mxu1 %v14094_v36  ;;  %v14126_v35 = vld [vmem:[%s14539_s28 + $0x920] ss:$20 sps:$4 sm:$0xff]   ;;  %v14129_v36 = vld [vmem:[%s14539_s28 + $0x6c8] ss:$20 sps:$4 sm:$0xff]  }
 0x43d   : > { %12014 = vmatpush3.bf16.msra.mxu0 %v14095_v38  ;;  %12036 = vmatpush3.bf16.msra.mxu1 %v14096_v55  ;;  %v14130_v38 = vld [vmem:[%s14539_s28 + $0x948] ss:$20 sps:$4 sm:$0xff]  }
 0x43e   : > { %12015 = vmatprep.subr.bf16.mxu0 %v14097_v41  ;;  %12037 = vmatprep.subr.bf16.mxu1 %v14098_v42  ;;  %v14131_v55 = vld [vmem:[%s14539_s28 + $0x588] ss:$20 sps:$4 sm:$0xff]   ;;  %v14134_v41 = vld [vmem:[%s14539_s28 + $0x970] ss:$20 sps:$4 sm:$0xff]  }
 0x43f   : > { %v14135_v42 = vld [vmem:[%s14539_s28 + $0x5b0] ss:$20 sps:$4 sm:$0xff]  }
 0x441   : > { %12016 = vmatpush3.bf16.msra.mxu0 %v14099_v44  ;;  %12038 = vmatpush3.bf16.msra.mxu1 %v14100_v60  ;;  %v14136_v44 = vld [vmem:[%s14539_s28 + $0x830] ss:$20 sps:$4 sm:$0xff]   ;;  %v14137_v60 = vld [vmem:[%s14539_s28 + $0x718] ss:$20 sps:$4 sm:$0xff]  }
 0x442   : > { %12017 = vmatprep.subr.bf16.mxu0 %v14101_v17  ;;  %12039 = vmatprep.subr.bf16.mxu1 %v14102_v10  ;;  %v14138_v17 = vld [vmem:[%s14539_s28 + $0x998] ss:$20 sps:$4 sm:$0xff]  }
 0x443   : > { %v14139_v10 = vld [vmem:[%s14539_s28 + $0x5d8] ss:$20 sps:$4 sm:$0xff]  }
 0x445   : > { %12018 = vmatpush3.bf16.msra.mxu0 %v14103_v48  ;;  %12040 = vmatpush3.bf16.msra.mxu1 %v14104_v50  ;;  %v14140_v48 = vld [vmem:[%s14539_s28 + $0x858] ss:$20 sps:$4 sm:$0xff]   ;;  %v14141_v50 = vld [vmem:[%s14539_s28 + $0x740] ss:$20 sps:$4 sm:$0xff]  }
 0x446   : > { %12019 = vmatprep.subr.bf16.mxu0 %v14105_v53  ;;  %12041 = vmatprep.subr.bf16.mxu1 %v14106_v63  ;;  %v14142_v53 = vld [vmem:[%s14539_s28 + $0x9c0] ss:$20 sps:$4 sm:$0xff]  }
 0x447   : > { %v14143_v63 = vld [vmem:[%s14539_s28 + $0x600] ss:$20 sps:$4 sm:$0xff]  }
 0x449   : > { %12020 = vmatpush3.bf16.msra.mxu0 %v14107_v56  ;;  %12042 = vmatpush3.bf16.msra.mxu1 %v14108_v57  ;;  %v14144_v56 = vld [vmem:[%s14539_s28 + $0x880] ss:$20 sps:$4 sm:$0xff]   ;;  %v14145_v57 = vld [vmem:[%s14539_s28 + $0x768] ss:$20 sps:$4 sm:$0xff]  }
 0x44a   : > { %12021 = vmatprep.subr.bf16.mxu0 %v14109_v58  ;;  %12043 = vmatprep.subr.bf16.mxu1 %v14110_v59  ;;  %v14146_v58 = vld [vmem:[%s14539_s28 + $0x9e8] ss:$20 sps:$4 sm:$0xff]  }
 0x44b   : > { %v14147_v59 = vld [vmem:[%s14539_s28 + $0x628] ss:$20 sps:$4 sm:$0xff]  }
 0x44d   : > { %12022 = vmatpush3.bf16.msra.mxu0 %v14111_v61  ;;  %12044 = vmatpush3.bf16.msra.mxu1 %v14112_v0  ;;  %v14148_v61 = vld [vmem:[%s14539_s28 + $0x8a8] ss:$20 sps:$4 sm:$0xff]   ;;  %v14149_v0 = vld [vmem:[%s14539_s28 + $0xb50] ss:$20 sps:$4 sm:$0xff]  }
 0x44e   : > { %12023 = vmatprep.subr.bf16.mxu0 %v14113_v1  ;;  %12045 = vmatprep.subr.bf16.mxu1 %v14114_v2  ;;  %v14150_v1 = vld [vmem:[%s14539_s28 + $0xdd0] ss:$20 sps:$4 sm:$0xff]  }
 0x44f   : > { %v14151_v2 = vld [vmem:[%s14539_s28 + $0xa10] ss:$20 sps:$4 sm:$0xff]  }
 0x451   : > { %12024 = vmatpush3.bf16.msra.mxu0 %v14115_v11  ;;  %12046 = vmatpush3.bf16.msra.mxu1 %v14116_v5  ;;  %v14152_v11 = vld [vmem:[%s14539_s28 + $0xc90] ss:$20 sps:$4 sm:$0xff]   ;;  %v14153_v5 = vld [vmem:[%s14539_s28 + $0xb78] ss:$20 sps:$4 sm:$0xff]  }
 0x452   : > { %12053 = vmatprep.subr.bf16.mxu0 %v14117_v7  ;;  %12075 = vmatprep.subr.bf16.mxu1 %v14118_v9  ;;  %v14154_v7 = vld [vmem:[%s14539_s28 + $0xdf8] ss:$20 sps:$4 sm:$0xff]  }
 0x453   : > { %v14155_v9 = vld [vmem:[%s14539_s28 + $0xa38] ss:$20 sps:$4 sm:$0xff]  }
 0x454   : > { %9990 = vmatmul.mubr.bf16.vlgmr.msra.gmra.mrb[4].mxu0 %v14634_v13  ;;  %10030 = vmatmul.mubr.bf16.vlgmr.msra.gmra.mrb[4].mxu1 %v14717_v23  ;;  %v14127_v13 = vld [vmem:[%s14539_s28 + $0x560] ss:$20 sps:$4 sm:$0xff]  }
 0x455   : > { %12054 = vmatpush3.bf16.msra.mxu0 %v14119_v12  ;;  %12076 = vmatpush3.bf16.msra.mxu1 %v14120_v22  ;;  %v14128_v23 = vld [vmem:[%s14539_s28 + $0x7e0] ss:$20 sps:$4 sm:$0xff]   ;;  %v14156_v12 = vld [vmem:[%s14539_s28 + $0xcb8] ss:$20 sps:$4 sm:$0xff]  }
 0x456   : > { %12055 = vmatprep.subr.bf16.mxu0 %v14121_v25  ;;  %12077 = vmatprep.subr.bf16.mxu1 %v14122_v20  ;;  %v14157_v22 = vld [vmem:[%s14539_s28 + $0xba0] ss:$20 sps:$4 sm:$0xff]   ;;  %v14161_v20 = vld [vmem:[%s14539_s28 + $0xbc8] ss:$20 sps:$4 sm:$0xff]  }
 0x457   : > { %10069 = vmatprep.mubr.bf16.mxu0 %v14723_v27  ;;  %10109 = vmatprep.mubr.bf16.mxu1 %v14799_v37  ;;  %v14132_v27 = vld [vmem:[%s14539_s28 + $0x808] ss:$20 sps:$4 sm:$0xff]   ;;  %v14133_v37 = vld [vmem:[%s14539_s28 + $0x6f0] ss:$20 sps:$4 sm:$0xff]   ;;  %v14158_v25 = vld [vmem:[%s14539_s28 + $0xe20] ss:$20 sps:$4 sm:$0xff]  }
 0x459   : > { %12056 = vmatpush3.bf16.msra.mxu0 %v14123_v49  ;;  %12078 = vmatpush3.bf16.msra.mxu1 %v14124_v4  ;;  %v14162_v49 = vld [vmem:[%s14539_s28 + $0xe48] ss:$20 sps:$4 sm:$0xff]  }
 0x45a   : > { %12057 = vmatprep.subr.bf16.mxu0 %v14125_v31  ;;  %12079 = vmatprep.subr.bf16.mxu1 %v14126_v35  ;;  %v14163_v4 = vld [vmem:[%s14539_s28 + $0xa88] ss:$20 sps:$4 sm:$0xff]   ;;  %v14166_v31 = vld [vmem:[%s14539_s28 + $0xe70] ss:$20 sps:$4 sm:$0xff]  }
 0x45b   : > { %v14167_v35 = vld [vmem:[%s14539_s28 + $0xab0] ss:$20 sps:$4 sm:$0xff]  }
 0x45d   : > { %12058 = vmatpush3.bf16.msra.mxu0 %v14127_v13  ;;  %12080 = vmatpush3.bf16.msra.mxu1 %v14128_v23  ;;  %v14168_v13 = vld [vmem:[%s14539_s28 + $0xd30] ss:$20 sps:$4 sm:$0xff]   ;;  %v14169_v23 = vld [vmem:[%s14539_s28 + $0xc18] ss:$20 sps:$4 sm:$0xff]  }
 0x45e   : > { %12059 = vmatprep.subr.bf16.mxu0 %v14129_v36  ;;  %12081 = vmatprep.subr.bf16.mxu1 %v14130_v38  ;;  %v14170_v36 = vld [vmem:[%s14539_s28 + $0xe98] ss:$20 sps:$4 sm:$0xff]  }
 0x45f   : > { %v14171_v38 = vld [vmem:[%s14539_s28 + $0xad8] ss:$20 sps:$4 sm:$0xff]  }
 0x461   : > { %12060 = vmatpush3.bf16.msra.mxu0 %v14131_v55  ;;  %12082 = vmatpush3.bf16.msra.mxu1 %v14132_v27  ;;  %v14172_v55 = vld [vmem:[%s14539_s28 + $0xd58] ss:$20 sps:$4 sm:$0xff]   ;;  %v14173_v27 = vld [vmem:[%s14539_s28 + $0xc40] ss:$20 sps:$4 sm:$0xff]  }
 0x462   : > { %12061 = vmatprep.subr.bf16.mxu0 %v14133_v37  ;;  %12083 = vmatprep.subr.bf16.mxu1 %v14134_v41  ;;  %v14174_v37 = vld [vmem:[%s14539_s28 + $0xec0] ss:$20 sps:$4 sm:$0xff]  }
 0x463   : > { %v14175_v41 = vld [vmem:[%s14539_s28 + $0xb00] ss:$20 sps:$4 sm:$0xff]  }
 0x465   : > { %12062 = vmatpush3.bf16.msra.mxu0 %v14135_v42  ;;  %12084 = vmatpush3.bf16.msra.mxu1 %v14136_v44  ;;  %v14176_v42 = vld [vmem:[%s14539_s28 + $0xd80] ss:$20 sps:$4 sm:$0xff]   ;;  %v14177_v44 = vld [vmem:[%s14539_s28 + $0xc68] ss:$20 sps:$4 sm:$0xff]  }
 0x466   : > { %12063 = vmatprep.subr.bf16.mxu0 %v14137_v60  ;;  %12085 = vmatprep.subr.bf16.mxu1 %v14138_v17  ;;  %v14178_v60 = vld [vmem:[%s14539_s28 + $0xee8] ss:$20 sps:$4 sm:$0xff]  }
 0x467   : > { %v14179_v17 = vld [vmem:[%s14539_s28 + $0xb28] ss:$20 sps:$4 sm:$0xff]  }
 0x469   : > { %12064 = vmatpush3.bf16.msra.mxu0 %v14139_v10  ;;  %12086 = vmatpush3.bf16.msra.mxu1 %v14140_v48  ;;  %v14180_v10 = vld [vmem:[%s14539_s28 + $0xda8] ss:$20 sps:$4 sm:$0xff]   ;;  %v14181_v48 = vld [vmem:[%s14539_s28 + $0x1050] ss:$20 sps:$4 sm:$0xff]  }
 0x46a   : > { %12065 = vmatprep.subr.bf16.mxu0 %v14141_v50  ;;  %12087 = vmatprep.subr.bf16.mxu1 %v14142_v53  ;;  %v14182_v50 = vld [vmem:[%s14539_s28 + $0x12d0] ss:$20 sps:$4 sm:$0xff]  }
 0x46b   : > { %v14183_v53 = vld [vmem:[%s14539_s28 + $0xf10] ss:$20 sps:$4 sm:$0xff]  }
 0x46d   : > { %12066 = vmatpush3.bf16.msra.mxu0 %v14143_v63  ;;  %12088 = vmatpush3.bf16.msra.mxu1 %v14144_v56  ;;  %v14184_v63 = vld [vmem:[%s14539_s28 + $0x1190] ss:$20 sps:$4 sm:$0xff]   ;;  %v14431_v56 = vmov 0.0  }
 0x46e   : > { %12067 = vmatprep.subr.bf16.mxu0 %v14145_v57  ;;  %12089 = vmatprep.subr.bf16.mxu1 %v14146_v58  ;;  %214 = vst [vmem:[%s15926_s5 + $0x8] sm:$0x3] %v14431_v56  ;;  %v14185_v57 = vld [vmem:[%s14539_s28 + $0x1078] ss:$20 sps:$4 sm:$0xff]  }
 0x46f   : > { %v14186_v58 = vld [vmem:[%s14539_s28 + $0x12f8] ss:$20 sps:$4 sm:$0xff]  }
 0x470   : > { %v14233_v56 = vld [vmem:[%s14539_s28 + $0x1618] ss:$20 sps:$4 sm:$0xff]  }
 0x471   : > { %12068 = vmatpush3.bf16.msra.mxu0 %v14147_v59  ;;  %12090 = vmatpush3.bf16.msra.mxu1 %v14148_v61  ;;  %v14187_v59 = vld [vmem:[%s14539_s28 + $0xf38] ss:$20 sps:$4 sm:$0xff]  }
 0x472   : > { %12097 = vmatprep.subr.bf16.mxu0 %v14149_v0  ;;  %12119 = vmatprep.subr.bf16.mxu1 %v14150_v1  ;;  %v14188_v61 = vld [vmem:[%s14539_s28 + $0x11b8] ss:$20 sps:$4 sm:$0xff]   ;;  %v14189_v0 = vld [vmem:[%s14539_s28 + $0x10a0] ss:$20 sps:$4 sm:$0xff]  }
 0x473   : > { %v14190_v1 = vld [vmem:[%s14539_s28 + $0x1320] ss:$20 sps:$4 sm:$0xff]  }
 0x474   : > { %10070 = vmatmul.mubr.bf16.vlgmr.msra.gmra.mrb[8].mxu0 %v14792_v33  ;;  %10110 = vmatmul.mubr.bf16.vlgmr.msra.gmra.mrb[8].mxu1 %v14872_v45  ;;  %v14159_v33 = vld [vmem:[%s14539_s28 + $0xa60] ss:$20 sps:$4 sm:$0xff]  }
 0x475   : > { %12098 = vmatpush3.bf16.msra.mxu0 %v14151_v2  ;;  %12120 = vmatpush3.bf16.msra.mxu1 %v14152_v11  ;;  %v14160_v45 = vld [vmem:[%s14539_s28 + $0xce0] ss:$20 sps:$4 sm:$0xff]   ;;  %v14193_v2 = vld [vmem:[%s14539_s28 + $0x10c8] ss:$20 sps:$4 sm:$0xff]  }
 0x476   : > { %12099 = vmatprep.subr.bf16.mxu0 %v14153_v5  ;;  %12121 = vmatprep.subr.bf16.mxu1 %v14154_v7  ;;  %v14194_v11 = vld [vmem:[%s14539_s28 + $0x1348] ss:$20 sps:$4 sm:$0xff]   ;;  %v14198_v7 = vld [vmem:[%s14539_s28 + $0x1370] ss:$20 sps:$4 sm:$0xff]  }
 0x477   : > { %10149 = vmatprep.mubr.bf16.mxu0 %v14879_v51  ;;  %10189 = vmatprep.mubr.bf16.mxu1 %v14955_v3  ;;  %v14164_v51 = vld [vmem:[%s14539_s28 + $0xd08] ss:$20 sps:$4 sm:$0xff]   ;;  %v14165_v3 = vld [vmem:[%s14539_s28 + $0xbf0] ss:$20 sps:$4 sm:$0xff]  }
 0x478   : > { %v14195_v5 = vld [vmem:[%s14539_s28 + $0xf88] ss:$20 sps:$4 sm:$0xff]  }
 0x479   : > { %12100 = vmatpush3.bf16.msra.mxu0 %v14155_v9  ;;  %12122 = vmatpush3.bf16.msra.mxu1 %v14156_v12  ;;  %v14199_v9 = vld [vmem:[%s14539_s28 + $0xfb0] ss:$20 sps:$4 sm:$0xff]  }
 0x47a   : > { %12101 = vmatprep.subr.bf16.mxu0 %v14157_v22  ;;  %12123 = vmatprep.subr.bf16.mxu1 %v14158_v25  ;;  %v14200_v12 = vld [vmem:[%s14539_s28 + $0x1230] ss:$20 sps:$4 sm:$0xff]   ;;  %v14201_v22 = vld [vmem:[%s14539_s28 + $0x1118] ss:$20 sps:$4 sm:$0xff]  }
 0x47b   : > { %v14202_v25 = vld [vmem:[%s14539_s28 + $0x1398] ss:$20 sps:$4 sm:$0xff]  }
 0x47d   : > { %12102 = vmatpush3.bf16.msra.mxu0 %v14159_v33  ;;  %12124 = vmatpush3.bf16.msra.mxu1 %v14160_v45  ;;  %v14203_v33 = vld [vmem:[%s14539_s28 + $0xfd8] ss:$20 sps:$4 sm:$0xff]  }
 0x47e   : > { %12103 = vmatprep.subr.bf16.mxu0 %v14161_v20  ;;  %12125 = vmatprep.subr.bf16.mxu1 %v14162_v49  ;;  %v14204_v45 = vld [vmem:[%s14539_s28 + $0x1258] ss:$20 sps:$4 sm:$0xff]   ;;  %v14205_v20 = vld [vmem:[%s14539_s28 + $0x1140] ss:$20 sps:$4 sm:$0xff]  }
 0x47f   : > { %v14206_v49 = vld [vmem:[%s14539_s28 + $0x13c0] ss:$20 sps:$4 sm:$0xff]  }
 0x481   : > { %12104 = vmatpush3.bf16.msra.mxu0 %v14163_v4  ;;  %12126 = vmatpush3.bf16.msra.mxu1 %v14164_v51  ;;  %v14207_v4 = vld [vmem:[%s14539_s28 + $0x1000] ss:$20 sps:$4 sm:$0xff]  }
 0x482   : > { %12105 = vmatprep.subr.bf16.mxu0 %v14165_v3  ;;  %12127 = vmatprep.subr.bf16.mxu1 %v14166_v31  ;;  %v14208_v51 = vld [vmem:[%s14539_s28 + $0x1280] ss:$20 sps:$4 sm:$0xff]   ;;  %v14209_v3 = vld [vmem:[%s14539_s28 + $0x1168] ss:$20 sps:$4 sm:$0xff]  }
 0x483   : > { %v14210_v31 = vld [vmem:[%s14539_s28 + $0x13e8] ss:$20 sps:$4 sm:$0xff]  }
 0x485   : > { %12106 = vmatpush3.bf16.msra.mxu0 %v14167_v35  ;;  %12128 = vmatpush3.bf16.msra.mxu1 %v14168_v13  ;;  %v14211_v35 = vld [vmem:[%s14539_s28 + $0x1028] ss:$20 sps:$4 sm:$0xff]  }
 0x486   : > { %12107 = vmatprep.subr.bf16.mxu0 %v14169_v23  ;;  %12129 = vmatprep.subr.bf16.mxu1 %v14170_v36  ;;  %v14212_v13 = vld [vmem:[%s14539_s28 + $0x12a8] ss:$20 sps:$4 sm:$0xff]   ;;  %v14213_v23 = vld [vmem:[%s14539_s28 + $0x1550] ss:$20 sps:$4 sm:$0xff]  }
 0x487   : > { %v14214_v36 = vld [vmem:[%s14539_s28 + $0x17d0] ss:$20 sps:$4 sm:$0xff]  }
 0x489   : > { %12108 = vmatpush3.bf16.msra.mxu0 %v14171_v38  ;;  %12130 = vmatpush3.bf16.msra.mxu1 %v14172_v55  ;;  %v14215_v38 = vld [vmem:[%s14539_s28 + $0x1410] ss:$20 sps:$4 sm:$0xff]  }
 0x48a   : > { %12109 = vmatprep.subr.bf16.mxu0 %v14173_v27  ;;  %12131 = vmatprep.subr.bf16.mxu1 %v14174_v37  ;;  %v14216_v55 = vld [vmem:[%s14539_s28 + $0x1690] ss:$20 sps:$4 sm:$0xff]   ;;  %v14217_v27 = vld [vmem:[%s14539_s28 + $0x1578] ss:$20 sps:$4 sm:$0xff]  }
 0x48b   : > { %v14218_v37 = vld [vmem:[%s14539_s28 + $0x17f8] ss:$20 sps:$4 sm:$0xff]  }
 0x48d   : > { %12110 = vmatpush3.bf16.msra.mxu0 %v14175_v41  ;;  %12132 = vmatpush3.bf16.msra.mxu1 %v14176_v42  ;;  %v14219_v41 = vld [vmem:[%s14539_s28 + $0x1438] ss:$20 sps:$4 sm:$0xff]  }
 0x48e   : > { %12111 = vmatprep.subr.bf16.mxu0 %v14177_v44  ;;  %12133 = vmatprep.subr.bf16.mxu1 %v14178_v60  ;;  %v14220_v42 = vld [vmem:[%s14539_s28 + $0x16b8] ss:$20 sps:$4 sm:$0xff]   ;;  %v14221_v44 = vld [vmem:[%s14539_s28 + $0x15a0] ss:$20 sps:$4 sm:$0xff]  }
 0x48f   : > { %v14222_v60 = vld [vmem:[%s14539_s28 + $0x1820] ss:$20 sps:$4 sm:$0xff]  }
 0x491   : > { %12112 = vmatpush3.bf16.msra.mxu0 %v14179_v17  ;;  %12134 = vmatpush3.bf16.msra.mxu1 %v14180_v10  ;;  %v14225_v17 = vld [vmem:[%s14539_s28 + $0x15c8] ss:$20 sps:$4 sm:$0xff]  }
 0x492   : > { %12141 = vmatprep.subr.bf16.mxu0 %v14181_v48  ;;  %12163 = vmatprep.subr.bf16.mxu1 %v14182_v50  ;;  %v14226_v10 = vld [vmem:[%s14539_s28 + $0x1848] ss:$20 sps:$4 sm:$0xff]   ;;  %v14230_v50 = vld [vmem:[%s14539_s28 + $0x1870] ss:$20 sps:$4 sm:$0xff]  }
 0x493   : > { %v14227_v48 = vld [vmem:[%s14539_s28 + $0x1488] ss:$20 sps:$4 sm:$0xff]  }
 0x494   : > { %10150 = vmatmul.mubr.bf16.vlgmr.msra.gmra.mrb[12].mxu0 %v14947_v62  ;;  %10190 = vmatmul.mubr.bf16.vlgmr.msra.gmra.mrb[12].mxu1 %v15029_v52  ;;  %v14191_v62 = vld [vmem:[%s14539_s28 + $0xf60] ss:$20 sps:$4 sm:$0xff]  }
 0x495   : > { %12142 = vmatpush3.bf16.msra.mxu0 %v14183_v53  ;;  %12164 = vmatpush3.bf16.msra.mxu1 %v14184_v63  ;;  %v14192_v52 = vld [vmem:[%s14539_s28 + $0x11e0] ss:$20 sps:$4 sm:$0xff]   ;;  %v14231_v53 = vld [vmem:[%s14539_s28 + $0x14b0] ss:$20 sps:$4 sm:$0xff]  }
 0x496   : > { %12143 = vmatprep.subr.bf16.mxu0 %v14185_v57  ;;  %12165 = vmatprep.subr.bf16.mxu1 %v14186_v58  ;;  %v14232_v63 = vld [vmem:[%s14539_s28 + $0x1730] ss:$20 sps:$4 sm:$0xff]   ;;  %v14234_v57 = vld [vmem:[%s14539_s28 + $0x1898] ss:$20 sps:$4 sm:$0xff]  }
 0x497   : > { %10229 = vmatprep.mubr.bf16.mxu0 %v15036_v24  ;;  %10269 = vmatprep.mubr.bf16.mxu1 %v15112_v47  ;;  %v14196_v24 = vld [vmem:[%s14539_s28 + $0x1208] ss:$20 sps:$4 sm:$0xff]   ;;  %v14197_v47 = vld [vmem:[%s14539_s28 + $0x10f0] ss:$20 sps:$4 sm:$0xff]   ;;  %v14235_v58 = vld [vmem:[%s14539_s28 + $0x14d8] ss:$20 sps:$4 sm:$0xff]  }
 0x499   : > { %12144 = vmatpush3.bf16.msra.mxu0 %v14187_v59  ;;  %12166 = vmatpush3.bf16.msra.mxu1 %v14188_v61  ;;  %v14236_v59 = vld [vmem:[%s14539_s28 + $0x1758] ss:$20 sps:$4 sm:$0xff]   ;;  %v14237_v61 = vld [vmem:[%s14539_s28 + $0x1640] ss:$20 sps:$4 sm:$0xff]  }
 0x49a   : > { %12145 = vmatprep.subr.bf16.mxu0 %v14189_v0  ;;  %12167 = vmatprep.subr.bf16.mxu1 %v14190_v1  ;;  %v14238_v0 = vld [vmem:[%s14539_s28 + $0x18c0] ss:$20 sps:$4 sm:$0xff]  }
 0x49b   : > { %v14239_v1 = vld [vmem:[%s14539_s28 + $0x1500] ss:$20 sps:$4 sm:$0xff]  }
 0x49d   : > { %12146 = vmatpush3.bf16.msra.mxu0 %v14191_v62  ;;  %12168 = vmatpush3.bf16.msra.mxu1 %v14192_v52  ;;  %v14240_v62 = vld [vmem:[%s14539_s28 + $0x1780] ss:$20 sps:$4 sm:$0xff]   ;;  %v14241_v52 = vld [vmem:[%s14539_s28 + $0x1668] ss:$20 sps:$4 sm:$0xff]  }
 0x49e   : > { %12147 = vmatprep.subr.bf16.mxu0 %v14193_v2  ;;  %12169 = vmatprep.subr.bf16.mxu1 %v14194_v11  ;;  %v14242_v2 = vld [vmem:[%s14539_s28 + $0x18e8] ss:$20 sps:$4 sm:$0xff]  }
 0x49f   : > { %v14243_v11 = vld [vmem:[%s14539_s28 + $0x1528] ss:$20 sps:$4 sm:$0xff]  }
 0x4a1   : > { %12148 = vmatpush3.bf16.msra.mxu0 %v14195_v5  ;;  %12170 = vmatpush3.bf16.msra.mxu1 %v14196_v24  ;;  %v14244_v5 = vld [vmem:[%s14539_s28 + $0x17a8] ss:$20 sps:$4 sm:$0xff]   ;;  %v14245_v24 = vld [vmem:[%s14539_s28 + $0x1a50] ss:$20 sps:$4 sm:$0xff]  }
 0x4a2   : > { %12149 = vmatprep.subr.bf16.mxu0 %v14197_v47  ;;  %12171 = vmatprep.subr.bf16.mxu1 %v14198_v7  ;;  %v14246_v47 = vld [vmem:[%s14539_s28 + $0x1cd0] ss:$20 sps:$4 sm:$0xff]  }
 0x4a3   : > { %v14247_v7 = vld [vmem:[%s14539_s28 + $0x1910] ss:$20 sps:$4 sm:$0xff]  }
 0x4a5   : > { %12150 = vmatpush3.bf16.msra.mxu0 %v14199_v9  ;;  %12172 = vmatpush3.bf16.msra.mxu1 %v14200_v12  ;;  %v14248_v9 = vld [vmem:[%s14539_s28 + $0x1b90] ss:$20 sps:$4 sm:$0xff]   ;;  %v14249_v12 = vld [vmem:[%s14539_s28 + $0x1a78] ss:$20 sps:$4 sm:$0xff]  }
 0x4a6   : > { %12151 = vmatprep.subr.bf16.mxu0 %v14201_v22  ;;  %12173 = vmatprep.subr.bf16.mxu1 %v14202_v25  ;;  %v14250_v22 = vld [vmem:[%s14539_s28 + $0x1cf8] ss:$20 sps:$4 sm:$0xff]  }
 0x4a7   : > { %v14251_v25 = vld [vmem:[%s14539_s28 + $0x1938] ss:$20 sps:$4 sm:$0xff]  }
 0x4a9   : > { %12152 = vmatpush3.bf16.msra.mxu0 %v14203_v33  ;;  %12174 = vmatpush3.bf16.msra.mxu1 %v14204_v45  ;;  %v14252_v33 = vld [vmem:[%s14539_s28 + $0x1bb8] ss:$20 sps:$4 sm:$0xff]   ;;  %v14253_v45 = vld [vmem:[%s14539_s28 + $0x1aa0] ss:$20 sps:$4 sm:$0xff]  }
 0x4aa   : > { %12153 = vmatprep.subr.bf16.mxu0 %v14205_v20  ;;  %12175 = vmatprep.subr.bf16.mxu1 %v14206_v49  ;;  %v14254_v20 = vld [vmem:[%s14539_s28 + $0x1d20] ss:$20 sps:$4 sm:$0xff]   ;;  %v14257_v49 = vld [vmem:[%s14539_s28 + $0x1ac8] ss:$20 sps:$4 sm:$0xff]  }
 0x4ad   : > { %12154 = vmatpush3.bf16.msra.mxu0 %v14207_v4  ;;  %12176 = vmatpush3.bf16.msra.mxu1 %v14208_v51  ;;  %v14258_v4 = vld [vmem:[%s14539_s28 + $0x1d48] ss:$20 sps:$4 sm:$0xff]  }
 0x4ae   : > { %12155 = vmatprep.subr.bf16.mxu0 %v14209_v3  ;;  %12177 = vmatprep.subr.bf16.mxu1 %v14210_v31  ;;  %v14259_v51 = vld [vmem:[%s14539_s28 + $0x1988] ss:$20 sps:$4 sm:$0xff]   ;;  %v14262_v3 = vld [vmem:[%s14539_s28 + $0x1d70] ss:$20 sps:$4 sm:$0xff]  }
 0x4af   : > { %v14263_v31 = vld [vmem:[%s14539_s28 + $0x19b0] ss:$20 sps:$4 sm:$0xff]  }
 0x4b1   : > { %12156 = vmatpush3.bf16.msra.mxu0 %v14211_v35  ;;  %12178 = vmatpush3.bf16.msra.mxu1 %v14212_v13  ;;  %v14264_v35 = vld [vmem:[%s14539_s28 + $0x1c30] ss:$20 sps:$4 sm:$0xff]   ;;  %v14265_v13 = vld [vmem:[%s14539_s28 + $0x1b18] ss:$20 sps:$4 sm:$0xff]  }
 0x4b2   : > { %12185 = vmatprep.subr.bf16.mxu0 %v14213_v23  ;;  %12207 = vmatprep.subr.bf16.mxu1 %v14214_v36  ;;  %v14266_v23 = vld [vmem:[%s14539_s28 + $0x1d98] ss:$20 sps:$4 sm:$0xff]  }
 0x4b3   : > { %v14267_v36 = vld [vmem:[%s14539_s28 + $0x19d8] ss:$20 sps:$4 sm:$0xff]  }
 0x4b4   : > { %10230 = vmatmul.mubr.bf16.vlgmr.msra.gmra.mrb[16].mxu0 %v15104_v40  ;;  %10270 = vmatmul.mubr.bf16.vlgmr.msra.gmra.mrb[16].mxu1 %v15185_v34  ;;  %v14223_v40 = vld [vmem:[%s14539_s28 + $0x1460] ss:$20 sps:$4 sm:$0xff]  }
 0x4b5   : > { %12186 = vmatpush3.bf16.msra.mxu0 %v14215_v38  ;;  %12208 = vmatpush3.bf16.msra.mxu1 %v14216_v55  ;;  %v14224_v34 = vld [vmem:[%s14539_s28 + $0x16e0] ss:$20 sps:$4 sm:$0xff]   ;;  %v14268_v38 = vld [vmem:[%s14539_s28 + $0x1c58] ss:$20 sps:$4 sm:$0xff]  }
 0x4b6   : > { %12187 = vmatprep.subr.bf16.mxu0 %v14217_v27  ;;  %12209 = vmatprep.subr.bf16.mxu1 %v14218_v37  ;;  %v14269_v55 = vld [vmem:[%s14539_s28 + $0x1b40] ss:$20 sps:$4 sm:$0xff]  }
 0x4b7   : > { %10309 = vmatprep.mubr.bf16.mxu0 %v15192_v8  ;;  %10349 = vmatprep.mubr.bf16.mxu1 %v15268_v39  ;;  %v14228_v8 = vld [vmem:[%s14539_s28 + $0x1708] ss:$20 sps:$4 sm:$0xff]   ;;  %v14229_v39 = vld [vmem:[%s14539_s28 + $0x15f0] ss:$20 sps:$4 sm:$0xff]   ;;  %v14270_v27 = vld [vmem:[%s14539_s28 + $0x1dc0] ss:$20 sps:$4 sm:$0xff]  }
 0x4b8   : > { %v14271_v37 = vld [vmem:[%s14539_s28 + $0x1a00] ss:$20 sps:$4 sm:$0xff]  }
 0x4b9   : > { %12188 = vmatpush3.bf16.msra.mxu0 %v14219_v41  ;;  %12210 = vmatpush3.bf16.msra.mxu1 %v14220_v42  ;;  %v14272_v41 = vld [vmem:[%s14539_s28 + $0x1c80] ss:$20 sps:$4 sm:$0xff]   ;;  %v14273_v42 = vld [vmem:[%s14539_s28 + $0x1b68] ss:$20 sps:$4 sm:$0xff]  }
 0x4ba   : > { %12189 = vmatprep.subr.bf16.mxu0 %v14221_v44  ;;  %12211 = vmatprep.subr.bf16.mxu1 %v14222_v60  ;;  %v14274_v44 = vld [vmem:[%s14539_s28 + $0x1de8] ss:$20 sps:$4 sm:$0xff]  }
 0x4bb   : > { %v14275_v60 = vld [vmem:[%s14539_s28 + $0x1a28] ss:$20 sps:$4 sm:$0xff]  }
 0x4bd   : > { %12190 = vmatpush3.bf16.msra.mxu0 %v14223_v40  ;;  %12212 = vmatpush3.bf16.msra.mxu1 %v14224_v34  ;;  %v14276_v40 = vld [vmem:[%s14539_s28 + $0x1ca8] ss:$20 sps:$4 sm:$0xff]   ;;  %v14277_v34 = vld [vmem:[%s14539_s28 + $0x1f50] ss:$20 sps:$4 sm:$0xff]  }
 0x4be   : > { %12191 = vmatprep.subr.bf16.mxu0 %v14225_v17  ;;  %12213 = vmatprep.subr.bf16.mxu1 %v14226_v10  ;;  %v14278_v17 = vld [vmem:[%s14539_s28 + $0x21d0] ss:$20 sps:$4 sm:$0xff]  }
 0x4bf   : > { %v14279_v10 = vld [vmem:[%s14539_s28 + $0x1e10] ss:$20 sps:$4 sm:$0xff]  }
 0x4c1   : > { %12192 = vmatpush3.bf16.msra.mxu0 %v14227_v48  ;;  %12214 = vmatpush3.bf16.msra.mxu1 %v14228_v8  ;;  %v14280_v48 = vld [vmem:[%s14539_s28 + $0x2090] ss:$20 sps:$4 sm:$0xff]   ;;  %v14281_v8 = vld [vmem:[%s14539_s28 + $0x1f78] ss:$20 sps:$4 sm:$0xff]  }
 0x4c2   : > { %12193 = vmatprep.subr.bf16.mxu0 %v14229_v39  ;;  %12215 = vmatprep.subr.bf16.mxu1 %v14230_v50  ;;  %v14282_v39 = vld [vmem:[%s14539_s28 + $0x21f8] ss:$20 sps:$4 sm:$0xff]  }
 0x4c3   : > { %v14283_v50 = vld [vmem:[%s14539_s28 + $0x1e38] ss:$20 sps:$4 sm:$0xff]  }
 0x4c5   : > { %12194 = vmatpush3.bf16.msra.mxu0 %v14231_v53  ;;  %12216 = vmatpush3.bf16.msra.mxu1 %v14232_v63  ;;  %v14284_v53 = vld [vmem:[%s14539_s28 + $0x20b8] ss:$20 sps:$4 sm:$0xff]   ;;  %v14285_v63 = vld [vmem:[%s14539_s28 + $0x1fa0] ss:$20 sps:$4 sm:$0xff]  }
 0x4c6   : > { %12195 = vmatprep.subr.bf16.mxu0 %v14233_v56  ;;  %12217 = vmatprep.subr.bf16.mxu1 %v14234_v57  ;;  %v14286_v56 = vld [vmem:[%s14539_s28 + $0x2220] ss:$20 sps:$4 sm:$0xff]   ;;  %v14289_v57 = vld [vmem:[%s14539_s28 + $0x1fc8] ss:$20 sps:$4 sm:$0xff]  }
 0x4c9   : > { %12196 = vmatpush3.bf16.msra.mxu0 %v14235_v58  ;;  %12218 = vmatpush3.bf16.msra.mxu1 %v14236_v59  ;;  %v14290_v58 = vld [vmem:[%s14539_s28 + $0x2248] ss:$20 sps:$4 sm:$0xff]  }
 0x4ca   : > { %12197 = vmatprep.subr.bf16.mxu0 %v14237_v61  ;;  %12219 = vmatprep.subr.bf16.mxu1 %v14238_v0  ;;  %v14291_v59 = vld [vmem:[%s14539_s28 + $0x1e88] ss:$20 sps:$4 sm:$0xff]   ;;  %v14294_v61 = vld [vmem:[%s14539_s28 + $0x2270] ss:$20 sps:$4 sm:$0xff]   ;;  %v14432_v0 = vmov 1983009808  }
 0x4cd   : > { %12198 = vmatpush3.bf16.msra.mxu0 %v14239_v1  ;;  %12220 = vmatpush3.bf16.msra.mxu1 %v14240_v62  ;;  %v10605_v1 = vunpack.c.l.s4 %v14432_v0  ;;  %v14295_v62 = vld [vmem:[%s14539_s28 + $0x1eb0] ss:$20 sps:$4 sm:$0xff]  }
 0x4ce   : > { %12199 = vmatprep.subr.bf16.mxu0 %v14241_v52  ;;  %12221 = vmatprep.subr.bf16.mxu1 %v14242_v2  ;;  %v14296_v52 = vld [vmem:[%s14539_s28 + $0x2130] ss:$20 sps:$4 sm:$0xff]   ;;  %v14297_v2 = vld [vmem:[%s14539_s28 + $0x2018] ss:$20 sps:$4 sm:$0xff]  }
 0x4d1   : > { %12200 = vmatpush3.bf16.msra.mxu0 %v14243_v11  ;;  %12222 = vmatpush3.bf16.msra.mxu1 %v14244_v5  ;;  %v14298_v11 = vld [vmem:[%s14539_s28 + $0x2298] ss:$20 sps:$4 sm:$0xff]   ;;  %v10606_v5 = vunpack.c.0.s8 %v10605_v1 }
 0x4d2   : > { %12229 = vmatprep.subr.bf16.mxu0 %v14245_v24  ;;  %12251 = vmatprep.subr.bf16.mxu1 %v14246_v47  ;;  %v14299_v24 = vld [vmem:[%s14539_s28 + $0x1ed8] ss:$20 sps:$4 sm:$0xff]  }
 0x4d3   : > { %v14300_v47 = vld [vmem:[%s14539_s28 + $0x2158] ss:$20 sps:$4 sm:$0xff]  }
 0x4d4   : > { %10310 = vmatmul.mubr.bf16.vlgmr.msra.gmra.mrb[20].mxu0 %v15260_v32  ;;  %10350 = vmatmul.mubr.bf16.vlgmr.msra.gmra.mrb[20].mxu1 %v15342_v6  ;;  %v14255_v32 = vld [vmem:[%s14539_s28 + $0x1960] ss:$20 sps:$4 sm:$0xff]  }
 0x4d5   : > { %12230 = vmatpush3.bf16.msra.mxu0 %v14247_v7  ;;  %12252 = vmatpush3.bf16.msra.mxu1 %v14248_v9  ;;  %v14256_v6 = vld [vmem:[%s14539_s28 + $0x1be0] ss:$20 sps:$4 sm:$0xff]  }
 0x4d6   : > { %12231 = vmatprep.subr.bf16.mxu0 %v14249_v12  ;;  %12253 = vmatprep.subr.bf16.mxu1 %v14250_v22  ;;  %v14301_v7 = vld [vmem:[%s14539_s28 + $0x2040] ss:$20 sps:$4 sm:$0xff]  }
 0x4d7   : > { %10389 = vmatprep.mubr.bf16.mxu0 %v15349_v14  ;;  %10429 = vmatprep.mubr.bf16.mxu1 %v15425_v54  ;;  %v14260_v14 = vld [vmem:[%s14539_s28 + $0x1c08] ss:$20 sps:$4 sm:$0xff]   ;;  %v14261_v54 = vld [vmem:[%s14539_s28 + $0x1af0] ss:$20 sps:$4 sm:$0xff]   ;;  %v14302_v9 = vld [vmem:[%s14539_s28 + $0x22c0] ss:$20 sps:$4 sm:$0xff]  }
 0x4d9   : > { %12232 = vmatpush3.bf16.msra.mxu0 %v14251_v25  ;;  %12254 = vmatpush3.bf16.msra.mxu1 %v14252_v33  ;;  %v16066_v25 = vsub.s32 %v10606_v5, %v14585_v43  ;;  %v14305_v43 = vld [vmem:[%s14539_s28 + $0x2068] ss:$20 sps:$4 sm:$0xff]  }
 0x4da   : > { %12233 = vmatprep.subr.bf16.mxu0 %v14253_v45  ;;  %12255 = vmatprep.subr.bf16.mxu1 %v14254_v20 }
 0x4dd   : > { %12234 = vmatpush3.bf16.msra.mxu0 %v14255_v32  ;;  %12256 = vmatpush3.bf16.msra.mxu1 %v14256_v6 }
 0x4de   : > { %12235 = vmatprep.subr.bf16.mxu0 %v14257_v49  ;;  %12257 = vmatprep.subr.bf16.mxu1 %v14258_v4  ;;  %v14303_v4 = vld [vmem:[%s14539_s28 + $0x1f00] ss:$20 sps:$4 sm:$0xff]  }
 0x4e1   : > { %12236 = vmatpush3.bf16.msra.mxu0 %v14259_v51  ;;  %12258 = vmatpush3.bf16.msra.mxu1 %v14260_v14  ;;  %v14304_v51 = vld [vmem:[%s14539_s28 + $0x2180] ss:$20 sps:$4 sm:$0xff]  }
 0x4e2   : > { %12237 = vmatprep.subr.bf16.mxu0 %v14261_v54  ;;  %12259 = vmatprep.subr.bf16.mxu1 %v14262_v3  ;;  %v14306_v3 = vld [vmem:[%s14539_s28 + $0x22e8] ss:$20 sps:$4 sm:$0xff]  }
 0x4e5   : > { %12238 = vmatpush3.bf16.msra.mxu0 %v14263_v31  ;;  %12260 = vmatpush3.bf16.msra.mxu1 %v14264_v35 }
 0x4e6   : > { %12239 = vmatprep.subr.bf16.mxu0 %v14265_v13  ;;  %12261 = vmatprep.subr.bf16.mxu1 %v14266_v23  ;;  %v14307_v23 = vld [vmem:[%s14539_s28 + $0x1f28] ss:$20 sps:$4 sm:$0xff]  }
 0x4e9   : > { %12240 = vmatpush3.bf16.msra.mxu0 %v14267_v36  ;;  %12262 = vmatpush3.bf16.msra.mxu1 %v14268_v38  ;;  %v14308_v36 = vld [vmem:[%s14539_s28 + $0x21a8] ss:$20 sps:$4 sm:$0xff]   ;;  %v14309_v38 = vld [vmem:[%s14539_s28 + $0x2450] ss:$20 sps:$4 sm:$0xff]  }
 0x4ea   : > { %12241 = vmatprep.subr.bf16.mxu0 %v14269_v55  ;;  %12263 = vmatprep.subr.bf16.mxu1 %v14270_v27  ;;  %v14310_v55 = vld [vmem:[%s14539_s28 + $0x26d0] ss:$20 sps:$4 sm:$0xff]  }
 0x4eb   : > { %v14311_v27 = vld [vmem:[%s14539_s28 + $0x2310] ss:$20 sps:$4 sm:$0xff]  }
 0x4ed   : > { %12242 = vmatpush3.bf16.msra.mxu0 %v14271_v37  ;;  %12264 = vmatpush3.bf16.msra.mxu1 %v14272_v41  ;;  %v14312_v37 = vld [vmem:[%s14539_s28 + $0x2590] ss:$20 sps:$4 sm:$0xff]   ;;  %v14313_v41 = vld [vmem:[%s14539_s28 + $0x2478] ss:$20 sps:$4 sm:$0xff]  }
 0x4ee   : > { %12243 = vmatprep.subr.bf16.mxu0 %v14273_v42  ;;  %12265 = vmatprep.subr.bf16.mxu1 %v14274_v44  ;;  %v14314_v42 = vld [vmem:[%s14539_s28 + $0x26f8] ss:$20 sps:$4 sm:$0xff]  }
 0x4ef   : > { %v14315_v44 = vld [vmem:[%s14539_s28 + $0x2338] ss:$20 sps:$4 sm:$0xff]  }
 0x4f1   : > { %12244 = vmatpush3.bf16.msra.mxu0 %v14275_v60  ;;  %12266 = vmatpush3.bf16.msra.mxu1 %v14276_v40  ;;  %v14316_v60 = vld [vmem:[%s14539_s28 + $0x25b8] ss:$20 sps:$4 sm:$0xff]   ;;  %v14317_v40 = vld [vmem:[%s14539_s28 + $0x24a0] ss:$20 sps:$4 sm:$0xff]  }
 0x4f2   : > { %12273 = vmatprep.subr.bf16.mxu0 %v14277_v34  ;;  %12295 = vmatprep.subr.bf16.mxu1 %v14278_v17  ;;  %v14318_v34 = vld [vmem:[%s14539_s28 + $0x2720] ss:$20 sps:$4 sm:$0xff]   ;;  %v14321_v17 = vld [vmem:[%s14539_s28 + $0x24c8] ss:$20 sps:$4 sm:$0xff]  }
 0x4f4   : > { %10390 = vmatmul.mubr.bf16.vlgmr.msra.gmra.mrb[24].mxu0 %v15417_v46  ;;  %10430 = vmatmul.mubr.bf16.vlgmr.msra.gmra.mrb[24].mxu1 %v15502_v29  ;;  %v14287_v46 = vld [vmem:[%s14539_s28 + $0x1e60] ss:$20 sps:$4 sm:$0xff]  }
 0x4f5   : > { %12274 = vmatpush3.bf16.msra.mxu0 %v14279_v10  ;;  %12296 = vmatpush3.bf16.msra.mxu1 %v14280_v48  ;;  %v14288_v29 = vld [vmem:[%s14539_s28 + $0x20e0] ss:$20 sps:$4 sm:$0xff]   ;;  %v14322_v10 = vld [vmem:[%s14539_s28 + $0x2748] ss:$20 sps:$4 sm:$0xff]  }
 0x4f6   : > { %12275 = vmatprep.subr.bf16.mxu0 %v14281_v8  ;;  %12297 = vmatprep.subr.bf16.mxu1 %v14282_v39  ;;  %v14323_v48 = vld [vmem:[%s14539_s28 + $0x2388] ss:$20 sps:$4 sm:$0xff]   ;;  %v14326_v8 = vld [vmem:[%s14539_s28 + $0x2770] ss:$20 sps:$4 sm:$0xff]  }
 0x4f7   : > { %10469 = vmatprep.mubr.bf16.mxu0 %v15509_v16  ;;  %10509 = vmatprep.mubr.bf16.mxu1 %v15585_v28  ;;  %v14292_v16 = vld [vmem:[%s14539_s28 + $0x2108] ss:$20 sps:$4 sm:$0xff]   ;;  %v14293_v28 = vld [vmem:[%s14539_s28 + $0x1ff0] ss:$20 sps:$4 sm:$0xff]  }
 0x4f8   : > { %v14327_v39 = vld [vmem:[%s14539_s28 + $0x23b0] ss:$20 sps:$4 sm:$0xff]  }
 0x4f9   : > { %12276 = vmatpush3.bf16.msra.mxu0 %v14283_v50  ;;  %12298 = vmatpush3.bf16.msra.mxu1 %v14284_v53  ;;  %v14328_v50 = vld [vmem:[%s14539_s28 + $0x2630] ss:$20 sps:$4 sm:$0xff]   ;;  %v14329_v53 = vld [vmem:[%s14539_s28 + $0x2518] ss:$20 sps:$4 sm:$0xff]  }
 0x4fa   : > { %12277 = vmatprep.subr.bf16.mxu0 %v14285_v63  ;;  %12299 = vmatprep.subr.bf16.mxu1 %v14286_v56  ;;  %v14330_v63 = vld [vmem:[%s14539_s28 + $0x2798] ss:$20 sps:$4 sm:$0xff]  }
 0x4fb   : > { %v14331_v56 = vld [vmem:[%s14539_s28 + $0x23d8] ss:$20 sps:$4 sm:$0xff]  }
 0x4fd   : > { %12278 = vmatpush3.bf16.msra.mxu0 %v14287_v46  ;;  %12300 = vmatpush3.bf16.msra.mxu1 %v14288_v29  ;;  %v14332_v46 = vld [vmem:[%s14539_s28 + $0x2658] ss:$20 sps:$4 sm:$0xff]   ;;  %v14333_v29 = vld [vmem:[%s14539_s28 + $0x2540] ss:$20 sps:$4 sm:$0xff]  }
 0x4fe   : > { %12279 = vmatprep.subr.bf16.mxu0 %v14289_v57  ;;  %12301 = vmatprep.subr.bf16.mxu1 %v14290_v58  ;;  %v14334_v57 = vld [vmem:[%s14539_s28 + $0x27c0] ss:$20 sps:$4 sm:$0xff]  }
 0x501   : > { %12280 = vmatpush3.bf16.msra.mxu0 %v14291_v59  ;;  %12302 = vmatpush3.bf16.msra.mxu1 %v14292_v16 }
 0x502   : > { %12281 = vmatprep.subr.bf16.mxu0 %v14293_v28  ;;  %12303 = vmatprep.subr.bf16.mxu1 %v14294_v61 }
 0x505   : > { %12282 = vmatpush3.bf16.msra.mxu0 %v14295_v62  ;;  %12304 = vmatpush3.bf16.msra.mxu1 %v14296_v52  ;;  %v14335_v52 = vld [vmem:[%s14539_s28 + $0x2400] ss:$20 sps:$4 sm:$0xff]  }
 0x506   : > { %12283 = vmatprep.subr.bf16.mxu0 %v14297_v2  ;;  %12305 = vmatprep.subr.bf16.mxu1 %v14298_v11  ;;  %v14336_v2 = vld [vmem:[%s14539_s28 + $0x2680] ss:$20 sps:$4 sm:$0xff]  }
 0x507   : > { %v9294_v12 = vpop.f32.mrb[0].mxu0  ;;  %v9950_v22 = vpop.f32.mrb[0].mxu1 }
 0x508   : > { %v9296_v33 = vpop.f32.mrb[1].mxu0  ;;  %v9952_v45 = vpop.f32.mrb[1].mxu1 }
 0x509   : > { %v10602_v20 = vcombine.low %v9294_v12, %v9296_v33  ;;  %v10603_v32 = vcombine.low %v9950_v22, %v9952_v45  ;;  %v9298_v6 = vpop.f32.mrb[2].mxu0  ;;  %v9954_v49 = vpop.f32.mrb[2].mxu1  ;;  %12284 = vmatpush3.bf16.msra.mxu0 %v14299_v24  ;;  %12306 = vmatpush3.bf16.msra.mxu1 %v14300_v47  ;;  %v14337_v24 = vld [vmem:[%s14539_s28 + $0x2568] ss:$20 sps:$4 sm:$0xff]  }
 0x50a   : > { %v9299_v14 = vpop.f32.mrb[3].mxu0  ;;  %v9955_v54 = vpop.f32.mrb[3].mxu1  ;;  %12285 = vmatprep.subr.bf16.mxu0 %v14301_v7  ;;  %12307 = vmatprep.subr.bf16.mxu1 %v14302_v9  ;;  %v14338_v47 = vld [vmem:[%s14539_s28 + $0x27e8] ss:$20 sps:$4 sm:$0xff]  }
 0x50b   : > { %v10610_v31 = vrot.slane %v10602_v20, %v16066_v25  ;;  %v10617_v35 = vrot.slane %v10603_v32, %v16066_v25  ;;  %v14339_v9 = vld [vmem:[%s14539_s28 + $0x2428] ss:$20 sps:$4 sm:$0xff]  }
 0x50c   : > { %v14340_v12 = vld [vmem:[%s14539_s28 + $0x26a8] ss:$20 sps:$4 sm:$0xff]  }
 0x50d   : > { %v10618_v13 = vcombine.low %v10610_v31, %v10617_v35  ;;  %12286 = vmatpush3.bf16.msra.mxu0 %v14303_v4  ;;  %12308 = vmatpush3.bf16.msra.mxu1 %v14304_v51 }
 0x50e   : > { %12287 = vmatprep.subr.bf16.mxu0 %v14305_v43  ;;  %12309 = vmatprep.subr.bf16.mxu1 %v14306_v3 }
 0x50f   : > { %10630 = vst [vmem:[%s15926_s5] sm:$0xff] %v10618_v13 }
 0x511   : > { %12288 = vmatpush3.bf16.msra.mxu0 %v14307_v23  ;;  %12310 = vmatpush3.bf16.msra.mxu1 %v14308_v36 }
 0x512   : > { %12317 = vmatprep.subr.bf16.mxu0 %v14309_v38  ;;  %12339 = vmatprep.subr.bf16.mxu1 %v14310_v55 }
 0x514   : > { %10470 = vmatmul.mubr.bf16.vlgmr.msra.gmra.mrb[28].mxu0 %v15577_v19  ;;  %10510 = vmatmul.mubr.bf16.vlgmr.msra.gmra.mrb[28].mxu1 %v15660_v15  ;;  %v14319_v19 = vld [vmem:[%s14539_s28 + $0x2360] ss:$20 sps:$4 sm:$0xff]  }
 0x515   : > { %12318 = vmatpush3.bf16.msra.mxu0 %v14311_v27  ;;  %12340 = vmatpush3.bf16.msra.mxu1 %v14312_v37  ;;  %v14320_v15 = vld [vmem:[%s14539_s28 + $0x25e0] ss:$20 sps:$4 sm:$0xff]  }
 0x516   : > { %12319 = vmatprep.subr.bf16.mxu0 %v14313_v41  ;;  %12341 = vmatprep.subr.bf16.mxu1 %v14314_v42 }
 0x517   : > { %10549 = vmatprep.mubr.bf16.mxu0 %v15667_v26  ;;  %10589 = vmatprep.mubr.bf16.mxu1 %v15743_v30  ;;  %v14324_v26 = vld [vmem:[%s14539_s28 + $0x2608] ss:$20 sps:$4 sm:$0xff]   ;;  %v14325_v30 = vld [vmem:[%s14539_s28 + $0x24f0] ss:$20 sps:$4 sm:$0xff]  }
 0x519   : > { %12320 = vmatpush3.bf16.msra.mxu0 %v14315_v44  ;;  %12342 = vmatpush3.bf16.msra.mxu1 %v14316_v60 }
 0x51a   : > { %12321 = vmatprep.subr.bf16.mxu0 %v14317_v40  ;;  %12343 = vmatprep.subr.bf16.mxu1 %v14318_v34 }
 0x51d   : > { %12322 = vmatpush3.bf16.msra.mxu0 %v14319_v19  ;;  %12344 = vmatpush3.bf16.msra.mxu1 %v14320_v15 }
 0x51e   : > { %12323 = vmatprep.subr.bf16.mxu0 %v14321_v17  ;;  %12345 = vmatprep.subr.bf16.mxu1 %v14322_v10 }
 0x521   : > { %12324 = vmatpush3.bf16.msra.mxu0 %v14323_v48  ;;  %12346 = vmatpush3.bf16.msra.mxu1 %v14324_v26 }
 0x522   : > { %12325 = vmatprep.subr.bf16.mxu0 %v14325_v30  ;;  %12347 = vmatprep.subr.bf16.mxu1 %v14326_v8 }
 0x525   : > { %12326 = vmatpush3.bf16.msra.mxu0 %v14327_v39  ;;  %12348 = vmatpush3.bf16.msra.mxu1 %v14328_v50 }
 0x526   : > { %12327 = vmatprep.subr.bf16.mxu0 %v14329_v53  ;;  %12349 = vmatprep.subr.bf16.mxu1 %v14330_v63 }
 0x527   : > { %v12025_v58 = vpop.f32.mrb[4].mxu0  ;;  %v12047_v59 = vpop.f32.mrb[4].mxu1 }
 0x528   : > { %v12026_v16 = vpop.f32.mrb[5].mxu0  ;;  %v12048_v28 = vpop.f32.mrb[5].mxu1 }
 0x529   : > { %v12027_v61 = vadd.f32 %v12026_v16, %v12025_v58  ;;  %v12049_v0 = vadd.f32 %v12048_v28, %v12047_v59  ;;  %v12028_v1 = vpop.f32.mrb[6].mxu0  ;;  %v12050_v62 = vpop.f32.mrb[6].mxu1  ;;  %12328 = vmatpush3.bf16.msra.mxu0 %v14331_v56  ;;  %12350 = vmatpush3.bf16.msra.mxu1 %v14332_v46 }
 0x52a   : > { %v12029_v11 = vpop.f32.mrb[7].mxu0  ;;  %v12051_v5 = vpop.f32.mrb[7].mxu1  ;;  %12329 = vmatprep.subr.bf16.mxu0 %v14333_v29  ;;  %12351 = vmatprep.subr.bf16.mxu1 %v14334_v57 }
 0x52b   : > { %v10032_v7 = vadd.f32 %v12049_v0, %v12027_v61 }
 0x52d   : > { %12330 = vmatpush3.bf16.msra.mxu0 %v14335_v52  ;;  %12352 = vmatpush3.bf16.msra.mxu1 %v14336_v2 }
 0x52e   : > { %12331 = vmatprep.subr.bf16.mxu0 %v14337_v24  ;;  %12353 = vmatprep.subr.bf16.mxu1 %v14338_v47 }
 0x531   : > { %12332 = vmatpush3.bf16.msra.mxu0 %v14339_v9  ;;  %12354 = vmatpush3.bf16.msra.mxu1 %v14340_v12 }
 0x534   : > { %10550 = vmatmul.mubr.bf16.vlgmr.msra.gmra.mrb[32].mxu0 %v15735_v18  ;;  %10590 = vmatmul.mubr.bf16.vlgmr.msra.gmra.mrb[32].mxu1 %v15811_v21 }
 0x547   : > { %v12069_v22 = vpop.f32.mrb[8].mxu0  ;;  %v12091_v33 = vpop.f32.mrb[8].mxu1 }
 0x548   : > { %v12070_v45 = vpop.f32.mrb[9].mxu0  ;;  %v12092_v20 = vpop.f32.mrb[9].mxu1 }
 0x549   : > { %v12071_v32 = vadd.f32 %v12070_v45, %v12069_v22  ;;  %v12093_v6 = vadd.f32 %v12092_v20, %v12091_v33  ;;  %v12072_v49 = vpop.f32.mrb[10].mxu0  ;;  %v12094_v4 = vpop.f32.mrb[10].mxu1 }
 0x54a   : > { %v12073_v51 = vpop.f32.mrb[11].mxu0  ;;  %v12095_v14 = vpop.f32.mrb[11].mxu1 }
 0x54b   : > { %v10072_v54 = vadd.f32 %v12071_v32, %v10032_v7 }
 0x54d   : > { %v10112_v43 = vadd.f32 %v12093_v6, %v10072_v54 }
 0x567   : > { %v12113_v3 = vpop.f32.mrb[12].mxu0  ;;  %v12135_v31 = vpop.f32.mrb[12].mxu1 }
 0x568   : > { %v12114_v35 = vpop.f32.mrb[13].mxu0  ;;  %v12136_v13 = vpop.f32.mrb[13].mxu1 }
 0x569   : > { %v12115_v23 = vadd.f32 %v12114_v35, %v12113_v3  ;;  %v12137_v18 = vadd.f32 %v12136_v13, %v12135_v31  ;;  %v12116_v36 = vpop.f32.mrb[14].mxu0  ;;  %v12138_v21 = vpop.f32.mrb[14].mxu1 }
 0x56a   : > { %v12117_v38 = vpop.f32.mrb[15].mxu0  ;;  %v12139_v55 = vpop.f32.mrb[15].mxu1 }
 0x56b   : > { %v10152_v27 = vadd.f32 %v12115_v23, %v10112_v43  ;;  %v216_v55 = vld [vmem:[%s15926_s5 + $0x8] sm:$0x3] }
 0x56d   : > { %v10192_v37 = vadd.f32 %v12137_v18, %v10152_v27 }
 0x587   : > { %v12157_v41 = vpop.f32.mrb[16].mxu0  ;;  %v12179_v42 = vpop.f32.mrb[16].mxu1 }
 0x588   : > { %v12158_v44 = vpop.f32.mrb[17].mxu0  ;;  %v12180_v60 = vpop.f32.mrb[17].mxu1 }
 0x589   : > { %v12159_v40 = vadd.f32 %v12158_v44, %v12157_v41  ;;  %v12181_v34 = vadd.f32 %v12180_v60, %v12179_v42  ;;  %v12160_v19 = vpop.f32.mrb[18].mxu0  ;;  %v12182_v15 = vpop.f32.mrb[18].mxu1 }
 0x58a   : > { %v12161_v17 = vpop.f32.mrb[19].mxu0  ;;  %v12183_v10 = vpop.f32.mrb[19].mxu1 }
 0x58b   : > { %v10232_v48 = vadd.f32 %v12159_v40, %v10192_v37 }
 0x58d   : > { %v10272_v26 = vadd.f32 %v12181_v34, %v10232_v48 }
 0x5a7   : > { %v12201_v30 = vpop.f32.mrb[20].mxu0  ;;  %v12223_v8 = vpop.f32.mrb[20].mxu1 }
 0x5a8   : > { %v12202_v39 = vpop.f32.mrb[21].mxu0  ;;  %v12224_v50 = vpop.f32.mrb[21].mxu1 }
 0x5a9   : > { %v12203_v53 = vadd.f32 %v12202_v39, %v12201_v30  ;;  %v12225_v63 = vadd.f32 %v12224_v50, %v12223_v8  ;;  %v12204_v56 = vpop.f32.mrb[22].mxu0  ;;  %v12226_v46 = vpop.f32.mrb[22].mxu1 }
 0x5aa   : > { %v12205_v29 = vpop.f32.mrb[23].mxu0  ;;  %v12227_v57 = vpop.f32.mrb[23].mxu1 }
 0x5ab   : > { %v10312_v58 = vadd.f32 %v12203_v53, %v10272_v26 }
 0x5ad   : > { %v10352_v59 = vadd.f32 %v12225_v63, %v10312_v58 }
 0x5c7   : > { %v12245_v16 = vpop.f32.mrb[24].mxu0  ;;  %v12267_v28 = vpop.f32.mrb[24].mxu1 }
 0x5c8   : > { %v12246_v61 = vpop.f32.mrb[25].mxu0  ;;  %v12268_v0 = vpop.f32.mrb[25].mxu1 }
 0x5c9   : > { %v12247_v1 = vadd.f32 %v12246_v61, %v12245_v16  ;;  %v12269_v62 = vadd.f32 %v12268_v0, %v12267_v28  ;;  %v12248_v52 = vpop.f32.mrb[26].mxu0  ;;  %v12270_v2 = vpop.f32.mrb[26].mxu1 }
 0x5ca   : > { %v12249_v11 = vpop.f32.mrb[27].mxu0  ;;  %v12271_v5 = vpop.f32.mrb[27].mxu1 }
 0x5cb   : > { %v10392_v24 = vadd.f32 %v12247_v1, %v10352_v59 }
 0x5cd   : > { %v10432_v47 = vadd.f32 %v12269_v62, %v10392_v24 }
 0x5e7   : > { %v12289_v7 = vpop.f32.mrb[28].mxu0  ;;  %v12311_v9 = vpop.f32.mrb[28].mxu1 }
 0x5e8   : > { %v12290_v12 = vpop.f32.mrb[29].mxu0  ;;  %v12312_v22 = vpop.f32.mrb[29].mxu1 }
 0x5e9   : > { %v12291_v33 = vadd.f32 %v12290_v12, %v12289_v7  ;;  %v12313_v45 = vadd.f32 %v12312_v22, %v12311_v9  ;;  %v12292_v20 = vpop.f32.mrb[30].mxu0  ;;  %v12314_v32 = vpop.f32.mrb[30].mxu1 }
 0x5ea   : > { %v12293_v6 = vpop.f32.mrb[31].mxu0  ;;  %v12315_v49 = vpop.f32.mrb[31].mxu1 }
 0x5eb   : > { %v10472_v4 = vadd.f32 %v12291_v33, %v10432_v47 }
 0x5ed   : > { %v10512_v51 = vadd.f32 %v12313_v45, %v10472_v4 }
 0x607   : > { %v12333_v14 = vpop.f32.mrb[32].mxu0  ;;  %v12355_v54 = vpop.f32.mrb[32].mxu1 }
 0x608   : > { %v12334_v43 = vpop.f32.mrb[33].mxu0  ;;  %v12356_v3 = vpop.f32.mrb[33].mxu1 }
 0x609   : > { %v12335_v31 = vadd.f32 %v12334_v43, %v12333_v14  ;;  %v12357_v35 = vadd.f32 %v12356_v3, %v12355_v54  ;;  %v12336_v13 = vpop.f32.mrb[34].mxu0  ;;  %v12358_v23 = vpop.f32.mrb[34].mxu1 }
 0x60a   : > { %v12337_v18 = vpop.f32.mrb[35].mxu0  ;;  %v12359_v36 = vpop.f32.mrb[35].mxu1 }
 0x60b   : > { %v10552_v21 = vadd.f32 %v12335_v31, %v10512_v51 }
 0x60d   : > { %v10592_v38 = vadd.f32 %v12357_v35, %v10552_v21 }
 0x60f   : > { %v10625_v27 = vrot.slane %v10592_v38, %v16066_v25 }
 0x611   : > { %v10629_v37 = vadd.f32 %v10625_v27, %v216_v55 }
 0x613   : > { %10631 = vst [vmem:[%s15926_s5 + $0x8] sm:$0x3] %v10629_v37 }
 0x614 PF: > { %s15_s14 = sadd.s32 1, %s14425_s14   ;;  %s16141_s9 = smov %s14409_s10 }
 0x615   : > { %p12_p4 = scmp.ge.s32.totalorder %s15_s14, 4   ;;  %s16142_s10 = smov %s14413_s11 }
 0x616   : > { %s16143_s11 = smov %s14493_s20  ;;  %s16144_s12 = smov %s14421_s13 }
 0x617   : > { %s16145_s13 = smov %s16147_s16  ;;  %14 = sbr.rel (!%p12_p4) target bundleno = 4 (0x4), region = 75 }
 0x61e   :  { %10653 = vsyncpa [#allocation3], 1 }
 0x61f   :  { %10655 = vsyncpa [#allocation3 + $0x1], 1 }

</bundles_post_ra>
